<compile_context>
chip_gen: v5e
topology: v5e:2x2
jax: 0.10.0
libtpu: 0.0.40
codegen_flags: <defaults>
</compile_context>

<pallas_src>
import functools

import jax
import jax.numpy as jnp
import numpy as np
from jax import lax
from jax.experimental import pallas as pl
from jax.experimental.pallas import tpu as pltpu


def _cswin_kernel(q_ref, k_ref, v_ref, tw_ref, b_ref, o_ref, *,
                  scale, W_sp, tpu_native):
    Bt, Hh, N, D = q_ref.shape        # windows-in-block, heads, tokens, head_dim
    C = Hh * D
    BH = Bt * Hh

    q = q_ref[...]                    # (Bt, Hh, N, D) in compute dtype
    k = k_ref[...]
    v = v_ref[...]

    # ---- attention: softmax((q @ k^T) * scale) @ v, f32 accumulation --------
    q3 = q.reshape(BH, N, D)
    k3 = k.reshape(BH, N, D)
    v3 = v.reshape(BH, N, D)
    s = jnp.einsum('bnd,bmd->bnm', q3, k3,
                   preferred_element_type=jnp.float32) * scale      # (BH, N, N)
    s = s - jnp.max(s, axis=-1, keepdims=True)
    p = jnp.exp(s)
    denom = jnp.sum(p, axis=-1, keepdims=True)
    if tpu_native:
        p = p * pl.reciprocal(denom, approx=True)    # EUP slot on hardware
    else:
        p = p / denom                                # exact divide off-TPU
    # TODO(synk): attn_drop is nn.Dropout(0.0) -> identity; dropout not implemented.
    av = jnp.einsum('bnm,bmd->bnd', p.astype(v.dtype), v3,
                    preferred_element_type=jnp.float32)             # (BH, N, D) f32

    # ---- merge heads once: lane-dense (Bt, N, C) for everything below -------
    out = av.reshape(Bt, Hh, N, D).transpose(0, 2, 1, 3).reshape(Bt, N, C)
    vm = v.transpose(0, 2, 1, 3).reshape(Bt, N, C)   # merged-head v, compute dtype

    out = out + b_ref[...].astype(jnp.float32)       # depthwise-conv bias (1, C)

    # ---- LePE: zero-padded depthwise 3x3 conv over each (H_sp, W_sp) window --
    # Validity masks and conv taps are pre-folded into tw_ref (9, N, C); each
    # tap is a static token rotate + one multiply-add (narrow mul, f32 acc).
    tw = tw_ref[...]
    tap = 0
    for di in (-1, 0, 1):
        for dj in (-1, 0, 1):
            off = di * W_sp + dj
            if off == 0:
                shifted = vm
            else:
                shift = (-off) % N
                if tpu_native:
                    shifted = pltpu.roll(vm, shift, 1)     # XLU rotate over tokens
                else:
                    shifted = jnp.roll(vm, shift, axis=1)  # portable fallback
            out = out + shifted * tw[tap]
            tap += 1

    o_ref[...] = out.astype(o_ref.dtype)


def _pick_bw_tile(n_windows, heads, N, D, C, itemsize, vmem_budget_bytes):
    """Largest windows-per-step block that fits the VMEM budget."""
    def step_bytes(t):
        qkv_blk = 3 * t * heads * N * D * itemsize * 2      # double-buffered inputs
        out_blk = t * N * C * itemsize * 2                   # double-buffered output
        live = t * heads * N * N * 4 + 3 * t * N * C * 4     # f32 scores + acc/lepe/vm
        return qkv_blk + out_blk + live + 9 * N * C * itemsize

    best = 1
    for t in range(1, n_windows + 1):
        if step_bytes(t) <= vmem_budget_bytes:
            best = t
    # Prefer an even number (>=2) of grid steps so the 'parallel' axis splits
    # across both TensorCores on megacore parts, without shrinking the tile
    # below half the largest fitting size; prefer exact divisors (no padding).
    cands = [t for t in range(max(1, best // 2), best + 1)
             if pl.cdiv(n_windows, t) >= 2 and pl.cdiv(n_windows, t) % 2 == 0]
    div_cands = [t for t in cands if n_windows % t == 0]
    if div_cands:
        return max(div_cands)
    if cands:
        return max(cands)
    divs = [t for t in range(max(1, best // 2), best + 1) if n_windows % t == 0]
    return max(divs) if divs else best


def cswin_attention(qkv, conv_w, conv_b, *, H, W, H_sp, W_sp, num_heads, scale,
                    bw_tile=None, compute_dtype=None,
                    vmem_budget_bytes=24 * 1024 * 1024,
                    vmem_limit_bytes=40 * 1024 * 1024):
    """qkv: (3, B, L, C) with L = H*W.  conv_w: (C,1,3,3), conv_b: (C,)."""
    q, k, v = qkv[0], qkv[1], qkv[2]
    B, L, C = q.shape
    assert L == H * W
    D = C // num_heads
    N = H_sp * W_sp
    nWh, nWw = H // H_sp, W // W_sp
    Bw = B * nWh * nWw

    out_dtype = q.dtype
    cdt = np.dtype(compute_dtype) if compute_dtype is not None else q.dtype

    def to_windows(x):                                  # im2cswin (layout glue)
        x = x.reshape(B, nWh, H_sp, nWw, W_sp, C)
        x = x.transpose(0, 1, 3, 2, 4, 5).reshape(Bw, N, num_heads, D)
        return x.transpose(0, 2, 1, 3).astype(cdt)      # (Bw, heads, N, D)

    qw, kw, vw = to_windows(q), to_windows(k), to_windows(v)

    # LePE tap weights: fold the 3x3 depthwise taps AND the zero-padding
    # validity masks into one (9, N, C) tensor (hoisted out of the kernel loop).
    w9 = conv_w.reshape(C, 9).astype(jnp.float32).T                   # (9, C)
    rows = np.arange(N) // W_sp
    cols = np.arange(N) % W_sp
    masks = np.empty((9, N), dtype=np.float32)
    tap = 0
    for di in (-1, 0, 1):
        for dj in (-1, 0, 1):
            masks[tap] = ((rows + di >= 0) & (rows + di < H_sp) &
                          (cols + dj >= 0) & (cols + dj < W_sp)).astype(np.float32)
            tap += 1
    tapw = (jnp.asarray(masks)[:, :, None] * w9[:, None, :]).astype(cdt)  # (9, N, C)
    bias = conv_b.reshape(1, C).astype(jnp.float32)

    if bw_tile is None:
        bw_tile = _pick_bw_tile(Bw, num_heads, N, D, C, cdt.itemsize,
                                vmem_budget_bytes)
    n_steps = pl.cdiv(Bw, bw_tile)
    Bw_pad = n_steps * bw_tile
    if Bw_pad != Bw:                                    # ragged tail -> pad windows
        pad = ((0, Bw_pad - Bw), (0, 0), (0, 0), (0, 0))
        qw, kw, vw = jnp.pad(qw, pad), jnp.pad(kw, pad), jnp.pad(vw, pad)

    tpu_native = jax.default_backend() == "tpu"
    kernel = functools.partial(_cswin_kernel, scale=scale, W_sp=W_sp,
                               tpu_native=tpu_native)

    out = pl.pallas_call(
        kernel,
        out_shape=jax.ShapeDtypeStruct((Bw_pad, N, C), out_dtype),
        grid_spec=pltpu.PrefetchScalarGridSpec(
            num_scalar_prefetch=0,
            grid=(n_steps,),
            in_specs=[
                pl.BlockSpec((bw_tile, num_heads, N, D), lambda b: (b, 0, 0, 0)),
                pl.BlockSpec((bw_tile, num_heads, N, D), lambda b: (b, 0, 0, 0)),
                pl.BlockSpec((bw_tile, num_heads, N, D), lambda b: (b, 0, 0, 0)),
                # constant block index -> tap weights / bias DMAed once
                pl.BlockSpec((9, N, C), lambda b: (0, 0, 0)),
                pl.BlockSpec((1, C), lambda b: (0, 0)),
            ],
            out_specs=pl.BlockSpec((bw_tile, N, C), lambda b: (b, 0, 0)),
        ),
        compiler_params=pltpu.CompilerParams(
            dimension_semantics=("parallel",),
            vmem_limit_bytes=vmem_limit_bytes),
    )(qw, kw, vw, tapw, bias)

    out = out[:Bw]
    # windows2img (layout glue); heads were already merged lane-dense in-kernel.
    x = out.reshape(B, nWh, nWw, H_sp, W_sp, C).transpose(0, 1, 3, 2, 4, 5)
    return x.reshape(B, H * W, C)


def _reference(qkv, weight, bias, *, H, W, H_sp, W_sp, num_heads, scale):
    """Pure-JAX mirror of the PyTorch forward (for validation)."""
    q, k, v = qkv[0], qkv[1], qkv[2]
    B, L, C = q.shape
    D = C // num_heads
    N = H_sp * W_sp
    nWh, nWw = H // H_sp, W // W_sp

    def im2cswin(x):
        x = x.reshape(B, H, W, C)
        x = x.reshape(B, nWh, H_sp, nWw, W_sp, C).transpose(0, 1, 3, 2, 4, 5)
        x = x.reshape(-1, N, num_heads, D).transpose(0, 2, 1, 3)
        return x

    qh, kh = im2cswin(q), im2cswin(k)

    xv = v.reshape(B, H, W, C).transpose(0, 3, 1, 2)                 # B C H W
    xv = xv.reshape(B, C, nWh, H_sp, nWw, W_sp).transpose(0, 2, 4, 1, 3, 5)
    xv = xv.reshape(-1, C, H_sp, W_sp)                               # Bw C Hs Ws
    lepe = lax.conv_general_dilated(
        xv, weight, (1, 1), ((1, 1), (1, 1)),
        feature_group_count=C,
        dimension_numbers=("NCHW", "OIHW", "NCHW"))
    lepe = lepe + bias[None, :, None, None]
    lepe = lepe.reshape(-1, num_heads, D, N).transpose(0, 1, 3, 2)
    vh = xv.reshape(-1, num_heads, D, N).transpose(0, 1, 3, 2)

    attn = (qh * scale) @ jnp.swapaxes(kh, -2, -1)
    attn = jax.nn.softmax(attn, axis=-1)
    x = attn @ vh + lepe
    x = jnp.swapaxes(x, 1, 2).reshape(-1, N, C)
    x = x.reshape(B, nWh, nWw, H_sp, W_sp, C).transpose(0, 1, 3, 2, 4, 5)
    return x.reshape(B, H * W, C)


if __name__ == "__main__":
    # module config: CSWAttention(dim=32, resolution=(8,8), idx=0, split_size=4, num_heads=4)
    B, H, W = 2, 8, 8
    dim, num_heads, split_size, idx = 32, 4, 4, 0
    if idx == -1:
        H_sp, W_sp = H, W
    elif idx == 0:
        H_sp, W_sp = H, split_size
    else:
        W_sp, H_sp = W, split_size
    head_dim = dim // num_heads
    scale = head_dim ** (-0.5)
    L = H * W

    key = jax.random.PRNGKey(0)
    k_qkv, k_w, k_b = jax.random.split(key, 3)
    qkv = jax.random.normal(k_qkv, (3, B, L, dim), jnp.float32)
    # deterministic params for get_v = nn.Conv2d(dim, dim, 3, padding=1, groups=dim)
    conv_w = jax.random.normal(k_w, (dim, 1, 3, 3), jnp.float32) * 0.1
    conv_b = jax.random.normal(k_b, (dim,), jnp.float32) * 0.1

    out = cswin_attention(qkv, conv_w, conv_b, H=H, W=W, H_sp=H_sp, W_sp=W_sp,
                          num_heads=num_heads, scale=scale)
    out = jax.block_until_ready(out)

    ref = _reference(qkv, conv_w, conv_b, H=H, W=W, H_sp=H_sp, W_sp=W_sp,
                     num_heads=num_heads, scale=scale)
    np.testing.assert_allclose(np.asarray(out), np.asarray(ref), rtol=2e-2, atol=2e-2)
    print("KERNEL_OK")
</pallas_src>

<mosaic_0001>
module attributes {stable_mosaic.version = 11 : i64} {
  func.func @_cswin_kernel(%arg0: i32, %arg1: memref<2x4x32x8xf32, #tpu.memory_space<vmem>>, %arg2: memref<2x4x32x8xf32, #tpu.memory_space<vmem>>, %arg3: memref<2x4x32x8xf32, #tpu.memory_space<vmem>>, %arg4: memref<9x32x32xf32, #tpu.memory_space<vmem>>, %arg5: memref<1x32xf32, #tpu.memory_space<vmem>>, %arg6: memref<2x32x32xf32, #tpu.memory_space<vmem>>) attributes {dimension_semantics = [#tpu.dimension_semantics<parallel>], iteration_bounds = array<i64: 2>, scalar_prefetch = 0 : i64, scratch_operands = 0 : i64, tpu.core_type = #tpu.core_type<tc>, window_params = [{transform_indices = @transform_0, window_bounds = array<i64: 2, 4, 32, 8>}, {transform_indices = @transform_1, window_bounds = array<i64: 2, 4, 32, 8>}, {transform_indices = @transform_2, window_bounds = array<i64: 2, 4, 32, 8>}, {pipeline_mode = #tpu.pipeline_mode<synchronous>, transform_indices = @transform_3, window_bounds = array<i64: 9, 32, 32>}, {pipeline_mode = #tpu.pipeline_mode<synchronous>, transform_indices = @transform_4, window_bounds = array<i64: 1, 32>}, {transform_indices = @transform_5, window_bounds = array<i64: 2, 32, 32>}]} {
    %c0 = arith.constant 0 : index
    %c0_0 = arith.constant 0 : index
    %c0_1 = arith.constant 0 : index
    %c0_2 = arith.constant 0 : index
    %0 = vector.load %arg1[%c0, %c0_0, %c0_1, %c0_2] : memref<2x4x32x8xf32, #tpu.memory_space<vmem>>, vector<2x4x32x8xf32>
    %c0_3 = arith.constant 0 : index
    %c0_4 = arith.constant 0 : index
    %c0_5 = arith.constant 0 : index
    %c0_6 = arith.constant 0 : index
    %1 = vector.load %arg2[%c0_3, %c0_4, %c0_5, %c0_6] : memref<2x4x32x8xf32, #tpu.memory_space<vmem>>, vector<2x4x32x8xf32>
    %c0_7 = arith.constant 0 : index
    %c0_8 = arith.constant 0 : index
    %c0_9 = arith.constant 0 : index
    %c0_10 = arith.constant 0 : index
    %2 = vector.load %arg3[%c0_7, %c0_8, %c0_9, %c0_10] : memref<2x4x32x8xf32, #tpu.memory_space<vmem>>, vector<2x4x32x8xf32>
    %3 = vector.shape_cast %0 : vector<2x4x32x8xf32> to vector<8x32x8xf32>
    %4 = vector.shape_cast %1 : vector<2x4x32x8xf32> to vector<8x32x8xf32>
    %5 = vector.shape_cast %2 : vector<2x4x32x8xf32> to vector<8x32x8xf32>
    "tpu.trace_start"() <{level = 10 : i32, message = "bnd,bmd->bnm"}> : () -> ()
    %cst = arith.constant dense<0.000000e+00> : vector<8x32x32xf32>
    %6 = tpu.matmul %3, %4, %cst {dimension_numbers = #tpu.dot_dimension_numbers<[2], [2], [1], [1], [0, 0, 0, 1, 1, 1], [0], [0]>} : vector<8x32x8xf32>, vector<8x32x8xf32>, vector<8x32x32xf32> -> vector<8x32x32xf32>
    "tpu.trace_stop"() : () -> ()
    %cst_11 = arith.constant 0.353553385 : f32
    %7 = vector.broadcast %cst_11 : f32 to vector<8x32x32xf32>
    %8 = arith.mulf %6, %7 : vector<8x32x32xf32>
    %cst_12 = arith.constant dense<0xFF800000> : vector<8x32xf32>
    %9 = vector.multi_reduction <maximumf>, %8, %cst_12 [2] : vector<8x32x32xf32> to vector<8x32xf32>
    %10 = vector.shape_cast %9 : vector<8x32xf32> to vector<8x32x1xf32>
    %11 = vector.broadcast %10 : vector<8x32x1xf32> to vector<8x32x32xf32>
    %12 = arith.subf %8, %11 : vector<8x32x32xf32>
    %13 = math.exp %12 : vector<8x32x32xf32>
    %cst_13 = arith.constant dense<0.000000e+00> : vector<8x32xf32>
    %14 = vector.multi_reduction <add>, %13, %cst_13 [2] : vector<8x32x32xf32> to vector<8x32xf32>
    %15 = vector.shape_cast %14 : vector<8x32xf32> to vector<8x32x1xf32>
    %16 = vector.broadcast %15 : vector<8x32x1xf32> to vector<8x32x32xf32>
    %17 = arith.divf %13, %16 : vector<8x32x32xf32>
    "tpu.trace_start"() <{level = 10 : i32, message = "bnm,bmd->bnd"}> : () -> ()
    %cst_14 = arith.constant dense<0.000000e+00> : vector<8x32x8xf32>
    %18 = tpu.matmul %17, %5, %cst_14 {dimension_numbers = #tpu.dot_dimension_numbers<[2], [1], [1], [2], [0, 0, 0, 1, 1, 2], [0], [0]>} : vector<8x32x32xf32>, vector<8x32x8xf32>, vector<8x32x8xf32> -> vector<8x32x8xf32>
    "tpu.trace_stop"() : () -> ()
    %19 = vector.shape_cast %18 : vector<8x32x8xf32> to vector<2x4x32x8xf32>
    %20 = tpu.transpose %19, [0, 2, 1, 3] : vector<2x4x32x8xf32> -> vector<2x32x4x8xf32>
    %21 = vector.shape_cast %20 : vector<2x32x4x8xf32> to vector<2x32x32xf32>
    %22 = tpu.transpose %2, [0, 2, 1, 3] : vector<2x4x32x8xf32> -> vector<2x32x4x8xf32>
    %23 = vector.shape_cast %22 : vector<2x32x4x8xf32> to vector<2x32x32xf32>
    %c0_15 = arith.constant 0 : index
    %c0_16 = arith.constant 0 : index
    %24 = vector.load %arg5[%c0_15, %c0_16] : memref<1x32xf32, #tpu.memory_space<vmem>>, vector<1x32xf32>
    %25 = vector.shape_cast %24 : vector<1x32xf32> to vector<1x1x32xf32>
    %26 = vector.broadcast %25 : vector<1x1x32xf32> to vector<2x32x32xf32>
    %27 = arith.addf %21, %26 : vector<2x32x32xf32>
    %c0_17 = arith.constant 0 : index
    %c0_18 = arith.constant 0 : index
    %c0_19 = arith.constant 0 : index
    %28 = vector.load %arg4[%c0_17, %c0_18, %c0_19] : memref<9x32x32xf32, #tpu.memory_space<vmem>>, vector<9x32x32xf32>
    %29 = vector.extract_strided_slice %23 {offsets = [0, 27, 0], sizes = [2, 5, 32], strides = [1, 1, 1]} : vector<2x32x32xf32> to vector<2x5x32xf32>
    %30 = vector.extract_strided_slice %23 {offsets = [0, 0, 0], sizes = [2, 27, 32], strides = [1, 1, 1]} : vector<2x32x32xf32> to vector<2x27x32xf32>
    %31 = tpu.concatenate %29, %30 in 1 : vector<2x5x32xf32>, vector<2x27x32xf32> -> vector<2x32x32xf32>
    %32 = vector.extract_strided_slice %28 {offsets = [0, 0, 0], sizes = [1, 32, 32], strides = [1, 1, 1]} : vector<9x32x32xf32> to vector<1x32x32xf32>
    %33 = vector.shape_cast %32 : vector<1x32x32xf32> to vector<32x32xf32>
    %34 = vector.shape_cast %33 : vector<32x32xf32> to vector<1x32x32xf32>
    %35 = vector.broadcast %34 : vector<1x32x32xf32> to vector<2x32x32xf32>
    %36 = arith.mulf %31, %35 : vector<2x32x32xf32>
    %37 = arith.addf %27, %36 : vector<2x32x32xf32>
    %38 = vector.extract_strided_slice %23 {offsets = [0, 28, 0], sizes = [2, 4, 32], strides = [1, 1, 1]} : vector<2x32x32xf32> to vector<2x4x32xf32>
    %39 = vector.extract_strided_slice %23 {offsets = [0, 0, 0], sizes = [2, 28, 32], strides = [1, 1, 1]} : vector<2x32x32xf32> to vector<2x28x32xf32>
    %40 = tpu.concatenate %38, %39 in 1 : vector<2x4x32xf32>, vector<2x28x32xf32> -> vector<2x32x32xf32>
    %41 = vector.extract_strided_slice %28 {offsets = [1, 0, 0], sizes = [1, 32, 32], strides = [1, 1, 1]} : vector<9x32x32xf32> to vector<1x32x32xf32>
    %42 = vector.shape_cast %41 : vector<1x32x32xf32> to vector<32x32xf32>
    %43 = vector.shape_cast %42 : vector<32x32xf32> to vector<1x32x32xf32>
    %44 = vector.broadcast %43 : vector<1x32x32xf32> to vector<2x32x32xf32>
    %45 = arith.mulf %40, %44 : vector<2x32x32xf32>
    %46 = arith.addf %37, %45 : vector<2x32x32xf32>
    %47 = vector.extract_strided_slice %23 {offsets = [0, 29, 0], sizes = [2, 3, 32], strides = [1, 1, 1]} : vector<2x32x32xf32> to vector<2x3x32xf32>
    %48 = vector.extract_strided_slice %23 {offsets = [0, 0, 0], sizes = [2, 29, 32], strides = [1, 1, 1]} : vector<2x32x32xf32> to vector<2x29x32xf32>
    %49 = tpu.concatenate %47, %48 in 1 : vector<2x3x32xf32>, vector<2x29x32xf32> -> vector<2x32x32xf32>
    %50 = vector.extract_strided_slice %28 {offsets = [2, 0, 0], sizes = [1, 32, 32], strides = [1, 1, 1]} : vector<9x32x32xf32> to vector<1x32x32xf32>
    %51 = vector.shape_cast %50 : vector<1x32x32xf32> to vector<32x32xf32>
    %52 = vector.shape_cast %51 : vector<32x32xf32> to vector<1x32x32xf32>
    %53 = vector.broadcast %52 : vector<1x32x32xf32> to vector<2x32x32xf32>
    %54 = arith.mulf %49, %53 : vector<2x32x32xf32>
    %55 = arith.addf %46, %54 : vector<2x32x32xf32>
    %56 = vector.extract_strided_slice %23 {offsets = [0, 31, 0], sizes = [2, 1, 32], strides = [1, 1, 1]} : vector<2x32x32xf32> to vector<2x1x32xf32>
    %57 = vector.extract_strided_slice %23 {offsets = [0, 0, 0], sizes = [2, 31, 32], strides = [1, 1, 1]} : vector<2x32x32xf32> to vector<2x31x32xf32>
    %58 = tpu.concatenate %56, %57 in 1 : vector<2x1x32xf32>, vector<2x31x32xf32> -> vector<2x32x32xf32>
    %59 = vector.extract_strided_slice %28 {offsets = [3, 0, 0], sizes = [1, 32, 32], strides = [1, 1, 1]} : vector<9x32x32xf32> to vector<1x32x32xf32>
    %60 = vector.shape_cast %59 : vector<1x32x32xf32> to vector<32x32xf32>
    %61 = vector.shape_cast %60 : vector<32x32xf32> to vector<1x32x32xf32>
    %62 = vector.broadcast %61 : vector<1x32x32xf32> to vector<2x32x32xf32>
    %63 = arith.mulf %58, %62 : vector<2x32x32xf32>
    %64 = arith.addf %55, %63 : vector<2x32x32xf32>
    %65 = vector.extract_strided_slice %28 {offsets = [4, 0, 0], sizes = [1, 32, 32], strides = [1, 1, 1]} : vector<9x32x32xf32> to vector<1x32x32xf32>
    %66 = vector.shape_cast %65 : vector<1x32x32xf32> to vector<32x32xf32>
    %67 = vector.shape_cast %66 : vector<32x32xf32> to vector<1x32x32xf32>
    %68 = vector.broadcast %67 : vector<1x32x32xf32> to vector<2x32x32xf32>
    %69 = arith.mulf %23, %68 : vector<2x32x32xf32>
    %70 = arith.addf %64, %69 : vector<2x32x32xf32>
    %71 = vector.extract_strided_slice %23 {offsets = [0, 1, 0], sizes = [2, 31, 32], strides = [1, 1, 1]} : vector<2x32x32xf32> to vector<2x31x32xf32>
    %72 = vector.extract_strided_slice %23 {offsets = [0, 0, 0], sizes = [2, 1, 32], strides = [1, 1, 1]} : vector<2x32x32xf32> to vector<2x1x32xf32>
    %73 = tpu.concatenate %71, %72 in 1 : vector<2x31x32xf32>, vector<2x1x32xf32> -> vector<2x32x32xf32>
    %74 = vector.extract_strided_slice %28 {offsets = [5, 0, 0], sizes = [1, 32, 32], strides = [1, 1, 1]} : vector<9x32x32xf32> to vector<1x32x32xf32>
    %75 = vector.shape_cast %74 : vector<1x32x32xf32> to vector<32x32xf32>
    %76 = vector.shape_cast %75 : vector<32x32xf32> to vector<1x32x32xf32>
    %77 = vector.broadcast %76 : vector<1x32x32xf32> to vector<2x32x32xf32>
    %78 = arith.mulf %73, %77 : vector<2x32x32xf32>
    %79 = arith.addf %70, %78 : vector<2x32x32xf32>
    %80 = vector.extract_strided_slice %23 {offsets = [0, 3, 0], sizes = [2, 29, 32], strides = [1, 1, 1]} : vector<2x32x32xf32> to vector<2x29x32xf32>
    %81 = vector.extract_strided_slice %23 {offsets = [0, 0, 0], sizes = [2, 3, 32], strides = [1, 1, 1]} : vector<2x32x32xf32> to vector<2x3x32xf32>
    %82 = tpu.concatenate %80, %81 in 1 : vector<2x29x32xf32>, vector<2x3x32xf32> -> vector<2x32x32xf32>
    %83 = vector.extract_strided_slice %28 {offsets = [6, 0, 0], sizes = [1, 32, 32], strides = [1, 1, 1]} : vector<9x32x32xf32> to vector<1x32x32xf32>
    %84 = vector.shape_cast %83 : vector<1x32x32xf32> to vector<32x32xf32>
    %85 = vector.shape_cast %84 : vector<32x32xf32> to vector<1x32x32xf32>
    %86 = vector.broadcast %85 : vector<1x32x32xf32> to vector<2x32x32xf32>
    %87 = arith.mulf %82, %86 : vector<2x32x32xf32>
    %88 = arith.addf %79, %87 : vector<2x32x32xf32>
    %89 = vector.extract_strided_slice %23 {offsets = [0, 4, 0], sizes = [2, 28, 32], strides = [1, 1, 1]} : vector<2x32x32xf32> to vector<2x28x32xf32>
    %90 = vector.extract_strided_slice %23 {offsets = [0, 0, 0], sizes = [2, 4, 32], strides = [1, 1, 1]} : vector<2x32x32xf32> to vector<2x4x32xf32>
    %91 = tpu.concatenate %89, %90 in 1 : vector<2x28x32xf32>, vector<2x4x32xf32> -> vector<2x32x32xf32>
    %92 = vector.extract_strided_slice %28 {offsets = [7, 0, 0], sizes = [1, 32, 32], strides = [1, 1, 1]} : vector<9x32x32xf32> to vector<1x32x32xf32>
    %93 = vector.shape_cast %92 : vector<1x32x32xf32> to vector<32x32xf32>
    %94 = vector.shape_cast %93 : vector<32x32xf32> to vector<1x32x32xf32>
    %95 = vector.broadcast %94 : vector<1x32x32xf32> to vector<2x32x32xf32>
    %96 = arith.mulf %91, %95 : vector<2x32x32xf32>
    %97 = arith.addf %88, %96 : vector<2x32x32xf32>
    %98 = vector.extract_strided_slice %23 {offsets = [0, 5, 0], sizes = [2, 27, 32], strides = [1, 1, 1]} : vector<2x32x32xf32> to vector<2x27x32xf32>
    %99 = vector.extract_strided_slice %23 {offsets = [0, 0, 0], sizes = [2, 5, 32], strides = [1, 1, 1]} : vector<2x32x32xf32> to vector<2x5x32xf32>
    %100 = tpu.concatenate %98, %99 in 1 : vector<2x27x32xf32>, vector<2x5x32xf32> -> vector<2x32x32xf32>
    %101 = vector.extract_strided_slice %28 {offsets = [8, 0, 0], sizes = [1, 32, 32], strides = [1, 1, 1]} : vector<9x32x32xf32> to vector<1x32x32xf32>
    %102 = vector.shape_cast %101 : vector<1x32x32xf32> to vector<32x32xf32>
    %103 = vector.shape_cast %102 : vector<32x32xf32> to vector<1x32x32xf32>
    %104 = vector.broadcast %103 : vector<1x32x32xf32> to vector<2x32x32xf32>
    %105 = arith.mulf %100, %104 : vector<2x32x32xf32>
    %106 = arith.addf %97, %105 : vector<2x32x32xf32>
    %c0_20 = arith.constant 0 : index
    %c0_21 = arith.constant 0 : index
    %c0_22 = arith.constant 0 : index
    %107 = vector.load %arg6[%c0_20, %c0_21, %c0_22] : memref<2x32x32xf32, #tpu.memory_space<vmem>>, vector<2x32x32xf32>
    tpu.vector_store %arg6[%c0_20, %c0_21, %c0_22], %106 {strides = array<i32>} : memref<2x32x32xf32, #tpu.memory_space<vmem>>, vector<2x32x32xf32>,
    return
  }
  func.func @transform_0(%arg0: i32) -> (i32, i32, i32, i32) {
    %c0_i32 = arith.constant 0 : i32
    %c0_i32_0 = arith.constant 0 : i32
    %c0_i32_1 = arith.constant 0 : i32
    %c0_i32_2 = arith.constant 0 : i32
    return %arg0, %c0_i32, %c0_i32_0, %c0_i32_1 : i32, i32, i32, i32
  }
  func.func @transform_1(%arg0: i32) -> (i32, i32, i32, i32) {
    %c0_i32 = arith.constant 0 : i32
    %c0_i32_0 = arith.constant 0 : i32
    %c0_i32_1 = arith.constant 0 : i32
    %c0_i32_2 = arith.constant 0 : i32
    return %arg0, %c0_i32, %c0_i32_0, %c0_i32_1 : i32, i32, i32, i32
  }
  func.func @transform_2(%arg0: i32) -> (i32, i32, i32, i32) {
    %c0_i32 = arith.constant 0 : i32
    %c0_i32_0 = arith.constant 0 : i32
    %c0_i32_1 = arith.constant 0 : i32
    %c0_i32_2 = arith.constant 0 : i32
    return %arg0, %c0_i32, %c0_i32_0, %c0_i32_1 : i32, i32, i32, i32
  }
  func.func @transform_3(%arg0: i32) -> (i32, i32, i32) {
    %c0_i32 = arith.constant 0 : i32
    %c0_i32_0 = arith.constant 0 : i32
    %c0_i32_1 = arith.constant 0 : i32
    %c0_i32_2 = arith.constant 0 : i32
    return %c0_i32, %c0_i32_0, %c0_i32_1 : i32, i32, i32
  }
  func.func @transform_4(%arg0: i32) -> (i32, i32) {
    %c0_i32 = arith.constant 0 : i32
    %c0_i32_0 = arith.constant 0 : i32
    %c0_i32_1 = arith.constant 0 : i32
    return %c0_i32, %c0_i32_0 : i32, i32
  }
  func.func @transform_5(%arg0: i32) -> (i32, i32, i32) {
    %c0_i32 = arith.constant 0 : i32
    %c0_i32_0 = arith.constant 0 : i32
    %c0_i32_1 = arith.constant 0 : i32
    return %arg0, %c0_i32, %c0_i32_0 : i32, i32, i32
  }
}

</mosaic_0001>

<bundles_post_ra>
// kernel: tpu_custom_call.1
= control target key start
LH: loop header
LB: loop body
LE: loop exit
PB: predicated region body
PF: predicated region fallthrough
CT: control target
= control target key end

     0   :  { %10 = vsyncpa [#allocation3], 0  ;;  %s8233_s0 = inlined_call_operand.vmem [shape: f32[4,4,32,8], index: 0, kind: input, shape index: {}]   ;;  %s8234_s1 = inlined_call_operand.vmem [shape: f32[4,4,32,8], index: 1, kind: input, shape index: {}]   ;;  %s8235_s2 = inlined_call_operand.vmem [shape: f32[4,4,32,8], index: 2, kind: input, shape index: {}]   ;;  %s8236_s3 = inlined_call_operand.vmem [shape: f32[9,32,32], index: 3, kind: input, shape index: {}]   ;;  %s8237_s4 = inlined_call_operand.vmem [shape: f32[1,32], index: 4, kind: input, shape index: {}]   ;;  %s8238_s5 = inlined_call_operand.hbm [shape: f32[4,32,32], index: 5, kind: output, shape index: {}]  }
   0x1   :  { %12 = vsyncpa [#allocation3 + $0x1], 0  ;;  %s4773_s18 = smov 0   ;;  %s4775_s19 = smov 0  }
   0x2   :  { %s4777_s20 = smov 0   ;;  %s4779_s21 = smov 0  }
   0x3 LB: > { %s4794_s22 = sadd.s32 4294967295, %s4735_s21   ;;  %s4378_s23 = sadd.s32 4294967294, %s4735_s21   ;;  %s4735_s21 = sphi %s4779_s21, %s8476_s21   ;;  %s4731_s20 = sphi %s4777_s20, %s8475_s20   ;;  %s4727_s19 = sphi %s4775_s19, %s8474_s19   ;;  %s4723_s18 = sphi %s4773_s18, %s8473_s18  }
   0x4   : > { %s4798_s24 = sadd.s32 1, %s4735_s21   ;;  %s145_s25 = sadd.s32 1, %s4731_s20 }
   0x5   : > { %s142_s26 = ssub.s32 %s4735_s21, %s4798_s24  ;;  %p155_p0 = scmp.ne.s32.totalorder %s4731_s20, %s4727_s19 }
   0x6   : > { %p143_p1 = scmp.eq.s32.totalorder %s142_s26, 0  ;;  %p156_p2 = scmp.eq.s32.totalorder %s4794_s22, 1 }
   0x7   : > { %p161_p3 = scmp.ne.s32.totalorder %s4727_s19, %s4723_s18  ;;  %p162_p4 = scmp.eq.s32.totalorder %s4378_s23, 1 }
   0x8   : > { %s4809_s27 = scalar_select %p143_p1, %s4731_s20, %s145_s25  }
   0x9   : > { %p4811_p5 = por %p156_p2, %p155_p0  ;;  %p4815_p6 = por %p162_p4, %p161_p3 }
   0xa   : > { %p4381_p7 = scmp.ge.s32.totalorder %s4735_s21, 1  ;;  %p216_p8 = scmp.lt.s32.totalorder %s4735_s21, 3 }
   0xc   : > { %p217_p9 = pnand %p4381_p7, %p216_p8 }
   0xe   : > { %220 = sbr.rel (%p217_p9) target bundleno = 937 (0x3a9), region = 40 }
  0x13   : > { %s4383_s30 = sshll.u32 %s4794_s22, 1  ;;  %vm375_vm0 = vcmask 64512   ;;  %vm832_vm1 = vcmask 261120   ;;  %vm1930_vm2 = vcmask 1047556   ;;  %s4739_s16 = smov 8  }
  0x14   : > { %p258_p10 = scmp.lt.s32.totalorder %s4383_s30, 3  ;;  %s4740_s17 = smov 16  }
  0x15   : > { %s4741_s23 = smov 24   ;;  %s4498_s10 = sshll.u32 %s4794_s22, 6 }
  0x16   : > { %s8478_s30 = smov (!%p258_p10, %s4383_s30), 3  ;;  %s4693_s7 = scalar_lea.hbm %s8238_s5, 128 }
  0x17   : > { %s4822_s6 = sshll.u32 %s8478_s30, 7 }
  0x18   : > { %s4828_s9 = scalar_lea.vmem %s8234_s1, %s4822_s6  ;;  %s4860_s12 = scalar_lea.vmem %s8233_s0, %s4822_s6 }
  0x19   : > { %v314_v0 = vld [vmem:[%s4828_s9 + $0x18] sm:$0xff]  ;;  %v313_v4 = vld [vmem:[%s4828_s9 + $0x10] sm:$0xff]  ;;  %v312_v8 = vld [vmem:[%s4828_s9 + $0x8] sm:$0xff]  ;;  %s5254_s15 = scalar_lea.vmem %s8235_s2, %s4822_s6 }
  0x1a   : > { %v318_v1 = vld [vmem:[%s4828_s9 + $0x38] sm:$0xff]  ;;  %4392 = vmatpush.xpose.msk.msra.mxu0 %vm375_vm0, %v314_v0  ;;  %v317_v5 = vld [vmem:[%s4828_s9 + $0x30] sm:$0xff]  ;;  %v316_v9 = vld [vmem:[%s4828_s9 + $0x28] sm:$0xff] }
  0x1b   : > { %v322_v2 = vld [vmem:[%s4828_s9 + $0x58] sm:$0xff]  ;;  %4400 = vmatpush.xpose.msk.msra.mxu1 %vm375_vm0, %v318_v1  ;;  %v321_v6 = vld [vmem:[%s4828_s9 + $0x50] sm:$0xff]  ;;  %v320_v10 = vld [vmem:[%s4828_s9 + $0x48] sm:$0xff] }
  0x1c   : > { %v326_v3 = vld [vmem:[%s4828_s9 + $0x78] sm:$0xff]  ;;  %4408 = vmatpush.xpose.msk.msra.mxu2 %vm375_vm0, %v322_v2  ;;  %v325_v7 = vld [vmem:[%s4828_s9 + $0x70] sm:$0xff]  ;;  %v324_v11 = vld [vmem:[%s4828_s9 + $0x68] sm:$0xff] }
  0x1d   : > { %4416 = vmatpush.xpose.msk.msra.mxu3 %vm375_vm0, %v326_v3  ;;  %v311_v12 = vld [vmem:[%s4828_s9] sm:$0xff]  ;;  %v330_v16 = vld [vmem:[%s4828_s9 + $0x98] sm:$0xff]  ;;  %v329_v24 = vld [vmem:[%s4828_s9 + $0x90] sm:$0xff] }
  0x1e   : > { %4393 = vmatpush.xpose.msk.msra.mxu0 %vm375_vm0, %v313_v4  ;;  %v315_v13 = vld [vmem:[%s4828_s9 + $0x20] sm:$0xff]  ;;  %v338_v17 = vld [vmem:[%s4828_s9 + $0xd8] sm:$0xff]  ;;  %v337_v25 = vld [vmem:[%s4828_s9 + $0xd0] sm:$0xff] }
  0x1f   : > { %4401 = vmatpush.xpose.msk.msra.mxu1 %vm375_vm0, %v317_v5  ;;  %v319_v14 = vld [vmem:[%s4828_s9 + $0x40] sm:$0xff]  ;;  %v342_v22 = vld [vmem:[%s4828_s9 + $0xf8] sm:$0xff]  ;;  %v333_v26 = vld [vmem:[%s4828_s9 + $0xb0] sm:$0xff] }
  0x20   : > { %4409 = vmatpush.xpose.msk.msra.mxu2 %vm375_vm0, %v321_v6  ;;  %v323_v15 = vld [vmem:[%s4828_s9 + $0x60] sm:$0xff]  ;;  %v334_v23 = vld [vmem:[%s4828_s9 + $0xb8] sm:$0xff]  ;;  %v341_v27 = vld [vmem:[%s4828_s9 + $0xf0] sm:$0xff] }
  0x21   : > { %4417 = vmatpush.xpose.msk.msra.mxu3 %vm375_vm0, %v325_v7  ;;  %v279_v18 = vld [vmem:[%s4860_s12] sm:$0xff]  ;;  %v336_v28 = vld [vmem:[%s4828_s9 + $0xc8] sm:$0xff]  ;;  %v281_v40 = vld [vmem:[%s4860_s12 + $0x10] sm:$0xff] }
  0x22   : > { %4394 = vmatpush.xpose.msk.msra.mxu0 %vm375_vm0, %v312_v8  ;;  %v283_v19 = vld [vmem:[%s4860_s12 + $0x20] sm:$0xff]  ;;  %v328_v29 = vld [vmem:[%s4828_s9 + $0x88] sm:$0xff]  ;;  %v285_v41 = vld [vmem:[%s4860_s12 + $0x30] sm:$0xff] }
  0x23   : > { %4402 = vmatpush.xpose.msk.msra.mxu1 %vm375_vm0, %v316_v9  ;;  %v287_v20 = vld [vmem:[%s4860_s12 + $0x40] sm:$0xff]  ;;  %v280_v30 = vld [vmem:[%s4860_s12 + $0x8] sm:$0xff]  ;;  %v289_v42 = vld [vmem:[%s4860_s12 + $0x50] sm:$0xff] }
  0x24   : > { %4410 = vmatpush.xpose.msk.msra.mxu2 %vm375_vm0, %v320_v10  ;;  %v291_v21 = vld [vmem:[%s4860_s12 + $0x60] sm:$0xff]  ;;  %v284_v31 = vld [vmem:[%s4860_s12 + $0x28] sm:$0xff]  ;;  %v293_v43 = vld [vmem:[%s4860_s12 + $0x70] sm:$0xff] }
  0x25   : > { %4418 = vmatpush.xpose.msk.msra.mxu3 %vm375_vm0, %v324_v11  ;;  %v288_v32 = vld [vmem:[%s4860_s12 + $0x48] sm:$0xff]  ;;  %v335_v36 = vld [vmem:[%s4828_s9 + $0xc0] sm:$0xff]  ;;  %v282_v44 = vld [vmem:[%s4860_s12 + $0x18] sm:$0xff] }
  0x26   : > { %4395 = vmatpush.xpose.msk.msra.mxu0 %vm375_vm0, %v311_v12  ;;  %v292_v33 = vld [vmem:[%s4860_s12 + $0x68] sm:$0xff]  ;;  %v327_v37 = vld [vmem:[%s4828_s9 + $0x80] sm:$0xff]  ;;  %v286_v45 = vld [vmem:[%s4860_s12 + $0x38] sm:$0xff] }
  0x27   : > { %4403 = vmatpush.xpose.msk.msra.mxu1 %vm375_vm0, %v315_v13  ;;  %v332_v34 = vld [vmem:[%s4828_s9 + $0xa8] sm:$0xff]  ;;  %v331_v38 = vld [vmem:[%s4828_s9 + $0xa0] sm:$0xff]  ;;  %v290_v46 = vld [vmem:[%s4860_s12 + $0x58] sm:$0xff] }
  0x28   : > { %4411 = vmatpush.xpose.msk.msra.mxu2 %vm375_vm0, %v319_v14  ;;  %v340_v35 = vld [vmem:[%s4828_s9 + $0xe8] sm:$0xff]  ;;  %v339_v39 = vld [vmem:[%s4828_s9 + $0xe0] sm:$0xff]  ;;  %v294_v47 = vld [vmem:[%s4860_s12 + $0x78] sm:$0xff] }
  0x29   : > { %4419 = vmatpush.xpose.msk.msra.mxu3 %vm375_vm0, %v323_v15  ;;  %4396 = vmatmul.msk.f32.vlgmr.msra.gmra.mxu0 %vm375_vm0, %v279_v18  ;;  %v299_v48 = vld [vmem:[%s4860_s12 + $0xa0] sm:$0xff]  ;;  %v296_v52 = vld [vmem:[%s4860_s12 + $0x88] sm:$0xff]  ;;  %v297_v56 = vld [vmem:[%s4860_s12 + $0x90] sm:$0xff] }
  0x2a   : > { %4424 = vmatpush.xpose.msk.msrb.mxu0 %vm375_vm0, %v330_v16  ;;  %4404 = vmatmul.msk.f32.vlgmr.msra.gmra.mxu1 %vm375_vm0, %v283_v19  ;;  %v295_v49 = vld [vmem:[%s4860_s12 + $0x80] sm:$0xff]  ;;  %v300_v53 = vld [vmem:[%s4860_s12 + $0xa8] sm:$0xff]  ;;  %v301_v57 = vld [vmem:[%s4860_s12 + $0xb0] sm:$0xff] }
  0x2b   : > { %4412 = vmatmul.msk.f32.vlgmr.msra.gmra.mxu2 %vm375_vm0, %v287_v20  ;;  %4432 = vmatpush.xpose.msk.msrb.mxu1 %vm375_vm0, %v334_v23  ;;  %v303_v50 = vld [vmem:[%s4860_s12 + $0xc0] sm:$0xff]  ;;  %v304_v54 = vld [vmem:[%s4860_s12 + $0xc8] sm:$0xff]  ;;  %v305_v58 = vld [vmem:[%s4860_s12 + $0xd0] sm:$0xff] }
  0x2c   : > { %4440 = vmatpush.xpose.msk.msrb.mxu2 %vm375_vm0, %v338_v17  ;;  %4420 = vmatmul.msk.f32.vlgmr.msra.gmra.mxu3 %vm375_vm0, %v291_v21  ;;  %v307_v51 = vld [vmem:[%s4860_s12 + $0xe0] sm:$0xff]  ;;  %v308_v55 = vld [vmem:[%s4860_s12 + $0xe8] sm:$0xff]  ;;  %v309_v59 = vld [vmem:[%s4860_s12 + $0xf0] sm:$0xff] }
  0x2d   : > { %4448 = vmatpush.xpose.msk.msrb.mxu3 %vm375_vm0, %v342_v22  ;;  %v298_v60 = vld [vmem:[%s4860_s12 + $0x98] sm:$0xff] }
  0x2e   : > { %4425 = vmatpush.xpose.msk.msrb.mxu0 %vm375_vm0, %v329_v24  ;;  %v302_v61 = vld [vmem:[%s4860_s12 + $0xb8] sm:$0xff] }
  0x2f   : > { %4433 = vmatpush.xpose.msk.msrb.mxu1 %vm375_vm0, %v333_v26  ;;  %v306_v62 = vld [vmem:[%s4860_s12 + $0xd8] sm:$0xff] }
  0x30   : > { %4441 = vmatpush.xpose.msk.msrb.mxu2 %vm375_vm0, %v337_v25  ;;  %v310_v63 = vld [vmem:[%s4860_s12 + $0xf8] sm:$0xff]  ;;  %s4288_s12 = scalar_lea.hbm %s8238_s5, %s4498_s10 }
  0x31   : > { %4449 = vmatpush.xpose.msk.msrb.mxu3 %vm375_vm0, %v341_v27  ;;  %4397 = vmatmul.msk.f32.gmra.mxu0 %vm375_vm0, %v280_v30 }
  0x32   : > { %4426 = vmatpush.xpose.msk.msrb.mxu0 %vm375_vm0, %v328_v29  ;;  %4405 = vmatmul.msk.f32.gmra.mxu1 %vm375_vm0, %v284_v31 }
  0x33   : > { %4413 = vmatmul.msk.f32.gmra.mxu2 %vm375_vm0, %v288_v32  ;;  %4434 = vmatpush.xpose.msk.msrb.mxu1 %vm375_vm0, %v332_v34 }
  0x34   : > { %4442 = vmatpush.xpose.msk.msrb.mxu2 %vm375_vm0, %v336_v28  ;;  %4421 = vmatmul.msk.f32.gmra.mxu3 %vm375_vm0, %v292_v33 }
  0x35   : > { %4450 = vmatpush.xpose.msk.msrb.mxu3 %vm375_vm0, %v340_v35 }
  0x36   : > { %4427 = vmatpush.xpose.msk.msrb.mxu0 %vm375_vm0, %v327_v37 }
  0x37   : > { %4435 = vmatpush.xpose.msk.msrb.mxu1 %vm375_vm0, %v331_v38 }
  0x38   : > { %4443 = vmatpush.xpose.msk.msrb.mxu2 %vm375_vm0, %v335_v36 }
  0x39   : > { %4451 = vmatpush.xpose.msk.msrb.mxu3 %vm375_vm0, %v339_v39  ;;  %4398 = vmatmul.msk.f32.gmra.mxu0 %vm375_vm0, %v281_v40 }
  0x3a   : > { %4406 = vmatmul.msk.f32.gmra.mxu1 %vm375_vm0, %v285_v41 }
  0x3b   : > { %4414 = vmatmul.msk.f32.gmra.mxu2 %vm375_vm0, %v289_v42 }
  0x3c   : > { %4422 = vmatmul.msk.f32.gmra.mxu3 %vm375_vm0, %v293_v43 }
  0x41   : > { %4399 = vmatmul.msk.f32.gmra.mxu0 %vm375_vm0, %v282_v44 }
  0x42   : > { %4407 = vmatmul.msk.f32.gmra.mxu1 %vm375_vm0, %v286_v45 }
  0x43   : > { %4415 = vmatmul.msk.f32.gmra.mxu2 %vm375_vm0, %v290_v46 }
  0x44   : > { %4423 = vmatmul.msk.f32.gmra.mxu3 %vm375_vm0, %v294_v47 }
  0x49   : > { %4428 = vmatmul.msk.f32.vlgmr.msrb.gmra.mxu0 %vm375_vm0, %v295_v49 }
  0x4a   : > { %4436 = vmatmul.msk.f32.vlgmr.msrb.gmra.mxu1 %vm375_vm0, %v299_v48 }
  0x4b   : > { %4444 = vmatmul.msk.f32.vlgmr.msrb.gmra.mxu2 %vm375_vm0, %v303_v50 }
  0x4c   : > { %4452 = vmatmul.msk.f32.vlgmr.msrb.gmra.mxu3 %vm375_vm0, %v307_v51 }
  0x51   : > { %4429 = vmatmul.msk.f32.gmra.mxu0 %vm375_vm0, %v296_v52 }
  0x52   : > { %4437 = vmatmul.msk.f32.gmra.mxu1 %vm375_vm0, %v300_v53 }
  0x53   : > { %4445 = vmatmul.msk.f32.gmra.mxu2 %vm375_vm0, %v304_v54 }
  0x54   : > { %4453 = vmatmul.msk.f32.gmra.mxu3 %vm375_vm0, %v308_v55 }
  0x59   : > { %4430 = vmatmul.msk.f32.gmra.mxu0 %vm375_vm0, %v297_v56 }
  0x5a   : > { %4438 = vmatmul.msk.f32.gmra.mxu1 %vm375_vm0, %v301_v57 }
  0x5b   : > { %4446 = vmatmul.msk.f32.gmra.mxu2 %vm375_vm0, %v305_v58 }
  0x5c   : > { %4454 = vmatmul.msk.f32.gmra.mxu3 %vm375_vm0, %v309_v59 }
  0x61   : > { %4431 = vmatmul.msk.f32.gmra.mxu0 %vm375_vm0, %v298_v60 }
  0x62   : > { %4439 = vmatmul.msk.f32.gmra.mxu1 %vm375_vm0, %v302_v61 }
  0x63   : > { %4447 = vmatmul.msk.f32.gmra.mxu2 %vm375_vm0, %v306_v62 }
  0x64   : > { %4455 = vmatmul.msk.f32.gmra.mxu3 %vm375_vm0, %v310_v63 }
  0xa6   : > { %v417_v0 = vpop.f32.mrf.mxu0 }
  0xa7   : > { %v470_v1 = vpop.f32.mrf.mxu1  ;;  %v4964_v2 = vmul.f32 0.35355338, %v417_v0 }
  0xa8   : > { %v4966_v3 = vmul.f32 0.35355338, %v470_v1 }
  0xa9   : > { %v833_v5 = vsel %vm832_vm1, %v4964_v2, -inf }
  0xaa   : > { %v845_v4 = vsel %vm832_vm1, %v4966_v3, -inf  ;;  %834 = vmax.xlane.f32.xlu1 %v833_v5 }
  0xab   : > { %846 = vmax.xlane.f32.xlu2 %v845_v4 }
  0xae   : > { %v523_v6 = vpop.f32.mrf.mxu2  ;;  %v420_v9 = vpop.f32.mrf.mxu0 }
  0xaf   : > { %v576_v7 = vpop.f32.mrf.mxu3  ;;  %v4972_v8 = vmul.f32 0.35355338, %v523_v6  ;;  %v473_v10 = vpop.f32.mrf.mxu1  ;;  %v4994_v25 = vmul.f32 0.35355338, %v420_v9 }
  0xb0   : > { %v4974_v11 = vmul.f32 0.35355338, %v473_v10  ;;  %v4980_v14 = vmul.f32 0.35355338, %v576_v7 }
  0xb1   : > { %v857_v12 = vsel %vm832_vm1, %v4972_v8, -inf  ;;  %v836_v32 = vsel %vm832_vm1, %v4994_v25, -inf }
  0xb2   : > { %858 = vmax.xlane.f32.xlu0 %v857_v12  ;;  %v848_v13 = vsel %vm832_vm1, %v4974_v11, -inf  ;;  %v869_v20 = vsel %vm832_vm1, %v4980_v14, -inf }
  0xb3   : > { %849 = vmax.xlane.f32.xlu2 %v848_v13 }
  0xb6   : > { %v526_v15 = vpop.f32.mrf.mxu2  ;;  %v423_v18 = vpop.f32.mrf.mxu0 }
  0xb7   : > { %v579_v16 = vpop.f32.mrf.mxu3  ;;  %v4982_v17 = vmul.f32 0.35355338, %v526_v15  ;;  %v476_v21 = vpop.f32.mrf.mxu1  ;;  %v4992_v24 = vmul.f32 0.35355338, %v423_v18 }
  0xb8   : > { %v4984_v19 = vmul.f32 0.35355338, %v579_v16  ;;  %v5004_v34 = vmul.f32 0.35355338, %v476_v21 }
  0xb9   : > { %v860_v22 = vsel %vm832_vm1, %v4982_v17, -inf  ;;  %v839_v29 = vsel %vm832_vm1, %v4992_v24, -inf }
  0xba   : > { %v872_v23 = vsel %vm832_vm1, %v4984_v19, -inf  ;;  %870 = vmax.xlane.f32.xlu0 %v869_v20  ;;  %861 = vmax.xlane.f32.xlu1 %v860_v22  ;;  %v851_v38 = vsel %vm832_vm1, %v5004_v34, -inf }
  0xbb   : > { %873 = vmax.xlane.f32.xlu2 %v872_v23 }
  0xbe   : > { %v529_v26 = vpop.f32.mrf.mxu2  ;;  %v426_v28 = vpop.f32.mrf.mxu0 }
  0xbf   : > { %v582_v27 = vpop.f32.mrf.mxu3  ;;  %v479_v30 = vpop.f32.mrf.mxu1  ;;  %v4998_v31 = vmul.f32 0.35355338, %v426_v28  ;;  %v5006_v35 = vmul.f32 0.35355338, %v529_v26 }
  0xc0   : > { %v5016_v43 = vmul.f32 0.35355338, %v479_v30  ;;  %v5018_v44 = vmul.f32 0.35355338, %v582_v27 }
  0xc1   : > { %v842_v33 = vsel %vm832_vm1, %v4998_v31, -inf  ;;  %v863_v39 = vsel %vm832_vm1, %v5006_v35, -inf }
  0xc2   : > { %837 = vmax.xlane.f32.xlu0 %v836_v32  ;;  %840 = vmax.xlane.f32.xlu1 %v839_v29  ;;  %v875_v48 = vsel %vm832_vm1, %v5018_v44, -inf  ;;  %v854_v49 = vsel %vm832_vm1, %v5016_v43, -inf }
  0xc3   : > { %843 = vmax.xlane.f32.xlu2 %v842_v33 }
  0xc6   : > { %v532_v36 = vpop.f32.mrf.mxu2  ;;  %v629_v47 = vpop.f32.mrf.mxu0 }
  0xc7   : > { %v5008_v37 = vmul.f32 0.35355338, %v532_v36  ;;  %v585_v40 = vpop.f32.mrf.mxu3  ;;  %v682_v42 = vpop.f32.mrf.mxu1  ;;  %v5030_v53 = vmul.f32 0.35355338, %v629_v47 }
  0xc8   : > { %v5020_v45 = vmul.f32 0.35355338, %v682_v42  ;;  %v5028_v52 = vmul.f32 0.35355338, %v585_v40 }
  0xc9   : > { %v866_v41 = vsel %vm832_vm1, %v5008_v37, -inf  ;;  %v881_v57 = vsel %vm832_vm1, %v5030_v53, -inf }
  0xca   : > { %852 = vmax.xlane.f32.xlu0 %v851_v38  ;;  %864 = vmax.xlane.f32.xlu1 %v863_v39  ;;  %v893_v50 = vsel %vm832_vm1, %v5020_v45, -inf  ;;  %v878_v56 = vsel %vm832_vm1, %v5028_v52, -inf }
  0xcb   : > { %867 = vmax.xlane.f32.xlu2 %v866_v41 }
  0xce   : > { %v735_v46 = vpop.f32.mrf.mxu2  ;;  %v632_v59 = vpop.f32.mrf.mxu0 }
  0xcf   : > { %v788_v51 = vpop.f32.mrf.mxu3  ;;  %v5040_v60 = vmul.f32 0.35355338, %v735_v46  ;;  %v5042_v61 = vmul.f32 0.35355338, %v632_v59  ;;  %v685_v4 = vpop.f32.mrf.mxu1 }
  0xd0   : > { %v5032_v54 = vmul.f32 0.35355338, %v788_v51  ;;  %v5054_v7 = vmul.f32 0.35355338, %v685_v4 }
  0xd1   : > { %v905_v0 = vsel %vm832_vm1, %v5040_v60, -inf  ;;  %v884_v1 = vsel %vm832_vm1, %v5042_v61, -inf }
  0xd2   : > { %876 = vmax.xlane.f32.xlu0 %v875_v48  ;;  %855 = vmax.xlane.f32.xlu1 %v854_v49  ;;  %v917_v58 = vsel %vm832_vm1, %v5032_v54, -inf  ;;  %v896_v13 = vsel %vm832_vm1, %v5054_v7, -inf }
  0xd3   : > { %894 = vmax.xlane.f32.xlu2 %v893_v50 }
  0xd6   : > { %v738_v55 = vpop.f32.mrf.mxu2  ;;  %v635_v16 = vpop.f32.mrf.mxu0 }
  0xd7   : > { %v5052_v6 = vmul.f32 0.35355338, %v738_v55  ;;  %v791_v10 = vpop.f32.mrf.mxu3  ;;  %v5064_v20 = vmul.f32 0.35355338, %v635_v16  ;;  %v688_v22 = vpop.f32.mrf.mxu1 }
  0xd8   : > { %v5066_v21 = vmul.f32 0.35355338, %v791_v10  ;;  %v5072_v28 = vmul.f32 0.35355338, %v688_v22 }
  0xd9   : > { %v908_v15 = vsel %vm832_vm1, %v5052_v6, -inf  ;;  %v887_v26 = vsel %vm832_vm1, %v5064_v20, -inf }
  0xda   : > { %879 = vmax.xlane.f32.xlu1 %v878_v56  ;;  %882 = vmax.xlane.f32.xlu0 %v881_v57  ;;  %v920_v23 = vsel %vm832_vm1, %v5066_v21, -inf  ;;  %v899_v30 = vsel %vm832_vm1, %v5072_v28, -inf }
  0xdb   : > { %918 = vmax.xlane.f32.xlu2 %v917_v58 }
  0xde   : > { %v741_v62 = vpop.f32.mrf.mxu2  ;;  %v638_v33 = vpop.f32.mrf.mxu0 }
  0xdf   : > { %v5044_v63 = vmul.f32 0.35355338, %v741_v62  ;;  %v794_v27 = vpop.f32.mrf.mxu3  ;;  %v691_v36 = vpop.f32.mrf.mxu1  ;;  %v5080_v38 = vmul.f32 0.35355338, %v638_v33 }
  0xe0   : > { %v5074_v29 = vmul.f32 0.35355338, %v794_v27  ;;  %v5082_v39 = vmul.f32 0.35355338, %v691_v36 }
  0xe1   : > { %v911_v5 = vsel %vm832_vm1, %v5044_v63, -inf  ;;  %v890_v41 = vsel %vm832_vm1, %v5080_v38, -inf }
  0xe2   : > { %906 = vmax.xlane.f32.xlu0 %v905_v0  ;;  %885 = vmax.xlane.f32.xlu1 %v884_v1  ;;  %v923_v32 = vsel %vm832_vm1, %v5074_v29, -inf  ;;  %v902_v40 = vsel %vm832_vm1, %v5082_v39, -inf }
  0xe3   : > { %912 = vmax.xlane.f32.xlu2 %v911_v5 }
  0xe6   : > { %v744_v9 = vpop.f32.mrf.mxu2 }
  0xe7   : > { %v5056_v12 = vmul.f32 0.35355338, %v744_v9  ;;  %v797_v42 = vpop.f32.mrf.mxu3 }
  0xe8   : > { %v5088_v46 = vmul.f32 0.35355338, %v797_v42 }
  0xe9   : > { %v914_v18 = vsel %vm832_vm1, %v5056_v12, -inf }
  0xea   : > { %897 = vmax.xlane.f32.xlu0 %v896_v13  ;;  %909 = vmax.xlane.f32.xlu1 %v908_v15  ;;  %v926_v47 = vsel %vm832_vm1, %v5088_v46, -inf }
  0xeb   : > { %915 = vmax.xlane.f32.xlu2 %v914_v18 }
  0xf2   : > { %921 = vmax.xlane.f32.xlu0 %v920_v23  ;;  %888 = vmax.xlane.f32.xlu1 %v887_v26 }
  0xfa   : > { %900 = vmax.xlane.f32.xlu0 %v899_v30  ;;  %924 = vmax.xlane.f32.xlu1 %v923_v32 }
 0x102   : > { %903 = vmax.xlane.f32.xlu1 %v902_v40  ;;  %891 = vmax.xlane.f32.xlu0 %v890_v41 }
 0x10a   : > { %927 = vmax.xlane.f32.xlu1 %v926_v47 }
 0x11d   : > { %v835_v49 = vpop.xlane.xlu1 %834 }
 0x11e   : > { %v847_v48 = vpop.xlane.xlu2 %846  ;;  %v929_v51 = vsub.f32 %v4964_v2, %v835_v49 }
 0x11f   : > { %v933_v50 = vsub.f32 %v4966_v3, %v847_v48 }
 0x120   : > { %v961_v56 = vmul.f32 1.442695, %v929_v51 }
 0x121   : > { %v969_v55 = vmul.f32 1.442695, %v933_v50 }
 0x123   : > { %4545 = vpow2.f32 %v969_v55 }
 0x124   : > { %4547 = vpow2.f32 %v961_v56 }
 0x125   : > { %v859_v57 = vpop.xlane.xlu0 %858 }
 0x126   : > { %v937_v58 = vsub.f32 %v4972_v8, %v859_v57  ;;  %v850_v59 = vpop.xlane.xlu2 %849 }
 0x127   : > { %v934_v62 = vsub.f32 %v4974_v11, %v850_v59 }
 0x128   : > { %v977_v0 = vmul.f32 1.442695, %v937_v58 }
 0x129   : > { %v5096_v1 = vpop.eup %4545  ;;  %v971_v4 = vmul.f32 1.442695, %v934_v62 }
 0x12a   : > { %v5098_v5 = vpop.eup %4547  ;;  %4549 = vpow2.f32 %v977_v0  ;;  %v1037_v2 = vsel %vm832_vm1, %v5096_v1, 0.0 }
 0x12b   : > { %4551 = vpow2.f32 %v971_v4  ;;  %v1025_v3 = vsel %vm832_vm1, %v5098_v5, 0.0  ;;  %1038 = vadd.xlane.f32.xlu1 %v1037_v2 }
 0x12c   : > { %1026 = vadd.xlane.f32.xlu2 %v1025_v3 }
 0x12d   : > { %v871_v8 = vpop.xlane.xlu0 %870  ;;  %v862_v9 = vpop.xlane.xlu1 %861 }
 0x12e   : > { %v941_v11 = vsub.f32 %v4980_v14, %v871_v8  ;;  %v874_v10 = vpop.xlane.xlu2 %873  ;;  %v938_v16 = vsub.f32 %v4982_v17, %v862_v9 }
 0x12f   : > { %v942_v33 = vsub.f32 %v4984_v19, %v874_v10 }
 0x130   : > { %v5105_v13 = vpop.eup %4549  ;;  %v985_v15 = vmul.f32 1.442695, %v941_v11  ;;  %v979_v26 = vmul.f32 1.442695, %v938_v16 }
 0x131   : > { %v5108_v18 = vpop.eup %4551  ;;  %v1049_v23 = vsel %vm832_vm1, %v5105_v13, 0.0  ;;  %v987_v48 = vmul.f32 1.442695, %v942_v33 }
 0x132   : > { %4553 = vpow2.f32 %v985_v15  ;;  %v1040_v22 = vsel %vm832_vm1, %v5108_v18, 0.0 }
 0x133   : > { %1041 = vadd.xlane.f32.xlu1 %v1040_v22  ;;  %4555 = vpow2.f32 %v979_v26 }
 0x134   : > { %1050 = vadd.xlane.f32.xlu2 %v1049_v23 }
 0x135   : > { %v838_v27 = vpop.xlane.xlu0 %837  ;;  %v841_v14 = vpop.xlane.xlu1 %840 }
 0x136   : > { %v930_v30 = vsub.f32 %v4994_v25, %v838_v27  ;;  %v844_v32 = vpop.xlane.xlu2 %843  ;;  %v931_v41 = vsub.f32 %v4992_v24, %v841_v14 }
 0x137   : > { %v932_v17 = vsub.f32 %v4998_v31, %v844_v32 }
 0x138   : > { %v5117_v36 = vpop.eup %4553  ;;  %v963_v40 = vmul.f32 1.442695, %v930_v30  ;;  %v965_v49 = vmul.f32 1.442695, %v931_v41 }
 0x139   : > { %v967_v42 = vmul.f32 1.442695, %v932_v17  ;;  %v1061_v47 = vsel %vm832_vm1, %v5117_v36, 0.0  ;;  %v5122_v19 = vpop.eup %4555 }
 0x13a   : > { %4557 = vpow2.f32 %v963_v40  ;;  %1062 = vadd.xlane.f32.xlu0 %v1061_v47  ;;  %v1052_v59 = vsel %vm832_vm1, %v5122_v19, 0.0 }
 0x13b   : > { %4559 = vpow2.f32 %v967_v42 }
 0x13c   : > { %4561 = vpow2.f32 %v987_v48 }
 0x13d   : > { %v853_v25 = vpop.xlane.xlu0 %852  ;;  %v865_v50 = vpop.xlane.xlu1 %864  ;;  %4563 = vpow2.f32 %v965_v49 }
 0x13e   : > { %v868_v31 = vpop.xlane.xlu2 %867  ;;  %v935_v51 = vsub.f32 %v5004_v34, %v853_v25  ;;  %v939_v56 = vsub.f32 %v5006_v35, %v865_v50 }
 0x13f   : > { %v940_v55 = vsub.f32 %v5008_v37, %v868_v31 }
 0x140   : > { %v5126_v24 = vpop.eup %4557  ;;  %v973_v0 = vmul.f32 1.442695, %v935_v51  ;;  %v981_v37 = vmul.f32 1.442695, %v939_v56 }
 0x141   : > { %v983_v57 = vmul.f32 1.442695, %v940_v55  ;;  %v1028_v58 = vsel %vm832_vm1, %v5126_v24, 0.0  ;;  %v5133_v62 = vpop.eup %4559 }
 0x142   : > { %1029 = vadd.xlane.f32.xlu2 %v1028_v58  ;;  %1053 = vadd.xlane.f32.xlu0 %v1052_v59  ;;  %v1034_v34 = vsel %vm832_vm1, %v5133_v62, 0.0  ;;  %v5137_v4 = vpop.eup %4561 }
 0x143   : > { %4565 = vpow2.f32 %v983_v57  ;;  %1035 = vadd.xlane.f32.xlu1 %v1034_v34  ;;  %v5139_v3 = vpop.eup %4563  ;;  %v1064_v16 = vsel %vm832_vm1, %v5137_v4, 0.0 }
 0x144   : > { %4567 = vpow2.f32 %v973_v0  ;;  %v1031_v22 = vsel %vm832_vm1, %v5139_v3, 0.0 }
 0x145   : > { %v877_v35 = vpop.xlane.xlu0 %876  ;;  %v856_v2 = vpop.xlane.xlu1 %855  ;;  %4569 = vpow2.f32 %v981_v37 }
 0x146   : > { %v895_v8 = vpop.xlane.xlu2 %894  ;;  %v943_v9 = vsub.f32 %v5018_v44, %v877_v35  ;;  %v936_v10 = vsub.f32 %v5016_v43, %v856_v2 }
 0x147   : > { %v949_v11 = vsub.f32 %v5020_v45, %v895_v8 }
 0x148   : > { %v989_v26 = vmul.f32 1.442695, %v943_v9  ;;  %v975_v27 = vmul.f32 1.442695, %v936_v10 }
 0x149   : > { %v1001_v15 = vmul.f32 1.442695, %v949_v11  ;;  %v5148_v23 = vpop.eup %4565 }
 0x14a   : > { %1065 = vadd.xlane.f32.xlu2 %v1064_v16  ;;  %1032 = vadd.xlane.f32.xlu0 %v1031_v22  ;;  %v1058_v44 = vsel %vm832_vm1, %v5148_v23, 0.0  ;;  %v5152_v45 = vpop.eup %4567 }
 0x14b   : > { %4571 = vpow2.f32 %v1001_v15  ;;  %1059 = vadd.xlane.f32.xlu1 %v1058_v44  ;;  %v5154_v30 = vpop.eup %4569  ;;  %v1043_v42 = vsel %vm832_vm1, %v5152_v45, 0.0 }
 0x14c   : > { %4573 = vpow2.f32 %v989_v26  ;;  %v1055_v47 = vsel %vm832_vm1, %v5154_v30, 0.0 }
 0x14d   : > { %v880_v43 = vpop.xlane.xlu1 %879  ;;  %v883_v14 = vpop.xlane.xlu0 %882  ;;  %4575 = vpow2.f32 %v975_v27 }
 0x14e   : > { %v919_v32 = vpop.xlane.xlu2 %918  ;;  %v944_v33 = vsub.f32 %v5028_v52, %v880_v43  ;;  %v945_v40 = vsub.f32 %v5030_v53, %v883_v14 }
 0x14f   : > { %v957_v17 = vsub.f32 %v5032_v54, %v919_v32 }
 0x150   : > { %v991_v49 = vmul.f32 1.442695, %v944_v33  ;;  %v993_v25 = vmul.f32 1.442695, %v945_v40 }
 0x151   : > { %v1017_v41 = vmul.f32 1.442695, %v957_v17  ;;  %v5163_v48 = vpop.eup %4571 }
 0x152   : > { %1044 = vadd.xlane.f32.xlu2 %v1043_v42  ;;  %1056 = vadd.xlane.f32.xlu0 %v1055_v47  ;;  %v1085_v52 = vsel %vm832_vm1, %v5163_v48, 0.0  ;;  %v5167_v54 = vpop.eup %4573 }
 0x153   : > { %4577 = vpow2.f32 %v1017_v41  ;;  %1086 = vadd.xlane.f32.xlu1 %v1085_v52  ;;  %v5169_v31 = vpop.eup %4575  ;;  %v1067_v58 = vsel %vm832_vm1, %v5167_v54, 0.0 }
 0x154   : > { %4579 = vpow2.f32 %v991_v49  ;;  %v1046_v59 = vsel %vm832_vm1, %v5169_v31, 0.0 }
 0x155   : > { %v907_v53 = vpop.xlane.xlu0 %906  ;;  %v886_v50 = vpop.xlane.xlu1 %885  ;;  %4581 = vpow2.f32 %v993_v25 }
 0x156   : > { %v913_v51 = vpop.xlane.xlu2 %912  ;;  %v953_v56 = vsub.f32 %v5040_v60, %v907_v53  ;;  %v946_v11 = vsub.f32 %v5042_v61, %v886_v50 }
 0x157   : > { %v955_v55 = vsub.f32 %v5044_v63, %v913_v51 }
 0x158   : > { %v1009_v37 = vmul.f32 1.442695, %v953_v56 }
 0x159   : > { %v1013_v57 = vmul.f32 1.442695, %v955_v55  ;;  %v5177_v0 = vpop.eup %4577 }
 0x15a   : > { %1068 = vadd.xlane.f32.xlu2 %v1067_v58  ;;  %1047 = vadd.xlane.f32.xlu0 %v1046_v59  ;;  %v1109_v34 = vsel %vm832_vm1, %v5177_v0, 0.0  ;;  %v5181_v63 = vpop.eup %4579 }
 0x15b   : > { %4583 = vpow2.f32 %v1013_v57  ;;  %1110 = vadd.xlane.f32.xlu1 %v1109_v34  ;;  %v5183_v2 = vpop.eup %4581  ;;  %v1070_v15 = vsel %vm832_vm1, %v5181_v63, 0.0 }
 0x15c   : > { %4585 = vpow2.f32 %v1009_v37  ;;  %v1073_v10 = vsel %vm832_vm1, %v5183_v2, 0.0 }
 0x15d   : > { %v898_v60 = vpop.xlane.xlu0 %897  ;;  %v910_v35 = vpop.xlane.xlu1 %909 }
 0x15e   : > { %v954_v8 = vsub.f32 %v5052_v6, %v910_v35  ;;  %v995_v6 = vmul.f32 1.442695, %v946_v11  ;;  %v950_v14 = vsub.f32 %v5054_v7, %v898_v60  ;;  %v916_v42 = vpop.xlane.xlu2 %915 }
 0x15f   : > { %v956_v25 = vsub.f32 %v5056_v12, %v916_v42  ;;  %v344_v42 = vld [vmem:[%s5254_s15 + $0x8] sm:$0xff] }
 0x160   : > { %v1011_v9 = vmul.f32 1.442695, %v954_v8 }
 0x161   : > { %v5191_v16 = vpop.eup %4583  ;;  %v1015_v57 = vmul.f32 1.442695, %v956_v25  ;;  %v354_v25 = vld [vmem:[%s5254_s15 + $0x58] sm:$0xff] }
 0x162   : > { %8295 = vst [vmem:[#allocation5_spill] sm:$0xff] %v5191_v16  ;;  %1074 = vadd.xlane.f32.xlu2 %v1073_v10  ;;  %1071 = vadd.xlane.f32.xlu0 %v1070_v15  ;;  %4587 = vpow2.f32 %v1011_v9  ;;  %v1103_v22 = vsel %vm832_vm1, %v5191_v16, 0.0  ;;  %v5195_v27 = vpop.eup %4585 }
 0x163   : > { %1104 = vadd.xlane.f32.xlu1 %v1103_v22  ;;  %4589 = vpow2.f32 %v995_v6  ;;  %v1097_v40 = vsel %vm832_vm1, %v5195_v27, 0.0  ;;  %1707 = vmatpush.msra.mxu2 %v354_v25 }
 0x165   : > { %v922_v26 = vpop.xlane.xlu0 %921  ;;  %v889_v44 = vpop.xlane.xlu1 %888 }
 0x166   : > { %v958_v61 = vsub.f32 %v5066_v21, %v922_v26  ;;  %v947_v43 = vsub.f32 %v5064_v20, %v889_v44  ;;  %v1003_v21 = vmul.f32 1.442695, %v950_v14 }
 0x168   : > { %v1019_v32 = vmul.f32 1.442695, %v958_v61  ;;  %v997_v33 = vmul.f32 1.442695, %v947_v43  ;;  %v5200_v17 = vpop.eup %4587 }
 0x169   : > { %8296 = vst [vmem:[#allocation6_spill] sm:$0xff] %v5200_v17  ;;  %v1100_v41 = vsel %vm832_vm1, %v5200_v17, 0.0  ;;  %v5207_v49 = vpop.eup %4589 }
 0x16a   : > { %4591 = vpow2.f32 %v1019_v32  ;;  %1098 = vadd.xlane.f32.xlu2 %v1097_v40  ;;  %1101 = vadd.xlane.f32.xlu0 %v1100_v41  ;;  %8297 = vst [vmem:[#allocation7_spill] sm:$0xff] %v5207_v49  ;;  %v5260_v40 = vld [vmem:[%s5254_s15 + $0x38] sm:$0xff]  ;;  %v345_v41 = vld [vmem:[%s5254_s15 + $0x10] sm:$0xff] }
 0x16b   : > { %4593 = vpow2.f32 %v997_v33  ;;  %v346_v33 = vld [vmem:[%s5254_s15 + $0x18] sm:$0xff]  ;;  %1666 = vmatpush.msra.mxu1 %v5260_v40 }
 0x16c   : > { %4595 = vpow2.f32 %v1003_v21  ;;  %1625 = vmatpush.msra.mxu0 %v346_v33  ;;  %v5265_v21 = vld [vmem:[%s5254_s15 + $0x30] sm:$0xff] }
 0x16d   : > { %v901_v20 = vpop.xlane.xlu0 %900  ;;  %v925_v47 = vpop.xlane.xlu1 %924  ;;  %1667 = vmatpush.msra.mxu1 %v5265_v21 }
 0x16e   : > { %v959_v7 = vsub.f32 %v5074_v29, %v925_v47  ;;  %v951_v51 = vsub.f32 %v5072_v28, %v901_v20  ;;  %v1076_v29 = vsel %vm832_vm1, %v5207_v49, 0.0  ;;  %1626 = vmatpush.msra.mxu0 %v345_v41  ;;  %v5270_v20 = vld [vmem:[%s5254_s15 + $0x28] sm:$0xff]  ;;  %v5274_v47 = vld [vmem:[%s5254_s15] sm:$0xff] }
 0x16f   : > { %1668 = vmatpush.msra.mxu1 %v5270_v20 }
 0x170   : > { %v5209_v52 = vpop.eup %4591  ;;  %v1021_v53 = vmul.f32 1.442695, %v959_v7  ;;  %v1005_v12 = vmul.f32 1.442695, %v951_v51  ;;  %1627 = vmatpush.msra.mxu0 %v344_v42  ;;  %v5277_v7 = vld [vmem:[%s5254_s15 + $0x20] sm:$0xff]  ;;  %v352_v51 = vld [vmem:[%s5254_s15 + $0x48] sm:$0xff] }
 0x171   : > { %8298 = vst [vmem:[#allocation8_spill] sm:$0xff] %v5209_v52  ;;  %v5212_v50 = vpop.eup %4593  ;;  %v1112_v55 = vsel %vm832_vm1, %v5209_v52, 0.0  ;;  %1669 = vmatpush.msra.mxu1 %v5277_v7 }
 0x172   : > { %8299 = vst [vmem:[#allocation9_spill] sm:$0xff] %v5212_v50  ;;  %1113 = vadd.xlane.f32.xlu2 %v1112_v55  ;;  %v1079_v56 = vsel %vm832_vm1, %v5212_v50, 0.0  ;;  %4597 = vpow2.f32 %v1021_v53  ;;  %1077 = vadd.xlane.f32.xlu0 %v1076_v29  ;;  %v5221_v34 = vpop.eup %4595  ;;  %v353_v53 = vld [vmem:[%s5254_s15 + $0x50] sm:$0xff]  ;;  %v5285_v55 = vld [vmem:[%s5254_s15 + $0x78] sm:$0xff] }
 0x173   : > { %1080 = vadd.xlane.f32.xlu1 %v1079_v56  ;;  %8300 = vst [vmem:[#allocation10_spill] sm:$0xff] %v5221_v34  ;;  %4599 = vpow2.f32 %v1015_v57  ;;  %v1088_v35 = vsel %vm832_vm1, %v5221_v34, 0.0  ;;  %1628 = vmatpush.msra.mxu0 %v5274_v47  ;;  %v5288_v56 = vld [vmem:[%s5254_s15 + $0x40] sm:$0xff] }
 0x174   : > { %4601 = vpow2.f32 %v1005_v12  ;;  %1708 = vmatpush.msra.mxu2 %v353_v53  ;;  %1748 = vmatpush.msra.mxu3 %v5285_v55  ;;  %v3102_v12 = vrot.slane %v346_v33, 4 }
 0x175   : > { %v904_v58 = vpop.xlane.xlu1 %903  ;;  %v892_v59 = vpop.xlane.xlu0 %891 }
 0x176   : > { %v948_v28 = vsub.f32 %v5080_v38, %v892_v59  ;;  %v952_v60 = vsub.f32 %v5082_v39, %v904_v58  ;;  %1709 = vmatpush.msra.mxu2 %v352_v51  ;;  %v3046_v58 = vrot.slane %v345_v41, 4  ;;  %v2990_v59 = vrot.slane %v344_v42, 4 }
 0x178   : > { %v5224_v37 = vpop.eup %4597  ;;  %v999_v9 = vmul.f32 1.442695, %v948_v28  ;;  %v1007_v11 = vmul.f32 1.442695, %v952_v60  ;;  %1710 = vmatpush.msra.mxu2 %v5288_v56  ;;  %v3100_v28 = vrot.slane %v354_v25, 4  ;;  %v3103_v60 = vsel %vm1930_vm2, %v354_v25, %v3102_v12  ;;  %v5309_v25 = vld [vmem:[%s5254_s15 + $0x70] sm:$0xff] }
 0x179   : > { %8301 = vst [vmem:[#allocation11_spill] sm:$0xff] %v5224_v37  ;;  %v1115_v8 = vsel %vm832_vm1, %v5224_v37, 0.0  ;;  %v5231_v15 = vpop.eup %4599  ;;  %1749 = vmatpush.msra.mxu3 %v5309_v25 }
 0x17a   : > { %1089 = vadd.xlane.f32.xlu2 %v1088_v35  ;;  %1116 = vadd.xlane.f32.xlu0 %v1115_v8  ;;  %8302 = vst [vmem:[#allocation12_spill] sm:$0xff] %v5231_v15  ;;  %v5234_v22 = vpop.eup %4601  ;;  %4603 = vpow2.f32 %v999_v9  ;;  %v1106_v6 = vsel %vm832_vm1, %v5231_v15, 0.0  ;;  %v3044_v35 = vrot.slane %v353_v53, 4  ;;  %v5294_v8 = vsel %vm1930_vm2, %v353_v53, %v3046_v58 }
 0x17b   : > { %8303 = vst [vmem:[#allocation13_spill] sm:$0xff] %v5234_v22  ;;  %4605 = vpow2.f32 %v1007_v11  ;;  %v1091_v26 = vsel %vm832_vm1, %v5234_v22, 0.0  ;;  %v2988_v9 = vrot.slane %v352_v51, 4  ;;  %v5297_v11 = vsel %vm1930_vm2, %v352_v51, %v2990_v59 }
 0x17d   : > { %v928_v10 = vpop.xlane.xlu1 %927 }
 0x17e   : > { %v960_v38 = vsub.f32 %v5088_v46, %v928_v10 }
 0x180   : > { %v1023_v39 = vmul.f32 1.442695, %v960_v38  ;;  %v5240_v44 = vpop.eup %4603  ;;  %v3101_v38 = vsel %vm1930_vm2, %v3100_v28, %v346_v33 }
 0x181   : > { %8304 = vst [vmem:[#allocation14_spill] sm:$0xff] %v5240_v44  ;;  %v5242_v61 = vpop.eup %4605  ;;  %v1082_v14 = vsel %vm832_vm1, %v5240_v44, 0.0 }
 0x182   : > { %4607 = vpow2.f32 %v1023_v39  ;;  %1107 = vadd.xlane.f32.xlu2 %v1106_v6  ;;  %1092 = vadd.xlane.f32.xlu0 %v1091_v26  ;;  %8305 = vst [vmem:[#allocation15_spill] sm:$0xff] %v5242_v61  ;;  %v1094_v32 = vsel %vm832_vm1, %v5242_v61, 0.0  ;;  %v5301_v39 = vsel %vm1930_vm2, %v3044_v35, %v345_v41 }
 0x188   : > { %v5244_v43 = vpop.eup %4607 }
 0x189   : > { %8306 = vst [vmem:[#allocation16_spill] sm:$0xff] %v5244_v43  ;;  %v1118_v46 = vsel %vm832_vm1, %v5244_v43, 0.0 }
 0x18a   : > { %1119 = vadd.xlane.f32.xlu1 %v1118_v46  ;;  %1083 = vadd.xlane.f32.xlu2 %v1082_v14  ;;  %v5304_v46 = vsel %vm1930_vm2, %v2988_v9, %v344_v42  ;;  %v4737_v9 = vmov 1983009808  }
 0x18b   : > { %1095 = vadd.xlane.f32.xlu0 %v1094_v32 }
 0x19e   : > { %v1039_v29 = vpop.xlane.xlu1 %1038 }
 0x19f   : > { %v1027_v57 = vpop.xlane.xlu2 %1026  ;;  %4609 = vrcp.f32 %v1039_v29  ;;  %v1190_v41 = vand.u32 2147483647, %v1039_v29  ;;  %v1192_v12 = vand.u32 2147483648, %v1039_v29  ;;  %vm1186_vm5 = vweird.f32 %v1039_v29 }
 0x1a0   : > { %4611 = vrcp.f32 %v1027_v57  ;;  %v1130_v58 = vand.u32 2147483647, %v1027_v57  ;;  %v1132_v59 = vand.u32 2147483648, %v1027_v57  ;;  %vm1126_vm6 = vweird.f32 %v1027_v57 }
 0x1a1   : > { %v1193_v61 = vor.u32 1.1754944e-38, %v1192_v12  ;;  %vm1191_vm10 = vcmp.eq.f32.partialorder %v1190_v41, 8.507059e+37 }
 0x1a2   : > { %vm1131_vm9 = vcmp.eq.f32.partialorder %v1130_v58, 8.507059e+37 }
 0x1a5   : > { %v4610_v10 = vpop.eup %4609 }
 0x1a6   : > { %v4612_v6 = vpop.eup %4611  ;;  %v1182_v26 = vmul.f32 %v4610_v10, %v1039_v29  ;;  %v5312_v51 = vpop.xlane.xlu1 %1041  ;;  %vm1187_vm3 = vweird.f32 %v4610_v10 }
 0x1a7   : > { %v1122_v14 = vmul.f32 %v4612_v6, %v1027_v57  ;;  %v5306_v32 = vpop.xlane.xlu2 %1050  ;;  %vm1127_vm4 = vweird.f32 %v4612_v6  ;;  %vm1188_vm7 = vmor %vm1186_vm5, %vm1187_vm3  ;;  %v3112_v57 = vrot.slane %v5285_v55, 4  ;;  %vm1201_vm15 = vweird.f32 %v5312_v51 }
 0x1a8   : > { %v1183_v53 = vsub.f32 1.0, %v1182_v26  ;;  %4613 = vrcp.f32 %v5306_v32  ;;  %v1935_v26 = vunpack.c.l.s4 %v4737_v9  ;;  %vm1128_vm8 = vmor %vm1126_vm6, %vm1127_vm4  ;;  %vm1246_vm11 = vweird.f32 %v5306_v32 }
 0x1a9   : > { %v1123_v33 = vsub.f32 1.0, %v1122_v14  ;;  %4615 = vrcp.f32 %v5312_v51  ;;  %v3114_v14 = vrot.slane %v5260_v40, 4 }
 0x1aa   : > { %v1184_v28 = vmul.f32 %v4610_v10, %v1183_v53  ;;  %v1133_v53 = vor.u32 1.1754944e-38, %v1132_v59  ;;  %v5325_v9 = vunpack.c.0.s8 %v1935_v26 }
 0x1ab   : > { %v1124_v42 = vmul.f32 %v4612_v6, %v1123_v33 }
 0x1ac   : > { %v1185_v35 = vadd.f32 %v4610_v10, %v1184_v28  ;;  %v3111_v41 = vperm.slane %v3103_v60, %v5325_v9 }
 0x1ad   : > { %v1125_v43 = vadd.f32 %v4612_v6, %v1124_v42  ;;  %v5321_v28 = vpop.xlane.xlu0 %1062  ;;  %v2934_v42 = vrot.slane %v5274_v47, 4 }
 0x1ae   : > { %v5317_v44 = vpop.eup %4613  ;;  %v1189_v33 = vsel %vm1188_vm7, %v4610_v10, %v1185_v35  ;;  %4617 = vrcp.f32 %v5321_v28  ;;  %v3138_v26 = vrot.slane %v3111_v41, 4  ;;  %vm1306_vm6 = vweird.f32 %v5321_v28 }
 0x1af   : > { %v1129_v15 = vsel %vm1128_vm8, %v4612_v6, %v1125_v43  ;;  %v1194_v22 = vsel %vm1191_vm10, %v1193_v61, %v1189_v33  ;;  %v1242_v29 = vmul.f32 %v5317_v44, %v5306_v32  ;;  %v5327_v37 = vpop.eup %4615  ;;  %v5332_v61 = vld [vmem:[%s5254_s15 + $0x68] sm:$0xff]  ;;  %v3107_v6 = vperm.slane %v3101_v38, %v5325_v9 }
 0x1b0   : > { %v1134_v12 = vsel %vm1131_vm9, %v1133_v53, %v1129_v15  ;;  %v1195_v43 = vmul.f32 %v5096_v1, %v1194_v22  ;;  %1750 = vmatpush.msra.mxu3 %v5332_v61  ;;  %v3113_v15 = vsel %vm1930_vm2, %v3112_v57, %v5260_v40  ;;  %v3115_v1 = vsel %vm1930_vm2, %v5285_v55, %v3114_v14 }
 0x1b1   : > { %v1243_v58 = vsub.f32 1.0, %v1242_v29  ;;  %v1135_v10 = vmul.f32 %v5098_v5, %v1134_v12  ;;  %v1197_v22 = vmul.f32 %v5327_v37, %v5312_v51  ;;  %v5349_v60 = vsel %vm1930_vm2, %v5288_v56, %v2934_v42 }
 0x1b2   : > { %4460 = vmatmul.msk.f32.vlgmr.msra.gmra.mxu1 %vm832_vm1, %v1195_v43  ;;  %v3119_v59 = vperm.slane %v3113_v15, %v5325_v9  ;;  %v3126_v35 = vrot.slane %v3107_v6, 4  ;;  %v3123_v40 = vperm.slane %v3115_v1, %v5325_v9  ;;  %v2932_v55 = vrot.slane %v5288_v56, 4 }
 0x1b3   : > { %4456 = vmatmul.msk.f32.vlgmr.msra.gmra.mxu0 %vm832_vm1, %v1135_v10  ;;  %v1244_v5 = vmul.f32 %v5317_v44, %v1243_v58  ;;  %v4738_v33 = vmov 1934713408   ;;  %vm1247_vm12 = vweird.f32 %v5317_v44  ;;  %v1250_v42 = vand.u32 2147483647, %v5306_v32  ;;  %v5364_v10 = vld [vmem:[%s5254_s15 + $0x60] sm:$0xff] }
 0x1b4   : > { %v1959_v29 = vunpack.c.l.s4 %v4738_v33  ;;  %v5358_v57 = vpop.eup %4617  ;;  %v1198_v58 = vsub.f32 1.0, %v1197_v22  ;;  %v1252_v56 = vand.u32 2147483648, %v5306_v32  ;;  %v1207_v43 = vand.u32 2147483648, %v5312_v51  ;;  %1751 = vmatpush.msra.mxu3 %v5364_v10  ;;  %vm5385_vm13 = vmor %vm1246_vm11, %vm1247_vm12 }
 0x1b5   : > { %v1245_v12 = vadd.f32 %v5317_v44, %v1244_v5  ;;  %v5370_v15 = vperm.slane %v5301_v39, %v5325_v9  ;;  %v3124_v1 = vrot.slane %v3119_v59, 4  ;;  %v5374_v5 = vsel %vm1930_vm2, %v3119_v59, %v3126_v35  ;;  %v5418_v14 = vpop.xlane.xlu0 %1053 }
 0x1b6   : > { %v3136_v33 = vrot.slane %v3123_v40, 4  ;;  %v5377_v53 = vsel %vm1930_vm2, %v3123_v40, %v3138_v26  ;;  %v5381_v22 = vsel %vm1930_vm2, %v2932_v55, %v5274_v47  ;;  %v1302_v39 = vmul.f32 %v5358_v57, %v5321_v28  ;;  %v5407_v55 = vpop.xlane.xlu2 %1029 }
 0x1b7   : > { %v5393_v59 = vperm.slane %v5294_v8, %v5325_v9  ;;  %v5397_v35 = vperm.slane %v5304_v46, %v5325_v9  ;;  %v5400_v47 = vsel %vm1930_vm2, %v3124_v1, %v3107_v6  ;;  %v1249_v32 = vsel %vm5385_vm13, %v5317_v44, %v1245_v12 }
 0x1b8   : > { %v1199_v26 = vmul.f32 %v5327_v37, %v1198_v58  ;;  %v1312_v40 = vand.u32 2147483648, %v5321_v28  ;;  %v5410_v8 = vsel %vm1930_vm2, %v3136_v33, %v3111_v41  ;;  %vm1251_vm14 = vcmp.eq.f32.partialorder %v1250_v42, 8.507059e+37 }
 0x1b9   : > { %v1253_v38 = vor.u32 1.1754944e-38, %v1252_v56  ;;  %v5415_v46 = vperm.slane %v5297_v11, %v5325_v9  ;;  %v1208_v6 = vor.u32 1.1754944e-38, %v1207_v43  ;;  %v1310_v44 = vand.u32 2147483647, %v5321_v28 }
 0x1ba   : > { %v3070_v12 = vrot.slane %v5370_v15, 4  ;;  %v5421_v58 = vunpack.c.0.s8 %v1959_v29  ;;  %v1303_v41 = vsub.f32 1.0, %v1302_v39  ;;  %4619 = vrcp.f32 %v5407_v55  ;;  %v5432_v29 = vpop.xlane.xlu1 %1035 }
 0x1bb   : > { %v1254_v1 = vsel %vm1251_vm14, %v1253_v38, %v1249_v32  ;;  %v3082_v42 = vrot.slane %v5393_v59, 4  ;;  %v5425_v56 = vor.u32 1.1754944e-38, %v1312_v40  ;;  %v1200_v43 = vadd.f32 %v5327_v37, %v1199_v26 }
 0x1bc   : > { %vm1202_vm3 = vweird.f32 %v5327_v37  ;;  %vm1307_vm4 = vweird.f32 %v5358_v57  ;;  %v1147_v33 = vand.u32 2147483648, %v5407_v55  ;;  %v1205_v39 = vand.u32 2147483647, %v5312_v51 }
 0x1bd   : > { %vm1203_vm5 = vmor %vm1201_vm15, %vm1202_vm3  ;;  %4621 = vrcp.f32 %v5418_v14  ;;  %v1255_v26 = vmul.f32 %v5105_v13, %v1254_v1  ;;  %v3056_v40 = vrot.slane %v5309_v25, 4  ;;  %v1304_v11 = vmul.f32 %v5358_v57, %v1303_v41 }
 0x1be   : > { %v1204_v32 = vsel %vm1203_vm5, %v5327_v37, %v1200_v43  ;;  %v1267_v16 = vand.u32 2147483648, %v5418_v14  ;;  %vm1206_vm7 = vcmp.eq.f32.partialorder %v1205_v39, 8.507059e+37  ;;  %v8309_v38 = vrot.slane %v5265_v21, 4  ;;  %vm5517_vm9 = vmor %vm1306_vm6, %vm1307_vm4 }
 0x1bf   : > { %4623 = vrcp.f32 %v5432_v29  ;;  %v1209_v34 = vsel %vm1206_vm7, %v1208_v6, %v1204_v32  ;;  %4464 = vmatmul.msk.f32.vlgmr.msra.gmra.mxu2 %vm832_vm1, %v1255_v26  ;;  %v3057_v13 = vsel %vm1930_vm2, %v3056_v40, %v5265_v21  ;;  %v1177_v41 = vand.u32 2147483648, %v5432_v29 }
 0x1c0   : > { %v3059_v51 = vsel %vm1930_vm2, %v5309_v25, %v8309_v38  ;;  %v5454_v1 = vpop.eup %4619  ;;  %v3147_v43 = vperm.slane %v5377_v53, %v5421_v58  ;;  %v1210_v39 = vmul.f32 %v5108_v18, %v1209_v34  ;;  %v3063_v25 = vperm.slane %v3057_v13, %v5325_v9 }
 0x1c1   : > { %v3067_v37 = vperm.slane %v3059_v51, %v5325_v9  ;;  %vm5461_vm8 = vcmp.eq.f32.partialorder %v1310_v44, 8.507059e+37  ;;  %v5465_v38 = vor.u32 1.1754944e-38, %v1147_v33  ;;  %v5469_v21 = vperm.slane %v5349_v60, %v5325_v9  ;;  %v5477_v44 = vpop.xlane.xlu2 %1065 }
 0x1c2   : > { %v1305_v40 = vadd.f32 %v5358_v57, %v1304_v11  ;;  %v5473_v53 = vor.u32 1.1754944e-38, %v1267_v16  ;;  %4461 = vmatmul.msk.f32.gmra.mxu1 %vm832_vm1, %v1210_v39  ;;  %v3068_v18 = vrot.slane %v3063_v25, 4  ;;  %v3071_v34 = vsel %vm1930_vm2, %v3063_v25, %v3070_v12  ;;  %v5487_v16 = vpop.xlane.xlu0 %1032 }
 0x1c3   : > { %v3080_v32 = vrot.slane %v3067_v37, 4  ;;  %v3083_v26 = vsel %vm1930_vm2, %v3067_v37, %v3082_v42  ;;  %v5479_v33 = vpop.eup %4621  ;;  %v1137_v60 = vmul.f32 %v5454_v1, %v5407_v55  ;;  %v3135_v51 = vperm.slane %v5374_v5, %v5421_v58 }
 0x1c4   : > { %v3000_v11 = vrot.slane %v5332_v61, 4  ;;  %v5490_v13 = vor.u32 1.1754944e-38, %v1177_v41  ;;  %v5492_v12 = vrot.slane %v3147_v43, 4  ;;  %v3069_v37 = vsel %vm1930_vm2, %v3068_v18, %v5370_v15 }
 0x1c5   : > { %v3081_v42 = vsel %vm1930_vm2, %v3080_v32, %v5393_v59  ;;  %v8313_v39 = vrot.slane %v5270_v20, 4  ;;  %v5500_v5 = vpop.eup %4623  ;;  %v5504_v59 = vperm.slane %v5400_v47, %v5421_v58  ;;  %v5508_v41 = vperm.slane %v5381_v22, %v5325_v9 }
 0x1c6   : > { %8312 = vst [vmem:[#allocation17_spill] sm:$0xff] %v5492_v12  ;;  %4625 = vrcp.f32 %v5477_v44  ;;  %v3001_v15 = vsel %vm1930_vm2, %v3000_v11, %v5270_v20  ;;  %v5523_v47 = vperm.slane %v5410_v8, %v5421_v58  ;;  %v1309_v20 = vsel %vm5517_vm9, %v5358_v57, %v1305_v40 }
 0x1c7   : > { %v3003_v25 = vsel %vm1930_vm2, %v5332_v61, %v8313_v39  ;;  %8314 = vst [vmem:[#allocation18_spill] sm:$0xff] %v5504_v59  ;;  %4627 = vrcp.f32 %v5487_v16  ;;  %v3007_v22 = vperm.slane %v3001_v15, %v5325_v9  ;;  %v1138_v32 = vsub.f32 1.0, %v1137_v60 }
 0x1c8   : > { %8317 = vst [vmem:[#allocation19_spill] sm:$0xff] %v5523_v47  ;;  %v3011_v43 = vperm.slane %v3003_v25, %v5325_v9  ;;  %v1257_v28 = vmul.f32 %v5479_v33, %v5418_v14  ;;  %v5533_v18 = vrot.slane %v3135_v51, 4  ;;  %v1167_v8 = vmul.f32 %v5500_v5, %v5432_v29 }
 0x1c9   : > { %v5539_v11 = vsel %vm1930_vm2, 0.0, %v5492_v12  ;;  %v3091_v39 = vperm.slane %v3083_v26, %v5421_v58  ;;  %v3012_v25 = vrot.slane %v3007_v22, 4  ;;  %v3079_v15 = vperm.slane %v3071_v34, %v5421_v58  ;;  %v5589_v26 = vpop.xlane.xlu2 %1044 }
 0x1ca   : > { %8318 = vst [vmem:[#allocation20_spill] sm:$0xff] %v5533_v18  ;;  %v8320_v57 = vrot.slane %v5397_v35, 4  ;;  %v3024_v60 = vrot.slane %v3011_v43, 4  ;;  %v8321_v51 = vrot.slane %v5415_v46, 4  ;;  %v5551_v18 = vpop.xlane.xlu1 %1059  ;;  %v1314_v12 = vsel %vm5461_vm8, %v5425_v56, %v1309_v20 }
 0x1cb   : > { %8319 = vst [vmem:[#allocation21_spill] sm:$0xff] %v5539_v11  ;;  %v2958_v34 = vrot.slane %v5508_v41, 4  ;;  %v3013_v59 = vsel %vm1930_vm2, %v3012_v25, %v5397_v35  ;;  %v2970_v50 = vrot.slane %v5469_v21, 4  ;;  %v1139_v56 = vmul.f32 %v5454_v1, %v1138_v32 }
 0x1cc   : > { %v3015_v40 = vsel %vm1930_vm2, %v3007_v22, %v8320_v57  ;;  %v5549_v61 = vsel %vm1930_vm2, %v3011_v43, %v8321_v51  ;;  %v5560_v22 = vpop.eup %4625  ;;  %v1258_v57 = vsub.f32 1.0, %v1257_v28  ;;  %v5564_v43 = vperm.slane %v3081_v42, %v5421_v58 }
 0x1cd   : > { %v3025_v51 = vsel %vm1930_vm2, %v3024_v60, %v5415_v46  ;;  %v5568_v6 = vpop.eup %4627  ;;  %v1168_v20 = vsub.f32 1.0, %v1167_v8  ;;  %v1327_v35 = vand.u32 2147483648, %v5477_v44  ;;  %v5573_v25 = vrot.slane %v3079_v15, 4 }
 0x1ce   : > { %8322 = vst [vmem:[#allocation22_spill] sm:$0xff] %v5564_v43  ;;  %v5575_v28 = vrot.slane %v3091_v39, 4  ;;  %v2944_v47 = vrot.slane %v5364_v10, 4  ;;  %v8325_v42 = vrot.slane %v5277_v7, 4  ;;  %v5583_v60 = vperm.slane %v3069_v37, %v5421_v58 }
 0x1cf   : > { %8323 = vst [vmem:[#allocation23_spill] sm:$0xff] %v5573_v25  ;;  %v1317_v32 = vmul.f32 %v5560_v22, %v5477_v44  ;;  %v1162_v8 = vand.u32 2147483648, %v5487_v16  ;;  %v3096_v39 = vrot.slane %v5564_v43, 4  ;;  %v1152_v11 = vmul.f32 %v5568_v6, %v5487_v16 }
 0x1d0   : > { %8324 = vst [vmem:[#allocation24_spill] sm:$0xff] %v5575_v28  ;;  %v2947_v46 = vsel %vm1930_vm2, %v5364_v10, %v8325_v42  ;;  %v3023_v52 = vperm.slane %v3015_v40, %v5421_v58  ;;  %v2945_v10 = vsel %vm1930_vm2, %v2944_v47, %v5277_v7  ;;  %4629 = vrcp.f32 %v5551_v18 }
 0x1d1   : > { %8326 = vst [vmem:[#allocation25_spill] sm:$0xff] %v5583_v60  ;;  %v2955_v15 = vperm.slane %v2947_v46, %v5325_v9  ;;  %v2951_v37 = vperm.slane %v2945_v10, %v5325_v9  ;;  %vm1141_vm10 = vweird.f32 %v5407_v55  ;;  %v5603_v46 = vsel %vm1930_vm2, 0.0, %v5573_v25 }
 0x1d2   : > { %8327 = vst [vmem:[#allocation26_spill] sm:$0xff] %v5603_v46  ;;  %v5607_v43 = vsel %vm1930_vm2, 0.0, %v5575_v28  ;;  %v1315_v7 = vmul.f32 %v5117_v36, %v1314_v12  ;;  %vm1261_vm11 = vweird.f32 %v5418_v14  ;;  %v1318_v47 = vsub.f32 1.0, %v1317_v32  ;;  %v5623_v36 = vpop.xlane.xlu1 %1086 }
 0x1d3   : > { %v2968_v42 = vrot.slane %v2955_v15, 4  ;;  %v2971_v17 = vsel %vm1930_vm2, %v2955_v15, %v2970_v50  ;;  %8328 = vst [vmem:[#allocation27_spill] sm:$0xff] %v5607_v43  ;;  %v2956_v10 = vrot.slane %v2951_v37, 4  ;;  %v5613_v50 = vsel %vm1930_vm2, %v2951_v37, %v2958_v34 }
 0x1d4   : > { %v2979_v40 = vperm.slane %v2971_v17, %v5421_v58  ;;  %v1153_v25 = vsub.f32 1.0, %v1152_v11  ;;  %v3035_v28 = vperm.slane %v5549_v61, %v5421_v58  ;;  %4468 = vmatmul.msk.f32.vlgmr.msra.gmra.mxu3 %vm832_vm1, %v1315_v7  ;;  %v1259_v12 = vmul.f32 %v5479_v33, %v1258_v57 }
 0x1d5   : > { %v2969_v15 = vsel %vm1930_vm2, %v2968_v42, %v5469_v21  ;;  %v5627_v34 = vmul.f32 %v5500_v5, %v1168_v20  ;;  %v5629_v32 = vrot.slane %v3023_v52, 4  ;;  %v2957_v21 = vsel %vm1930_vm2, %v2956_v10, %v5508_v41 }
 0x1d6   : > { %v5620_v49 = vperm.slane %v2969_v15, %v5421_v58  ;;  %v2986_v17 = vrot.slane %v2979_v40, 4  ;;  %v5635_v37 = vor.u32 1.1754944e-38, %v1327_v35  ;;  %v5637_v42 = vor.u32 1.1754944e-38, %v1162_v8  ;;  %v5640_v40 = vld [vmem:[%s5254_s15 + $0xd8] sm:$0xff]  ;;  %v5642_v7 = vpop.eup %4629  ;;  %v5655_v35 = vpop.xlane.xlu0 %1056 }
 0x1d7   : > { %8329 = vst [vmem:[#allocation28_spill] sm:$0xff] %v5629_v32  ;;  %v5645_v57 = vsel %vm1930_vm2, 0.0, %v3096_v39  ;;  %v5649_v20 = vperm.slane %v3013_v59, %v5421_v58  ;;  %1871 = vmatpush.msrb.mxu2 %v5640_v40  ;;  %v5659_v8 = vmul.f32 %v5560_v22, %v1318_v47  ;;  %v1154_v10 = vmul.f32 %v5568_v6, %v1153_v25  ;;  %v5674_v47 = vpop.xlane.xlu2 %1068 }
 0x1d8   : > { %8330 = vst [vmem:[#allocation29_spill] sm:$0xff] %v5645_v57  ;;  %v5653_v41 = vsel %vm1930_vm2, %v2986_v17, %v5620_v49  ;;  %v5662_v39 = vrot.slane %v3035_v28, 4  ;;  %4631 = vrcp.f32 %v5623_v36  ;;  %v5666_v59 = vperm.slane %v3025_v51, %v5421_v58 }
 0x1d9   : > { %8331 = vst [vmem:[#allocation30_spill] sm:$0xff] %v5649_v20  ;;  %v5670_v15 = vsel %vm1930_vm2, 0.0, %v5629_v32  ;;  %4633 = vrcp.f32 %v5589_v26  ;;  %v1140_v61 = vadd.f32 %v5454_v1, %v1139_v56  ;;  %v1287_v25 = vmul.f32 %v5642_v7, %v5551_v18  ;;  %v5689_v56 = vld [vmem:[%s5254_s15 + $0xf8] sm:$0xff] }
 0x1da   : > { %8332 = vst [vmem:[#allocation31_spill] sm:$0xff] %v5653_v41  ;;  %vm1142_vm12 = vweird.f32 %v5454_v1  ;;  %v1145_v28 = vand.u32 2147483647, %v5407_v55  ;;  %v1260_v51 = vadd.f32 %v5479_v33, %v1259_v12  ;;  %vm1156_vm13 = vweird.f32 %v5487_v16  ;;  %1912 = vmatpush.msrb.mxu3 %v5689_v56 }
 0x1db   : > { %8333 = vst [vmem:[#allocation32_spill] sm:$0xff] %v5662_v39  ;;  %v1297_v11 = vand.u32 2147483648, %v5551_v18  ;;  %4635 = vrcp.f32 %v5655_v35  ;;  %vm1143_vm14 = vmor %vm1141_vm10, %vm1142_vm12  ;;  %vm1262_vm15 = vweird.f32 %v5479_v33  ;;  %v5693_v41 = vsel %vm1930_vm2, 0.0, %v5662_v39  ;;  %v5716_v39 = vpop.xlane.xlu1 %1110 }
 0x1dc   : > { %8334 = vst [vmem:[#allocation33_spill] sm:$0xff] %v5666_v59  ;;  %v1144_v12 = vsel %vm1143_vm14, %v5454_v1, %v1140_v61  ;;  %vm1146_vm3 = vcmp.eq.f32.partialorder %v1145_v28, 8.507059e+37  ;;  %vm5698_vm4 = vmor %vm1261_vm11, %vm1262_vm15  ;;  %v1265_v55 = vand.u32 2147483647, %v5418_v14  ;;  %vm1321_vm5 = vweird.f32 %v5477_v44 }
 0x1dd   : > { %8335 = vst [vmem:[#allocation34_spill] sm:$0xff] %v5670_v15  ;;  %v3040_v43 = vrot.slane %v5666_v59, 4  ;;  %v1149_v46 = vsel %vm1146_vm3, %v5465_v38, %v1144_v12  ;;  %v1264_v1 = vsel %vm5698_vm4, %v5479_v33, %v1260_v51  ;;  %v1288_v28 = vsub.f32 1.0, %v1287_v25 }
 0x1de   : > { %8336 = vst [vmem:[#allocation35_spill] sm:$0xff] %v5693_v41  ;;  %v5711_v61 = vpop.eup %4631  ;;  %v2967_v14 = vperm.slane %v5613_v50, %v5421_v58  ;;  %v1150_v60 = vmul.f32 %v5126_v24, %v1149_v46  ;;  %vm1266_vm6 = vcmp.eq.f32.partialorder %v1265_v55, 8.507059e+37  ;;  %v5721_v38 = vor.u32 1.1754944e-38, %v1297_v11 }
 0x1df   : > { %v5718_v59 = vpop.eup %4633  ;;  %v1422_v33 = vmul.f32 %v5711_v61, %v5623_v36  ;;  %v1269_v52 = vsel %vm1266_vm6, %v5473_v53, %v1264_v1  ;;  %v5727_v25 = vsel %vm1930_vm2, 0.0, %v2986_v17  ;;  %v1222_v50 = vand.u32 2147483648, %v5589_v26  ;;  %v5742_v17 = vpop.xlane.xlu0 %1047 }
 0x1e0   : > { %8339 = vst [vmem:[#allocation36_spill] sm:$0xff] %v5727_v25  ;;  %4457 = vmatmul.msk.f32.gmra.mxu0 %vm832_vm1, %v1150_v60  ;;  %v1270_v24 = vmul.f32 %v5122_v19, %v1269_v52  ;;  %4637 = vrcp.f32 %v5674_v47  ;;  %v5736_v11 = vsel %vm1930_vm2, 0.0, %v3040_v43  ;;  %v5739_v51 = vperm.slane %v2957_v21, %v5421_v58  ;;  %v5757_v1 = vpop.xlane.xlu2 %1074 }
 0x1e1   : > { %v5733_v46 = vpop.eup %4635  ;;  %8340 = vst [vmem:[#allocation37_spill] sm:$0xff] %v5736_v11  ;;  %v2984_v53 = vrot.slane %v5620_v49, 4  ;;  %4639 = vrcp.f32 %v5716_v39  ;;  %v5746_v60 = vmul.f32 %v5642_v7, %v1288_v28  ;;  %v5748_v19 = vrot.slane %v2967_v14, 4 }
 0x1e2   : > { %8341 = vst [vmem:[#allocation38_spill] sm:$0xff] %v5739_v51  ;;  %v1423_v12 = vsub.f32 1.0, %v1422_v33  ;;  %4465 = vmatmul.msk.f32.gmra.mxu2 %vm832_vm1, %v1270_v24  ;;  %v1155_v43 = vadd.f32 %v5568_v6, %v1154_v10  ;;  %v1212_v21 = vmul.f32 %v5718_v59, %v5589_v26  ;;  %vm1157_vm7 = vweird.f32 %v5568_v6 }
 0x1e3   : > { %8342 = vst [vmem:[#allocation39_spill] sm:$0xff] %v5748_v19  ;;  %v1160_v49 = vand.u32 2147483647, %v5487_v16  ;;  %v5759_v28 = vor.u32 1.1754944e-38, %v1222_v50  ;;  %v1272_v14 = vmul.f32 %v5733_v46, %v5655_v35  ;;  %4641 = vrcp.f32 %v5742_v17  ;;  %vm1158_vm8 = vmor %vm1156_vm13, %vm1157_vm7 }
 0x1e4   : > { %v1320_v10 = vadd.f32 %v5560_v22, %v5659_v8  ;;  %v5769_v33 = vsel %vm1930_vm2, 0.0, %v2984_v53  ;;  %v1159_v52 = vsel %vm1158_vm8, %v5568_v6, %v1155_v43  ;;  %vm1322_vm10 = vweird.f32 %v5560_v22  ;;  %v5786_v6 = vld [vmem:[%s5254_s15 + $0x98] sm:$0xff]  ;;  %v5789_v53 = vld [vmem:[%s5254_s15 + $0xd0] sm:$0xff] }
 0x1e5   : > { %8343 = vst [vmem:[#allocation40_spill] sm:$0xff] %v5769_v33  ;;  %vm1161_vm9 = vcmp.eq.f32.partialorder %v1160_v49, 8.507059e+37  ;;  %v1424_v24 = vmul.f32 %v5711_v61, %v1423_v12  ;;  %vm5779_vm11 = vmor %vm1321_vm5, %vm1322_vm10  ;;  %v1325_v8 = vand.u32 2147483647, %v5477_v44  ;;  %4643 = vrcp.f32 %v5757_v1  ;;  %1789 = vmatpush.msrb.mxu0 %v5786_v6  ;;  %v5801_v44 = vld [vmem:[%s5254_s15 + $0xb8] sm:$0xff]  ;;  %1872 = vmatpush.msrb.mxu2 %v5789_v53 }
 0x1e6   : > { %v5773_v50 = vpop.eup %4637  ;;  %v1164_v55 = vsel %vm1161_vm9, %v5637_v42, %v1159_v52  ;;  %vm1171_vm12 = vweird.f32 %v5432_v29  ;;  %v1213_v12 = vsub.f32 1.0, %v1212_v21  ;;  %v1282_v42 = vand.u32 2147483648, %v5655_v35  ;;  %1830 = vmatpush.msrb.mxu1 %v5801_v44 }
 0x1e7   : > { %v5791_v43 = vpop.eup %4639  ;;  %v1165_v49 = vmul.f32 %v5139_v3, %v1164_v55  ;;  %v1324_v52 = vsel %vm5779_vm11, %v5560_v22, %v1320_v10  ;;  %vm1216_vm13 = vweird.f32 %v5589_v26  ;;  %v1273_v57 = vsub.f32 1.0, %v1272_v14 }
 0x1e8   : > { %v1430_v25 = vand.u32 2147483647, %v5623_v36  ;;  %v1432_v33 = vand.u32 2147483648, %v5623_v36  ;;  %v1542_v21 = vmul.f32 %v5791_v43, %v5716_v39  ;;  %vm1427_vm14 = vweird.f32 %v5711_v61 }
 0x1e9   : > { %v1342_v3 = vand.u32 2147483648, %v5674_v47  ;;  %v1237_v22 = vand.u32 2147483648, %v5742_v17  ;;  %4458 = vmatmul.msk.f32.gmra.mxu0 %vm832_vm1, %v1165_v49  ;;  %vm1326_vm15 = vcmp.eq.f32.partialorder %v1325_v8, 8.507059e+37  ;;  %v5814_v55 = vpop.eup %4641  ;;  %v1425_v14 = vadd.f32 %v5711_v61, %v1424_v24 }
 0x1ea   : > { %v5819_v10 = vmul.f32 %v5773_v50, %v5674_v47  ;;  %v1552_v16 = vand.u32 2147483648, %v5716_v39  ;;  %v1329_v19 = vsel %vm1326_vm15, %v5635_v37, %v1324_v52  ;;  %v1214_v51 = vmul.f32 %v5718_v59, %v1213_v12  ;;  %v5837_v52 = vld [vmem:[%s5254_s15 + $0xf0] sm:$0xff] }
 0x1eb   : > { %v5824_v41 = vor.u32 1.1754944e-38, %v1282_v42  ;;  %vm1426_vm3 = vweird.f32 %v5623_v36  ;;  %v1330_v8 = vmul.f32 %v5137_v4, %v1329_v19  ;;  %v5828_v49 = vpop.eup %4643  ;;  %v1274_v24 = vmul.f32 %v5733_v46, %v1273_v57  ;;  %v5840_v12 = vld [vmem:[%s5254_s15 + $0x90] sm:$0xff]  ;;  %1913 = vmatpush.msrb.mxu3 %v5837_v52 }
 0x1ec   : > { %vm1276_vm4 = vweird.f32 %v5655_v35  ;;  %vm5832_vm5 = vcmp.eq.f32.partialorder %v1430_v25, 8.507059e+37  ;;  %v1433_v15 = vor.u32 1.1754944e-38, %v1432_v33  ;;  %v1543_v37 = vsub.f32 1.0, %v1542_v21  ;;  %v5843_v42 = vld [vmem:[%s5254_s15 + $0xb0] sm:$0xff]  ;;  %vm5847_vm6 = vmor %vm1426_vm3, %vm1427_vm14  ;;  %v5859_v33 = vpop.xlane.xlu0 %1071  ;;  %1790 = vmatpush.msrb.mxu0 %v5840_v12 }
 0x1ed   : > { %v5851_v36 = vor.u32 1.1754944e-38, %v1342_v3  ;;  %v1227_v57 = vmul.f32 %v5814_v55, %v5742_v17  ;;  %v5855_v25 = vor.u32 1.1754944e-38, %v1237_v22  ;;  %v1550_v19 = vand.u32 2147483647, %v5716_v39  ;;  %4469 = vmatmul.msk.f32.gmra.mxu3 %vm832_vm1, %v1330_v8  ;;  %1831 = vmatpush.msrb.mxu1 %v5843_v42 }
 0x1ee   : > { %v1429_v21 = vsel %vm5847_vm6, %v5711_v61, %v1425_v14  ;;  %v1333_v3 = vsub.f32 1.0, %v5819_v10  ;;  %vm1546_vm7 = vweird.f32 %v5716_v39  ;;  %v5867_v32 = vor.u32 1.1754944e-38, %v1552_v16 }
 0x1ef   : > { %v1170_v22 = vadd.f32 %v5500_v5, %v5627_v34  ;;  %v1362_v8 = vmul.f32 %v5828_v49, %v5757_v1  ;;  %vm1172_vm8 = vweird.f32 %v5500_v5  ;;  %v1175_v61 = vand.u32 2147483647, %v5432_v29 }
 0x1f0   : > { %v1215_v14 = vadd.f32 %v5718_v59, %v1214_v51  ;;  %v1544_v10 = vmul.f32 %v5791_v43, %v1543_v37  ;;  %4645 = vrcp.f32 %v5859_v33  ;;  %vm5882_vm9 = vmor %vm1171_vm12, %vm1172_vm8  ;;  %vm1217_vm10 = vweird.f32 %v5718_v59 }
 0x1f1   : > { %v1220_v16 = vand.u32 2147483647, %v5589_v26  ;;  %v5890_v4 = vsel %vm5832_vm5, %v1433_v15, %v1429_v21  ;;  %v1228_v20 = vsub.f32 1.0, %v1227_v57  ;;  %vm1547_vm11 = vweird.f32 %v5791_v43  ;;  %vm1218_vm12 = vmor %vm1216_vm13, %vm1217_vm10  ;;  %v5906_v21 = vpop.xlane.xlu1 %1104 }
 0x1f2   : > { %v1174_v51 = vsel %vm5882_vm9, %v5500_v5, %v1170_v22  ;;  %vm5898_vm14 = vcmp.eq.f32.partialorder %v1550_v19, 8.507059e+37  ;;  %vm1176_vm15 = vcmp.eq.f32.partialorder %v1175_v61, 8.507059e+37  ;;  %v1219_v37 = vsel %vm1218_vm12, %v5718_v59, %v1215_v14  ;;  %v5910_v19 = vpop.xlane.xlu2 %1098 }
 0x1f3   : > { %vm1221_vm3 = vcmp.eq.f32.partialorder %v1220_v16, 8.507059e+37  ;;  %v1275_v15 = vadd.f32 %v5733_v46, %v1274_v24  ;;  %vm1231_vm5 = vweird.f32 %v5742_v17  ;;  %v1363_v11 = vsub.f32 1.0, %v1362_v8 }
 0x1f4   : > { %v1372_v57 = vand.u32 2147483648, %v5757_v1  ;;  %v1179_v5 = vsel %vm1176_vm15, %v5490_v13, %v1174_v51  ;;  %v1224_v26 = vsel %vm1221_vm3, %v5759_v28, %v1219_v37  ;;  %vm1291_vm13 = vweird.f32 %v5551_v18 }
 0x1f5   : > { %v1545_v59 = vadd.f32 %v5791_v43, %v1544_v10  ;;  %v1180_v22 = vmul.f32 %v5133_v62, %v1179_v5  ;;  %v1225_v24 = vmul.f32 %v5152_v45, %v1224_v26  ;;  %vm1277_vm6 = vweird.f32 %v5733_v46  ;;  %v5975_v26 = vld [vmem:[%s5254_s15 + $0x88] sm:$0xff] }
 0x1f6   : > { %v5918_v8 = vmul.f32 %v5773_v50, %v1333_v3  ;;  %v1229_v61 = vmul.f32 %v5814_v55, %v1228_v20  ;;  %v1357_v13 = vand.u32 2147483648, %v5859_v33  ;;  %vm5924_vm8 = vmor %vm1276_vm4, %vm1277_vm6  ;;  %v1280_v14 = vand.u32 2147483647, %v5655_v35  ;;  %v5929_v62 = vpop.eup %4645  ;;  %1791 = vmatpush.msrb.mxu0 %v5975_v26 }
 0x1f7   : > { %v3324_v45 = vrot.slane %v5640_v40, 4  ;;  %v1522_v10 = vand.u32 2147483648, %v5906_v21  ;;  %4459 = vmatmul.msk.f32.gmra.mxu0 %vm832_vm1, %v1180_v22  ;;  %4462 = vmatmul.msk.f32.gmra.mxu1 %vm832_vm1, %v1225_v24  ;;  %v1279_v20 = vsel %vm5924_vm8, %v5733_v46, %v1275_v15  ;;  %4647 = vrcp.f32 %v5910_v19  ;;  %vm5943_vm4 = vmor %vm1546_vm7, %vm1547_vm11  ;;  %v5981_v22 = vld [vmem:[%s5254_s15 + $0xc8] sm:$0xff] }
 0x1f8   : > { %v1364_v3 = vmul.f32 %v5828_v49, %v1363_v11  ;;  %vm1366_vm9 = vweird.f32 %v5757_v1  ;;  %v1370_v34 = vand.u32 2147483647, %v5757_v1  ;;  %vm1281_vm10 = vcmp.eq.f32.partialorder %v1280_v14, 8.507059e+37  ;;  %1873 = vmatpush.msrb.mxu2 %v5981_v22 }
 0x1f9   : > { %vm1336_vm12 = vweird.f32 %v5674_v47  ;;  %v1549_v39 = vsel %vm5943_vm4, %v5791_v43, %v1545_v59  ;;  %v5954_v46 = vor.u32 1.1754944e-38, %v1372_v57  ;;  %4649 = vrcp.f32 %v5906_v21  ;;  %v5968_v43 = vpop.xlane.xlu0 %1101  ;;  %v5978_v59 = vld [vmem:[%s5254_s15 + $0xa8] sm:$0xff] }
 0x1fa   : > { %v1284_v16 = vsel %vm1281_vm10, %v5824_v41, %v1279_v20  ;;  %vm1367_vm7 = vweird.f32 %v5828_v49  ;;  %v5961_v51 = vmul.f32 %v5929_v62, %v5859_v33  ;;  %v5963_v37 = vor.u32 1.1754944e-38, %v1357_v13  ;;  %v5999_v13 = vld [vmem:[%s5254_s15 + $0xa0] sm:$0xff]  ;;  %1832 = vmatpush.msrb.mxu1 %v5978_v59  ;;  %v6029_v20 = vld [vmem:[%s5254_s15 + $0xe8] sm:$0xff] }
 0x1fb   : > { %v1285_v15 = vmul.f32 %v5154_v30, %v1284_v16  ;;  %v5966_v11 = vor.u32 1.1754944e-38, %v1522_v10  ;;  %v3325_v57 = vsel %vm1930_vm2, %v3324_v45, %v5786_v6  ;;  %v3326_v41 = vrot.slane %v5786_v6, 4  ;;  %1914 = vmatpush.msrb.mxu3 %v6029_v20  ;;  %vm6054_vm8 = vmor %vm1366_vm9, %vm1367_vm7 }
 0x1fc   : > { %v1230_v5 = vadd.f32 %v5814_v55, %v1229_v61  ;;  %v5986_v30 = vsel %vm5898_vm14, %v5867_v32, %v1549_v39  ;;  %v5989_v24 = vadd.f32 %v5828_v49, %v1364_v3  ;;  %vm1232_vm11 = vweird.f32 %v5814_v55  ;;  %v5996_v61 = vld [vmem:[%s5254_s15 + $0x80] sm:$0xff]  ;;  %1833 = vmatpush.msrb.mxu1 %v5999_v13 }
 0x1fd   : > { %4466 = vmatmul.msk.f32.gmra.mxu2 %vm832_vm1, %v1285_v15  ;;  %v1235_v6 = vand.u32 2147483647, %v5742_v17  ;;  %v6001_v28 = vpop.eup %4647  ;;  %v3327_v32 = vsel %vm1930_vm2, %v5640_v40, %v3326_v41  ;;  %vm6007_vm14 = vmor %vm1231_vm5, %vm1232_vm11  ;;  %v1290_v14 = vadd.f32 %v5642_v7, %v5746_v60  ;;  %vm1292_vm15 = vweird.f32 %v5642_v7  ;;  %1792 = vmatpush.msrb.mxu0 %v5996_v61 }
 0x1fe   : > { %v1295_v45 = vand.u32 2147483647, %v5551_v18  ;;  %v1348_v10 = vsub.f32 1.0, %v5961_v51  ;;  %v3336_v40 = vrot.slane %v5689_v56, 4  ;;  %4651 = vrcp.f32 %v5968_v43  ;;  %vm6023_vm3 = vmor %vm1291_vm13, %vm1292_vm15 }
 0x1ff   : > { %v3268_v17 = vrot.slane %v5789_v53, 4  ;;  %v6031_v35 = vpop.eup %4649  ;;  %v3331_v3 = vperm.slane %v3325_v57, %v5325_v9  ;;  %v1234_v39 = vsel %vm6007_vm14, %v5814_v55, %v1230_v5  ;;  %vm1236_vm5 = vcmp.eq.f32.partialorder %v1235_v6, 8.507059e+37 }
 0x200   : > { %v1294_v18 = vsel %vm6023_vm3, %v5642_v7, %v1290_v14  ;;  %vm6042_vm13 = vcmp.eq.f32.partialorder %v1370_v34, 8.507059e+37  ;;  %v1482_v51 = vmul.f32 %v6001_v28, %v5910_v19  ;;  %v3335_v15 = vperm.slane %v3327_v32, %v5325_v9 }
 0x201   : > { %v1239_v55 = vsel %vm1236_vm5, %v5855_v25, %v1234_v39  ;;  %vm1296_vm6 = vcmp.eq.f32.partialorder %v1295_v45, 8.507059e+37  ;;  %v1335_v41 = vadd.f32 %v5773_v50, %v5918_v8  ;;  %vm1337_vm4 = vweird.f32 %v5773_v50 }
 0x202   : > { %v1240_v34 = vmul.f32 %v5169_v31, %v1239_v55  ;;  %v1299_v57 = vsel %vm1296_vm6, %v5721_v38, %v1294_v18  ;;  %v1369_v25 = vsel %vm6054_vm8, %v5828_v49, %v5989_v24  ;;  %v6069_v1 = vmul.f32 %v6031_v35, %v5906_v21  ;;  %vm1338_vm9 = vmor %vm1336_vm12, %vm1337_vm4 }
 0x203   : > { %v1300_v5 = vmul.f32 %v5148_v23, %v1299_v57  ;;  %v1340_v31 = vand.u32 2147483647, %v5674_v47  ;;  %v3350_v38 = vrot.slane %v3331_v3, 4  ;;  %v1339_v8 = vsel %vm1338_vm9, %v5773_v50, %v1335_v41  ;;  %v6116_v57 = vld [vmem:[%s5254_s15 + $0xc0] sm:$0xff] }
 0x204   : > { %4463 = vmatmul.msk.f32.gmra.mxu1 %vm832_vm1, %v1240_v34  ;;  %v3337_v6 = vsel %vm1930_vm2, %v3336_v40, %v5801_v44  ;;  %v3338_v49 = vrot.slane %v5801_v44, 4  ;;  %v6080_v24 = vpop.eup %4651  ;;  %v1483_v32 = vsub.f32 1.0, %v1482_v51  ;;  %v3362_v29 = vrot.slane %v3335_v15, 4  ;;  %v6119_v41 = vld [vmem:[%s5254_s15 + $0xe0] sm:$0xff]  ;;  %1874 = vmatpush.msrb.mxu2 %v6116_v57  ;;  %s4291_s15 = sshll.u32 %s4288_s12, 4  ;;  %s4292_s15 = int_to_ptr.hbm [resolvable:$true] %s4291_s15 }
 0x205   : > { %4467 = vmatmul.msk.f32.gmra.mxu2 %vm832_vm1, %v1300_v5  ;;  %vm1341_vm10 = vcmp.eq.f32.partialorder %v1340_v31, 8.507059e+37  ;;  %v3343_v23 = vperm.slane %v3337_v6, %v5325_v9  ;;  %v3269_v50 = vsel %vm1930_vm2, %v3268_v17, %v5840_v12  ;;  %v3270_v45 = vrot.slane %v5840_v12, 4  ;;  %1915 = vmatpush.msrb.mxu3 %v6119_v41  ;;  %v6139_v6 = vpop.xlane.xlu2 %1113  ;;  %s4687_s25 = sshra.s32 %s4292_s15, 4  ;;  %s4688_s25 = int_to_ptr.hbm [resolvable:$true] %s4687_s25 }
 0x206   : > { %v1344_v47 = vsel %vm1341_vm10, %v5851_v36, %v1339_v8  ;;  %v3339_v14 = vsel %vm1930_vm2, %v5689_v56, %v3338_v49  ;;  %v3280_v39 = vrot.slane %v5837_v52, 4  ;;  %v6094_v18 = vmul.f32 %v5929_v62, %v1348_v10  ;;  %s4689_s26 = scalar_lea.hbm %s4688_s25, 64  ;;  %p4694_p0 = scmp.lt.s32.totalorder %s4688_s25, %s8238_s5 }
 0x207   : > { %v1345_v44 = vmul.f32 %v5167_v54, %v1344_v47  ;;  %v3347_v40 = vperm.slane %v3339_v14, %v5325_v9  ;;  %v3348_v60 = vrot.slane %v3343_v23, 4  ;;  %v3351_v36 = vsel %vm1930_vm2, %v3343_v23, %v3350_v38  ;;  %v6145_v23 = vpop.xlane.xlu1 %1080  ;;  %p4690_p11 = scmp.ne.s32.totalorder %s4688_s25, %s4689_s26  ;;  %p4695_p1 = scmp.lt.s32.totalorder %s4693_s7, %s4689_s26 }
 0x208   : > { %v3271_v56 = vsel %vm1930_vm2, %v5789_v53, %v3270_v45  ;;  %v3275_v17 = vperm.slane %v3269_v50, %v5325_v9  ;;  %v1484_v12 = vmul.f32 %v6001_v28, %v1483_v32  ;;  %v6109_v10 = vsel %vm6042_vm13, %v5954_v46, %v1369_v25 }
 0x209   : > { %4470 = vmatmul.msk.f32.gmra.mxu3 %vm832_vm1, %v1345_v44  ;;  %v3349_v54 = vsel %vm1930_vm2, %v3348_v60, %v3331_v3  ;;  %v3360_v51 = vrot.slane %v3347_v40, 4  ;;  %v6104_v55 = vsel %vm1930_vm2, %v3347_v40, %v3362_v29  ;;  %v1497_v53 = vmul.f32 %v6080_v24, %v5968_v43  ;;  %p4691_p12 = pnand %p4690_p11, %p4811_p5  ;;  %p4696_p2 = por %p4695_p1, %p4694_p0 }
 0x20a   : > { %v3359_v7 = vperm.slane %v3351_v36, %v5421_v58  ;;  %v3279_v34 = vperm.slane %v3271_v56, %v5325_v9  ;;  %v3294_v5 = vrot.slane %v3275_v17, 4  ;;  %v3281_v16 = vsel %vm1930_vm2, %v3280_v39, %v5843_v42  ;;  %v6168_v56 = vpop.xlane.xlu0 %1077 }
 0x20b   : > { %v6122_v3 = vsel %vm1930_vm2, %v3360_v51, %v3335_v15  ;;  %v3282_v46 = vrot.slane %v5843_v42, 4  ;;  %v1513_v25 = vsub.f32 1.0, %v6069_v1  ;;  %vm1486_vm12 = vweird.f32 %v5910_v19  ;;  %p4692_p13 = pneg %p4691_p12 }
 0x20c   : > { %v3306_v31 = vrot.slane %v3279_v34, 4  ;;  %v3287_v38 = vperm.slane %v3281_v16, %v5325_v9  ;;  %v1485_v15 = vadd.f32 %v6001_v28, %v1484_v12  ;;  %vm1487_vm7 = vweird.f32 %v6001_v28 }
 0x20d   : > { %v6135_v8 = vperm.slane %v3349_v54, %v5421_v58  ;;  %v3283_v42 = vsel %vm1930_vm2, %v5837_v52, %v3282_v46  ;;  %v1492_v49 = vand.u32 2147483648, %v5910_v19  ;;  %v6142_v1 = vrot.slane %v3359_v7, 4  ;;  %vm6152_vm11 = vmor %vm1486_vm12, %vm1487_vm7  ;;  %p4697_p3 = pnand %p4696_p2, %p4692_p13 }
 0x20e   : > { %v3291_v32 = vperm.slane %v3283_v42, %v5325_v9  ;;  %v3292_v29 = vrot.slane %v3287_v38, 4  ;;  %v1490_v47 = vand.u32 2147483647, %v5910_v19  ;;  %v1498_v14 = vsub.f32 1.0, %v1497_v53 }
 0x20f   : > { %v1507_v50 = vand.u32 2147483648, %v5968_v43  ;;  %v3295_v45 = vsel %vm1930_vm2, %v3287_v38, %v3294_v5  ;;  %4653 = vrcp.f32 %v6139_v6  ;;  %vm1351_vm14 = vweird.f32 %v5859_v33 }
 0x210   : > { %v3293_v44 = vsel %vm1930_vm2, %v3292_v29, %v3275_v17  ;;  %v3304_v40 = vrot.slane %v3291_v32, 4  ;;  %v6158_v60 = vsel %vm1930_vm2, %v3291_v32, %v3306_v31  ;;  %v1489_v39 = vsel %vm6152_vm11, %v6001_v28, %v1485_v15 }
 0x211   : > { %v3372_v19 = vrot.slane %v6135_v8, 4  ;;  %v1567_v36 = vand.u32 2147483648, %v6139_v6  ;;  %4655 = vrcp.f32 %v6145_v23  ;;  %v6171_v17 = vmul.f32 %v6031_v35, %v1513_v25 }
 0x212   : > { %v1493_v12 = vor.u32 1.1754944e-38, %v1492_v49  ;;  %v6175_v54 = vsel %vm1930_vm2, 0.0, %v6142_v1  ;;  %v3305_v51 = vsel %vm1930_vm2, %v3304_v40, %v3279_v34  ;;  %vm1491_vm15 = vcmp.eq.f32.partialorder %v1490_v47, 8.507059e+37  ;;  %v6243_v42 = vpop.xlane.xlu0 %1116 }
 0x213   : > { %v6179_v28 = vmul.f32 %v6080_v24, %v1498_v14  ;;  %v6181_v53 = vor.u32 1.1754944e-38, %v1507_v50  ;;  %v3303_v7 = vperm.slane %v3295_v45, %v5421_v58  ;;  %v6187_v16 = vperm.slane %v3293_v44, %v5421_v58 }
 0x214   : > { %v6184_v5 = vsel %vm1491_vm15, %v1493_v12, %v1489_v39  ;;  %4657 = vrcp.f32 %v6168_v56  ;;  %v3214_v46 = vrot.slane %v5975_v26, 4  ;;  %v6194_v25 = vsel %vm1930_vm2, 0.0, %v3372_v19 }
 0x215   : > { %8368 = vst [vmem:[#allocation41_spill] sm:$0xff] %v6187_v16  ;;  %v6197_v38 = vor.u32 1.1754944e-38, %v1567_v36  ;;  %v6199_v15 = vpop.eup %4653  ;;  %v1402_v49 = vand.u32 2147483648, %v6145_v23  ;;  %v3212_v32 = vrot.slane %v5981_v22, 4  ;;  %v6210_v14 = vperm.slane %v3305_v51, %v5421_v58  ;;  %v6227_v51 = vpop.xlane.xlu2 %1089 }
 0x216   : > { %v3215_v29 = vsel %vm1930_vm2, %v5981_v22, %v3214_v46  ;;  %v6212_v50 = vrot.slane %v3303_v7, 4  ;;  %v1387_v45 = vand.u32 2147483648, %v6168_v56  ;;  %v3226_v40 = vrot.slane %v5978_v59, 4 }
 0x217   : > { %v6207_v47 = vpop.eup %4655  ;;  %8369 = vst [vmem:[#allocation42_spill] sm:$0xff] %v6210_v14  ;;  %v3223_v52 = vperm.slane %v3215_v29, %v5325_v9  ;;  %v3213_v39 = vsel %vm1930_vm2, %v3212_v32, %v5975_v26  ;;  %v1350_v22 = vadd.f32 %v5929_v62, %v6094_v18  ;;  %v1557_v19 = vmul.f32 %v6199_v15, %v6139_v6 }
 0x218   : > { %8370 = vst [vmem:[#allocation43_spill] sm:$0xff] %v6212_v50  ;;  %v3219_v36 = vperm.slane %v3213_v39, %v5325_v9  ;;  %vm1352_vm3 = vweird.f32 %v5929_v62  ;;  %v1355_v12 = vand.u32 2147483647, %v5859_v33  ;;  %v1392_v46 = vmul.f32 %v6207_v47, %v6145_v23 }
 0x219   : > { %v6233_v26 = vor.u32 1.1754944e-38, %v1402_v49  ;;  %vm1353_vm5 = vmor %vm1351_vm14, %vm1352_vm3  ;;  %v1375_v18 = vmul.f32 %v5183_v2, %v6109_v10  ;;  %v1435_v32 = vmul.f32 %v5163_v48, %v5890_v4  ;;  %v3250_v29 = vrot.slane %v3223_v52, 4 }
 0x21a   : > { %v6229_v7 = vpop.eup %4657  ;;  %v1354_v39 = vsel %vm1353_vm5, %v5929_v62, %v1350_v22  ;;  %vm1356_vm13 = vcmp.eq.f32.partialorder %v1355_v12, 8.507059e+37  ;;  %v3224_v44 = vrot.slane %v6029_v20, 4  ;;  %v3238_v31 = vrot.slane %v3219_v36, 4  ;;  %v6325_v14 = vpop.xlane.xlu0 %1092 }
 0x21b   : > { %v1359_v49 = vsel %vm1356_vm13, %v5963_v37, %v1354_v39  ;;  %4472 = vmatmul.msk.f32.vlgmr.msrb.gmra.mxu0 %vm832_vm1, %v1375_v18  ;;  %4476 = vmatmul.msk.f32.vlgmr.msrb.gmra.mxu1 %vm832_vm1, %v1435_v32  ;;  %v3227_v2 = vsel %vm1930_vm2, %v6029_v20, %v3226_v40  ;;  %4659 = vrcp.f32 %v6227_v51  ;;  %v1377_v48 = vmul.f32 %v6229_v7, %v6168_v56 }
 0x21c   : > { %v1360_v33 = vmul.f32 %v5181_v63, %v1359_v49  ;;  %v3225_v4 = vsel %vm1930_vm2, %v3224_v44, %v5978_v59  ;;  %v3235_v62 = vperm.slane %v3227_v2, %v5325_v9  ;;  %v6257_v37 = vor.u32 1.1754944e-38, %v1387_v45 }
 0x21d   : > { %v3158_v10 = vrot.slane %v5996_v61, 4  ;;  %v3231_v22 = vperm.slane %v3225_v4, %v5325_v9  ;;  %4661 = vrcp.f32 %v6243_v42  ;;  %v1558_v20 = vsub.f32 1.0, %v1557_v19 }
 0x21e   : > { %4471 = vmatmul.msk.f32.gmra.mxu3 %vm832_vm1, %v1360_v33  ;;  %v3248_v40 = vrot.slane %v3235_v62, 4  ;;  %v3251_v12 = vsel %vm1930_vm2, %v3235_v62, %v3250_v29  ;;  %v3156_v63 = vrot.slane %v6116_v57, 4  ;;  %v1393_v18 = vsub.f32 1.0, %v1392_v46 }
 0x21f   : > { %v3236_v59 = vrot.slane %v3231_v22, 4  ;;  %v3239_v44 = vsel %vm1930_vm2, %v3231_v22, %v3238_v31  ;;  %v3259_v45 = vperm.slane %v3251_v12, %v5421_v58  ;;  %v1378_v32 = vsub.f32 1.0, %v1377_v48 }
 0x220   : > { %v3249_v39 = vsel %vm1930_vm2, %v3248_v40, %v3223_v52  ;;  %v1447_v49 = vand.u32 2147483648, %v6227_v51  ;;  %v3157_v19 = vsel %vm1930_vm2, %v3156_v63, %v5996_v61  ;;  %v3247_v33 = vperm.slane %v3239_v44, %v5421_v58 }
 0x221   : > { %v6271_v2 = vpop.eup %4659  ;;  %v3237_v29 = vsel %vm1930_vm2, %v3236_v59, %v3219_v36  ;;  %v1582_v46 = vand.u32 2147483648, %v6243_v42  ;;  %v3159_v31 = vsel %vm1930_vm2, %v6116_v57, %v3158_v10  ;;  %v6279_v48 = vmul.f32 %v6199_v15, %v1558_v20 }
 0x222   : > { %v3170_v52 = vrot.slane %v5999_v13, 4  ;;  %v6283_v4 = vperm.slane %v3249_v39, %v5421_v58  ;;  %v3163_v61 = vperm.slane %v3157_v19, %v5325_v9  ;;  %v6289_v36 = vmul.f32 %v6207_v47, %v1393_v18  ;;  %v6310_v39 = vpop.xlane.xlu2 %1107 }
 0x223   : > { %v6286_v62 = vpop.eup %4661  ;;  %v6291_v22 = vrot.slane %v3259_v45, 4  ;;  %v3167_v40 = vperm.slane %v3159_v31, %v5325_v9  ;;  %v3168_v57 = vrot.slane %v6119_v41, 4  ;;  %v1379_v10 = vmul.f32 %v6229_v7, %v1378_v32  ;;  %v6396_v32 = vpop.xlane.xlu1 %1119 }
 0x224   : > { %v6297_v20 = vperm.slane %v3237_v29, %v5421_v58  ;;  %v1437_v12 = vmul.f32 %v6271_v2, %v6227_v51  ;;  %v6301_v63 = vor.u32 1.1754944e-38, %v1447_v49  ;;  %vm1381_vm6 = vweird.f32 %v6168_v56 }
 0x225   : > { %v6304_v18 = vrot.slane %v3247_v33, 4  ;;  %v1572_v59 = vmul.f32 %v6286_v62, %v6243_v42  ;;  %v6308_v44 = vor.u32 1.1754944e-38, %v1582_v46  ;;  %v3182_v45 = vrot.slane %v3163_v61, 4 }
 0x226   : > { %v3194_v19 = vrot.slane %v3167_v40, 4  ;;  %v3169_v29 = vsel %vm1930_vm2, %v3168_v57, %v5999_v13  ;;  %v3171_v49 = vsel %vm1930_vm2, %v6119_v41, %v3170_v52  ;;  %v6319_v33 = vsel %vm1930_vm2, 0.0, %v6291_v22 }
 0x227   : > { %v3175_v31 = vperm.slane %v3169_v29, %v5325_v9  ;;  %v3179_v46 = vperm.slane %v3171_v49, %v5325_v9  ;;  %v1495_v34 = vmul.f32 %v5195_v27, %v6184_v5  ;;  %v1438_v16 = vsub.f32 1.0, %v1437_v12 }
 0x228   : > { %v1555_v13 = vmul.f32 %v5177_v0, %v5986_v30  ;;  %4663 = vrcp.f32 %v6310_v39  ;;  %vm1501_vm8 = vweird.f32 %v5968_v43  ;;  %v1573_v41 = vsub.f32 1.0, %v1572_v59 }
 0x229   : > { %v3180_v52 = vrot.slane %v3175_v31, 4  ;;  %v3183_v57 = vsel %vm1930_vm2, %v3175_v31, %v3182_v45  ;;  %v3192_v29 = vrot.slane %v3179_v46, 4  ;;  %4480 = vmatmul.msk.f32.vlgmr.msrb.gmra.mxu2 %vm832_vm1, %v1495_v34  ;;  %vm1561_vm4 = vweird.f32 %v6139_v6 }
 0x22a   : > { %v3191_v27 = vperm.slane %v3183_v57, %v5421_v58  ;;  %v3195_v5 = vsel %vm1930_vm2, %v3179_v46, %v3194_v19  ;;  %4484 = vmatmul.msk.f32.vlgmr.msrb.gmra.mxu3 %vm832_vm1, %v1555_v13  ;;  %v1537_v0 = vand.u32 2147483648, %v6310_v39  ;;  %4665 = vrcp.f32 %v6325_v14 }
 0x22b   : > { %v6342_v30 = vsel %vm1930_vm2, 0.0, %v6304_v18  ;;  %v3181_v12 = vsel %vm1930_vm2, %v3180_v52, %v3163_v61  ;;  %v3193_v34 = vsel %vm1930_vm2, %v3192_v29, %v3167_v40  ;;  %v3203_v59 = vperm.slane %v3195_v5, %v5421_v58  ;;  %v8371_v29 = vld [vmem:[#allocation7_spill] sm:$0xff] }
 0x22c   : > { %v6348_v45 = vperm.slane %v3181_v12, %v5421_v58  ;;  %v6351_v19 = vperm.slane %v3193_v34, %v5421_v58  ;;  %v6353_v49 = vrot.slane %v3191_v27, 4  ;;  %v1462_v31 = vand.u32 2147483648, %v6325_v14 }
 0x22d   : > { %v6356_v46 = vrot.slane %v3203_v59, 4  ;;  %v1380_v13 = vadd.f32 %v6229_v7, %v1379_v10  ;;  %vm1382_vm9 = vweird.f32 %v6229_v7  ;;  %v1385_v61 = vand.u32 2147483647, %v6168_v56 }
 0x22e   : > { %v6361_v40 = vpop.eup %4663  ;;  %v1439_v52 = vmul.f32 %v6271_v2, %v1438_v16  ;;  %v6365_v57 = vmul.f32 %v6286_v62, %v1573_v41  ;;  %v6368_v27 = vor.u32 1.1754944e-38, %v1537_v0  ;;  %vm1383_vm10 = vmor %vm1381_vm6, %vm1382_vm9  ;;  %v6374_v10 = vsel %vm1930_vm2, 0.0, %v6353_v49 }
 0x22f   : > { %v3208_v5 = vrot.slane %v6351_v19, 4  ;;  %v1527_v12 = vmul.f32 %v6361_v40, %v6310_v39  ;;  %v1384_v16 = vsel %vm1383_vm10, %v6229_v7, %v1380_v13  ;;  %vm1396_vm12 = vweird.f32 %v6145_v23 }
 0x230   : > { %v6380_v41 = vpop.eup %4665  ;;  %v6385_v0 = vsel %vm1930_vm2, 0.0, %v6356_v46  ;;  %v6387_v56 = vor.u32 1.1754944e-38, %v1462_v31  ;;  %vm1386_vm7 = vcmp.eq.f32.partialorder %v1385_v61, 8.507059e+37  ;;  %v1500_v34 = vadd.f32 %v6080_v24, %v6179_v28 }
 0x231   : > { %vm1441_vm11 = vweird.f32 %v6227_v51  ;;  %v1528_v59 = vsub.f32 1.0, %v1527_v12  ;;  %v1452_v7 = vmul.f32 %v6380_v41, %v6325_v14  ;;  %v1389_v13 = vsel %vm1386_vm7, %v6257_v37, %v1384_v16 }
 0x232   : > { %vm1502_vm14 = vweird.f32 %v6080_v24  ;;  %v1390_v50 = vmul.f32 %v8371_v29, %v1389_v13  ;;  %v1505_v28 = vand.u32 2147483647, %v5968_v43  ;;  %v1560_v61 = vadd.f32 %v6199_v15, %v6279_v48  ;;  %v6420_v13 = vpop.xlane.xlu2 %1083 }
 0x233   : > { %vm6401_vm15 = vmor %vm1501_vm8, %vm1502_vm14  ;;  %vm1562_vm3 = vweird.f32 %v6199_v15  ;;  %v1453_v12 = vsub.f32 1.0, %v1452_v7  ;;  %v1565_v43 = vand.u32 2147483647, %v6139_v6  ;;  %vm1516_vm13 = vweird.f32 %v5906_v21 }
 0x234   : > { %v1504_v29 = vsel %vm6401_vm15, %v6080_v24, %v1500_v34  ;;  %vm6415_vm5 = vmor %vm1561_vm4, %vm1562_vm3  ;;  %v6424_v48 = vsel %vm1930_vm2, 0.0, %v3208_v5  ;;  %4473 = vmatmul.msk.f32.gmra.mxu0 %vm832_vm1, %v1390_v50  ;;  %vm1506_vm6 = vcmp.eq.f32.partialorder %v1505_v28, 8.507059e+37  ;;  %4667 = vrcp.f32 %v6396_v32  ;;  %v6431_v34 = vpop.xlane.xlu0 %1095  ;;  %v8376_v50 = vld [vmem:[#allocation6_spill] sm:$0xff] }
 0x235   : > { %v1564_v24 = vsel %vm6415_vm5, %v6199_v15, %v1560_v61  ;;  %v3612_v6 = vrot.slane %v6385_v0, 4  ;;  %v1509_v7 = vsel %vm1506_vm6, %v6181_v53, %v1504_v29  ;;  %vm1566_vm8 = vcmp.eq.f32.partialorder %v1565_v43, 8.507059e+37  ;;  %v8377_v61 = vld [vmem:[#allocation8_spill] sm:$0xff] }
 0x236   : > { %v1597_v31 = vand.u32 2147483648, %v6396_v32  ;;  %v6437_v5 = vmul.f32 %v6361_v40, %v1528_v59  ;;  %v1510_v28 = vmul.f32 %v8376_v50, %v1509_v7  ;;  %v1569_v37 = vsel %vm1566_vm8, %v6197_v38, %v1564_v24 }
 0x237   : > { %4669 = vrcp.f32 %v6420_v13  ;;  %vm1576_vm4 = vweird.f32 %v6243_v42  ;;  %v1454_v15 = vmul.f32 %v6380_v41, %v1453_v12  ;;  %v1570_v16 = vmul.f32 %v8377_v61, %v1569_v37  ;;  %v8382_v12 = vld [vmem:[#allocation9_spill] sm:$0xff] }
 0x238   : > { %v1417_v53 = vand.u32 2147483648, %v6420_v13  ;;  %4671 = vrcp.f32 %v6431_v34  ;;  %4481 = vmatmul.msk.f32.gmra.mxu2 %vm832_vm1, %v1510_v28  ;;  %v6448_v59 = vor.u32 1.1754944e-38, %v1597_v31  ;;  %v1477_v29 = vand.u32 2147483648, %v6431_v34 }
 0x239   : > { %v1395_v38 = vadd.f32 %v6207_v47, %v6289_v36  ;;  %vm1397_vm9 = vweird.f32 %v6207_v47  ;;  %vm1456_vm10 = vweird.f32 %v6325_v14  ;;  %4485 = vmatmul.msk.f32.gmra.mxu3 %vm832_vm1, %v1570_v16  ;;  %v1400_v43 = vand.u32 2147483647, %v6145_v23 }
 0x23a   : > { %v6456_v37 = vor.u32 1.1754944e-38, %v1417_v53  ;;  %vm6460_vm7 = vmor %vm1396_vm12, %vm1397_vm9  ;;  %v1440_v24 = vadd.f32 %v6271_v2, %v1439_v52  ;;  %vm1442_vm14 = vweird.f32 %v6271_v2  ;;  %v6467_v36 = vpop.eup %4667  ;;  %vm1531_vm15 = vweird.f32 %v6310_v39 }
 0x23b   : > { %v6470_v7 = vor.u32 1.1754944e-38, %v1477_v29  ;;  %v1399_v31 = vsel %vm6460_vm7, %v6207_v47, %v1395_v38  ;;  %vm6477_vm12 = vmor %vm1441_vm11, %vm1442_vm14  ;;  %v1445_v23 = vand.u32 2147483647, %v6227_v51  ;;  %v1515_v52 = vadd.f32 %v6031_v35, %v6171_v17 }
 0x23c   : > { %v1587_v28 = vmul.f32 %v6467_v36, %v6396_v32  ;;  %vm1401_vm3 = vcmp.eq.f32.partialorder %v1400_v43, 8.507059e+37  ;;  %v1444_v61 = vsel %vm6477_vm12, %v6271_v2, %v1440_v24  ;;  %vm1517_vm5 = vweird.f32 %v6031_v35  ;;  %v8383_v24 = vld [vmem:[#allocation10_spill] sm:$0xff] }
 0x23d   : > { %v6490_v47 = vpop.eup %4669  ;;  %v1404_v16 = vsel %vm1401_vm3, %v6233_v26, %v1399_v31  ;;  %vm1446_vm11 = vcmp.eq.f32.partialorder %v1445_v23, 8.507059e+37  ;;  %v1520_v51 = vand.u32 2147483647, %v5906_v21  ;;  %v1575_v17 = vadd.f32 %v6286_v62, %v6365_v57  ;;  %vm1518_vm6 = vmor %vm1516_vm13, %vm1517_vm5 }
 0x23e   : > { %v6496_v53 = vpop.eup %4671  ;;  %v1588_v29 = vsub.f32 1.0, %v1587_v28  ;;  %v1407_v38 = vmul.f32 %v6490_v47, %v6420_v13  ;;  %v1405_v2 = vmul.f32 %v8382_v12, %v1404_v16  ;;  %v1449_v43 = vsel %vm1446_vm11, %v6301_v63, %v1444_v61  ;;  %v8384_v63 = vld [vmem:[#allocation5_spill] sm:$0xff] }
 0x23f   : > { %v1467_v26 = vmul.f32 %v6496_v53, %v6431_v34  ;;  %v1450_v31 = vmul.f32 %v8383_v24, %v1449_v43  ;;  %v1519_v57 = vsel %vm1518_vm6, %v6031_v35, %v1515_v52  ;;  %vm1521_vm8 = vcmp.eq.f32.partialorder %v1520_v51, 8.507059e+37  ;;  %v8389_v24 = vld [vmem:[#allocation28_spill] sm:$0xff] }
 0x240   : > { %v1589_v50 = vmul.f32 %v6467_v36, %v1588_v29  ;;  %v1408_v23 = vsub.f32 1.0, %v1407_v38  ;;  %4474 = vmatmul.msk.f32.gmra.mxu0 %vm832_vm1, %v1405_v2  ;;  %v1524_v28 = vsel %vm1521_vm8, %v5966_v11, %v1519_v57  ;;  %vm1577_vm9 = vweird.f32 %v6286_v62  ;;  %v8385_v38 = vld [vmem:[#allocation11_spill] sm:$0xff]  ;;  %v8386_v2 = vld [vmem:[#allocation30_spill] sm:$0xff] }
 0x241   : > { %vm1411_vm7 = vweird.f32 %v6420_v13  ;;  %v1468_v21 = vsub.f32 1.0, %v1467_v26  ;;  %4477 = vmatmul.msk.f32.gmra.mxu1 %vm832_vm1, %v1450_v31  ;;  %v1525_v61 = vmul.f32 %v8384_v63, %v1524_v28  ;;  %vm1578_vm13 = vmor %vm1576_vm4, %vm1577_vm9  ;;  %v1580_v35 = vand.u32 2147483647, %v6243_v42  ;;  %v8388_v26 = vld [vmem:[#allocation13_spill] sm:$0xff]  ;;  %v8393_v63 = vld [vmem:[#allocation32_spill] sm:$0xff] }
 0x242   : > { %v1455_v52 = vadd.f32 %v6380_v41, %v1454_v15  ;;  %v1409_v16 = vmul.f32 %v6490_v47, %v1408_v23  ;;  %vm1471_vm14 = vweird.f32 %v6431_v34  ;;  %v1579_v11 = vsel %vm1578_vm13, %v6286_v62, %v1575_v17 }
 0x243   : > { %vm1457_vm12 = vweird.f32 %v6380_v41  ;;  %v1460_v51 = vand.u32 2147483647, %v6325_v14  ;;  %v1469_v29 = vmul.f32 %v6496_v53, %v1468_v21  ;;  %4482 = vmatmul.msk.f32.gmra.mxu2 %vm832_vm1, %v1525_v61  ;;  %vm1581_vm3 = vcmp.eq.f32.partialorder %v1580_v35, 8.507059e+37  ;;  %v8392_v21 = vld [vmem:[#allocation33_spill] sm:$0xff]  ;;  %v8394_v35 = vld [vmem:[#allocation12_spill] sm:$0xff] }
 0x244   : > { %vm1458_vm4 = vmor %vm1456_vm10, %vm1457_vm12  ;;  %v1530_v42 = vadd.f32 %v6361_v40, %v6437_v5  ;;  %vm1532_vm5 = vweird.f32 %v6361_v40  ;;  %v1584_v15 = vsel %vm1581_vm3, %v6308_v44, %v1579_v11  ;;  %v1535_v17 = vand.u32 2147483647, %v6310_v39  ;;  %v8390_v39 = vld [vmem:[#allocation34_spill] sm:$0xff] }
 0x245   : > { %v1459_v62 = vsel %vm1458_vm4, %v6380_v41, %v1455_v52  ;;  %vm1461_vm11 = vcmp.eq.f32.partialorder %v1460_v51, 8.507059e+37  ;;  %vm1533_vm6 = vmor %vm1531_vm15, %vm1532_vm5  ;;  %vm1591_vm8 = vweird.f32 %v6396_v32  ;;  %v1585_v14 = vmul.f32 %v8385_v38, %v1584_v15  ;;  %v8395_v51 = vld [vmem:[#allocation37_spill] sm:$0xff] }
 0x246   : > { %v1464_v12 = vsel %vm1461_vm11, %v6387_v56, %v1459_v62  ;;  %v1534_v5 = vsel %vm1533_vm6, %v6361_v40, %v1530_v42  ;;  %v8387_v43 = vrot.slane %v8386_v2, 4  ;;  %vm1536_vm10 = vcmp.eq.f32.partialorder %v1535_v17, 8.507059e+37  ;;  %v8396_v42 = vld [vmem:[#allocation35_spill] sm:$0xff] }
 0x247   : > { %v1465_v41 = vmul.f32 %v8388_v26, %v1464_v12  ;;  %v3434_v31 = vsel %vm1930_vm2, %v8389_v24, %v8386_v2  ;;  %v8391_v57 = vrot.slane %v8390_v39, 4  ;;  %4486 = vmatmul.msk.f32.gmra.mxu3 %vm832_vm1, %v1585_v14  ;;  %v1539_v56 = vsel %vm1536_vm10, %v6368_v27, %v1534_v5  ;;  %v8399_v39 = vld [vmem:[#allocation15_spill] sm:$0xff] }
 0x248   : > { %v3037_v44 = vsel %vm1930_vm2, 0.0, %v8387_v43  ;;  %v6553_v40 = vperm.slane %v3434_v31, %v5325_v9  ;;  %v3445_v61 = vsel %vm1930_vm2, %v8393_v63, %v8392_v21  ;;  %v1540_v52 = vmul.f32 %v8394_v35, %v1539_v56 }
 0x249   : > { %v3440_v23 = vsel %vm1930_vm2, %v8391_v57, %v3037_v44  ;;  %v6563_v11 = vperm.slane %v3445_v61, %v5325_v9  ;;  %v8397_v15 = vrot.slane %v8396_v42, 4  ;;  %v1410_v62 = vadd.f32 %v6490_v47, %v1409_v16  ;;  %4478 = vmatmul.msk.f32.gmra.mxu1 %vm832_vm1, %v1465_v41  ;;  %v8398_v41 = vld [vmem:[#allocation14_spill] sm:$0xff]  ;;  %v8402_v61 = vld [vmem:[#allocation25_spill] sm:$0xff] }
 0x24a   : > { %v6556_v28 = vperm.slane %v3440_v23, %v5325_v9  ;;  %vm1412_vm15 = vweird.f32 %v6490_v47  ;;  %v1415_v14 = vand.u32 2147483647, %v6420_v13  ;;  %v1470_v12 = vadd.f32 %v6496_v53, %v1469_v29 }
 0x24b   : > { %v3451_v27 = vsel %vm1930_vm2, %v8397_v15, %v8395_v51  ;;  %vm1413_vm9 = vmor %vm1411_vm7, %vm1412_vm15  ;;  %vm1472_vm13 = vweird.f32 %v6496_v53  ;;  %v1475_v16 = vand.u32 2147483647, %v6431_v34  ;;  %v1590_v5 = vadd.f32 %v6467_v36, %v1589_v50  ;;  %4483 = vmatmul.msk.f32.gmra.mxu2 %vm832_vm1, %v1540_v52  ;;  %v8404_v51 = vld [vmem:[#allocation16_spill] sm:$0xff] }
 0x24c   : > { %v6572_v17 = vperm.slane %v3451_v27, %v5325_v9  ;;  %v3456_v38 = vrot.slane %v6556_v28, 4  ;;  %v1414_v44 = vsel %vm1413_vm9, %v6490_v47, %v1410_v62  ;;  %vm1416_vm12 = vcmp.eq.f32.partialorder %v1415_v14, 8.507059e+37  ;;  %vm1473_vm7 = vmor %vm1471_vm14, %vm1472_vm13  ;;  %v8406_v14 = vld [vmem:[#allocation26_spill] sm:$0xff] }
 0x24d   : > { %v1419_v29 = vsel %vm1416_vm12, %v6456_v37, %v1414_v44  ;;  %v1474_v50 = vsel %vm1473_vm7, %v6496_v53, %v1470_v12  ;;  %vm1476_vm3 = vcmp.eq.f32.partialorder %v1475_v16, 8.507059e+37  ;;  %vm1592_vm4 = vweird.f32 %v6467_v36  ;;  %v8410_v44 = vld [vmem:[#allocation29_spill] sm:$0xff] }
 0x24e   : > { %v3457_v2 = vsel %vm1930_vm2, %v3456_v38, %v6553_v40  ;;  %v3468_v43 = vrot.slane %v6572_v17, 4  ;;  %v1420_v24 = vmul.f32 %v8398_v41, %v1419_v29  ;;  %v1479_v31 = vsel %vm1476_vm3, %v6470_v7, %v1474_v50  ;;  %vm1593_vm14 = vmor %vm1591_vm8, %vm1592_vm4  ;;  %v8411_v29 = vld [vmem:[#allocation27_spill] sm:$0xff] }
 0x24f   : > { %v6591_v13 = vperm.slane %v3457_v2, %v5421_v58  ;;  %v1480_v57 = vmul.f32 %v8399_v39, %v1479_v31  ;;  %v1595_v37 = vand.u32 2147483647, %v6396_v32  ;;  %v1594_v53 = vsel %vm1593_vm14, %v6467_v36, %v1590_v5  ;;  %v8408_v5 = vld [vmem:[#allocation22_spill] sm:$0xff]  ;;  %v8409_v2 = vld [vmem:[#allocation24_spill] sm:$0xff] }
 0x250   : > { %v3469_v26 = vsel %vm1930_vm2, %v3468_v43, %v6563_v11  ;;  %4475 = vmatmul.msk.f32.gmra.mxu0 %vm832_vm1, %v1420_v24  ;;  %v8400_v7 = vrot.slane %v6348_v45, 4  ;;  %v3596_v56 = vsel %vm1930_vm2, %v6353_v49, %v6348_v45  ;;  %v3607_v21 = vsel %vm1930_vm2, %v6356_v46, %v6351_v19 }
 0x251   : > { %v6601_v34 = vperm.slane %v3469_v26, %v5421_v58  ;;  %v3482_v47 = vrot.slane %v6591_v13, 4  ;;  %v3666_v63 = vrot.slane %v6319_v33, 4  ;;  %vm1596_vm5 = vcmp.eq.f32.partialorder %v1595_v37, 8.507059e+37  ;;  %4479 = vmatmul.msk.f32.gmra.mxu1 %vm832_vm1, %v1480_v57 }
 0x252   : > { %v3205_v23 = vsel %vm1930_vm2, 0.0, %v8400_v7  ;;  %v6623_v36 = vperm.slane %v3596_v56, %v5325_v9  ;;  %v1599_v45 = vsel %vm1596_vm5, %v6448_v59, %v1594_v53  ;;  %v8401_v49 = vrot.slane %v6374_v10, 4  ;;  %v8405_v10 = vld [vmem:[#allocation23_spill] sm:$0xff] }
 0x253   : > { %v3483_v32 = vsel %vm1930_vm2, %v6601_v34, %v3482_v47  ;;  %v6632_v46 = vperm.slane %v3607_v21, %v5325_v9  ;;  %v8403_v35 = vrot.slane %v8402_v61, 4  ;;  %v1600_v42 = vmul.f32 %v8404_v51, %v1599_v45 }
 0x254   : > { %3822 = vrot.lane.b32.xlu1 %v3483_v32, %s4739_s16  ;;  %v3602_v19 = vsel %vm1930_vm2, %v8401_v49, %v3205_v23  ;;  %v3613_v59 = vsel %vm1930_vm2, %v3612_v6, %v6424_v48  ;;  %v3488_v27 = vsel %vm1930_vm2, %v8405_v10, %v8402_v61  ;;  %v8407_v12 = vrot.slane %v8406_v14, 4 }
 0x255   : > { %v3093_v52 = vsel %vm1930_vm2, 0.0, %v8403_v35  ;;  %v6639_v15 = vperm.slane %v3602_v19, %v5325_v9  ;;  %v6649_v62 = vperm.slane %v3613_v59, %v5325_v9  ;;  %v3492_v38 = vperm.slane %v3488_v27, %v5325_v9  ;;  %4487 = vmatmul.msk.f32.gmra.mxu3 %vm832_vm1, %v1600_v42 }
 0x256   : > { %v3494_v16 = vsel %vm1930_vm2, %v8407_v12, %v3093_v52  ;;  %v3499_v43 = vsel %vm1930_vm2, %v8409_v2, %v8408_v5  ;;  %v8412_v50 = vrot.slane %v8411_v29, 4  ;;  %v3367_v31 = vperm.slane %v6122_v3, %v5421_v58 }
 0x257   : > { %v3618_v0 = vrot.slane %v6639_v15, 4  ;;  %v3498_v48 = vperm.slane %v3494_v16, %v5325_v9  ;;  %v6662_v6 = vperm.slane %v3499_v43, %v5325_v9  ;;  %v3630_v41 = vrot.slane %v6649_v62, 4 }
 0x258   : > { %v3505_v26 = vsel %vm1930_vm2, %v8412_v50, %v8410_v44  ;;  %v8413_v47 = vperm.slane %v6104_v55, %v5421_v58  ;;  %v3758_v53 = vsel %vm1930_vm2, %v6142_v1, %v6135_v8  ;;  %v8414_v7 = vrot.slane %v6175_v54, 4 }
 0x259   : > { %v3509_v24 = vperm.slane %v3505_v26, %v5325_v9  ;;  %v3619_v57 = vsel %vm1930_vm2, %v3618_v0, %v6623_v36  ;;  %v3510_v37 = vrot.slane %v3498_v48, 4  ;;  %v3631_v55 = vsel %vm1930_vm2, %v3630_v41, %v6632_v46 }
 0x25a   : > { %v3378_v39 = vrot.slane %v8413_v47, 4  ;;  %v3764_v23 = vsel %vm1930_vm2, %v8414_v7, %v6194_v25  ;;  %v6685_v56 = vperm.slane %v3619_v57, %v5421_v58  ;;  %v3376_v21 = vrot.slane %v3367_v31, 4 }
 0x25b   : > { %v3522_v3 = vrot.slane %v3509_v24, 4  ;;  %v3655_v32 = vrot.slane %v6342_v30, 4  ;;  %v6691_v45 = vperm.slane %v3631_v55, %v5421_v58  ;;  %v3511_v8 = vsel %vm1930_vm2, %v3510_v37, %v3492_v38 }
 0x25c   : > { %v3379_v1 = vsel %vm1930_vm2, 0.0, %v3378_v39  ;;  %v3644_v54 = vrot.slane %v6685_v56, 4  ;;  %v6697_v25 = vperm.slane %v3511_v8, %v5421_v58  ;;  %v6702_v19 = vperm.slane %v3758_v53, %v5325_v9 }
 0x25d   : > { %v3523_v49 = vsel %vm1930_vm2, %v3522_v3, %v6662_v6  ;;  %v3377_v61 = vsel %vm1930_vm2, 0.0, %v3376_v21  ;;  %v6709_v35 = vperm.slane %v3764_v23, %v5325_v9  ;;  %v3769_v52 = vsel %vm1930_vm2, %v3378_v39, %v3367_v31  ;;  %v8418_v3 = vld [vmem:[#allocation39_spill] sm:$0xff] }
 0x25e   : > { %v6705_v30 = vperm.slane %v3523_v49, %v5421_v58  ;;  %v8415_v51 = vrot.slane %v6283_v4, 4  ;;  %v3645_v59 = vsel %vm1930_vm2, %v6691_v45, %v3644_v54  ;;  %v3536_v10 = vrot.slane %v6697_v25, 4 }
 0x25f   : > { %v3774_v27 = vrot.slane %v3379_v1, 4  ;;  %3828 = vrot.lane.b32.xlu1 %v3645_v59, %s4739_s16  ;;  %v6720_v14 = vperm.slane %v3769_v52, %v5325_v9  ;;  %v3780_v12 = vrot.slane %v6709_v35, 4  ;;  %v8416_v16 = vrot.slane %v6297_v20, 4 }
 0x260   : > { %v3265_v42 = vsel %vm1930_vm2, 0.0, %v8415_v51  ;;  %v3650_v2 = vsel %vm1930_vm2, %v6304_v18, %v6297_v20  ;;  %v3537_v43 = vsel %vm1930_vm2, %v6705_v30, %v3536_v10  ;;  %v3661_v20 = vsel %vm1930_vm2, %v6291_v22, %v6283_v4  ;;  %v8417_v22 = vld [vmem:[#allocation38_spill] sm:$0xff] }
 0x261   : > { %v3261_v5 = vsel %vm1930_vm2, 0.0, %v8416_v16  ;;  %v3775_v0 = vsel %vm1930_vm2, %v3774_v27, %v3377_v61  ;;  %v3654_v44 = vperm.slane %v3650_v2, %v5325_v9  ;;  %3824 = vrot.lane.b32.xlu0 %v3537_v43, %s4739_s16  ;;  %v3781_v26 = vsel %vm1930_vm2, %v3780_v12, %v6702_v19  ;;  %v8421_v2 = vld [vmem:[#allocation43_spill] sm:$0xff] }
 0x262   : > { %v3656_v29 = vsel %vm1930_vm2, %v3655_v32, %v3261_v5  ;;  %v6736_v50 = vperm.slane %v3775_v0, %v5325_v9  ;;  %v6745_v18 = vperm.slane %v3781_v26, %v5421_v58  ;;  %v3665_v31 = vperm.slane %v3661_v20, %v5325_v9  ;;  %v8422_v26 = vld [vmem:[#allocation40_spill] sm:$0xff] }
 0x263   : > { %v3660_v41 = vperm.slane %v3656_v29, %v5325_v9  ;;  %v3667_v47 = vsel %vm1930_vm2, %v3666_v63, %v3265_v42  ;;  %v3512_v39 = vrot.slane %v3492_v38, 4  ;;  %v3524_v7 = vrot.slane %v6662_v6, 4  ;;  %v8423_v20 = vld [vmem:[#allocation36_spill] sm:$0xff] }
 0x264   : > { %v3792_v57 = vrot.slane %v6736_v50, 4  ;;  %v3671_v37 = vperm.slane %v3667_v47, %v5325_v9  ;;  %v3806_v23 = vrot.slane %v6745_v18, 4  ;;  %v2980_v55 = vrot.slane %v8417_v22, 4 }
 0x265   : > { %v3672_v53 = vrot.slane %v3660_v41, 4  ;;  %v3513_v4 = vsel %vm1930_vm2, %v3498_v48, %v3512_v39  ;;  %v2983_v21 = vsel %vm1930_vm2, 0.0, %v8418_v3  ;;  %v3525_v48 = vsel %vm1930_vm2, %v3509_v24, %v3524_v7 }
 0x266   : > { %v3793_v33 = vsel %vm1930_vm2, %v3792_v57, %v6720_v14  ;;  %v3684_v38 = vrot.slane %v3671_v37, 4  ;;  %v6763_v32 = vperm.slane %v3513_v4, %v5421_v58  ;;  %v2981_v1 = vsel %vm1930_vm2, 0.0, %v2980_v55 }
 0x267   : > { %v3673_v63 = vsel %vm1930_vm2, %v3672_v53, %v3654_v44  ;;  %v6766_v6 = vperm.slane %v3793_v33, %v5421_v58  ;;  %v6775_v49 = vperm.slane %v3525_v48, %v5421_v58  ;;  %v3380_v61 = vsel %vm1930_vm2, %v8418_v3, %v8417_v22  ;;  %v8425_v3 = vld [vmem:[#allocation18_spill] sm:$0xff]  ;;  %v8426_v48 = vld [vmem:[#allocation20_spill] sm:$0xff] }
 0x268   : > { %v6769_v8 = vperm.slane %v3673_v63, %v5421_v58  ;;  %v3685_v54 = vsel %vm1930_vm2, %v3684_v38, %v3665_v31  ;;  %v3385_v52 = vrot.slane %v2983_v21, 4  ;;  %v8419_v51 = vperm.slane %v6158_v60, %v5421_v58  ;;  %v8420_v60 = vld [vmem:[#allocation31_spill] sm:$0xff] }
 0x269   : > { %v3807_v24 = vsel %vm1930_vm2, %v6766_v6, %v3806_v23  ;;  %v6788_v59 = vperm.slane %v3685_v54, %v5421_v58  ;;  %v3538_v27 = vrot.slane %v6775_v49, 4  ;;  %v3384_v12 = vperm.slane %v3380_v61, %v5325_v9 }
 0x26a   : > { %v6783_v42 = vrot.slane %v8419_v51, 4  ;;  %v3698_v10 = vrot.slane %v6769_v8, 4  ;;  %3834 = vrot.lane.b32.xlu1 %v3807_v24, %s4739_s16  ;;  %v3386_v16 = vsel %vm1930_vm2, %v3385_v52, %v2981_v1  ;;  %v3395_v5 = vperm.slane %v8420_v60, %v5325_v9 }
 0x26b   : > { %v6799_v43 = vsel %vm1930_vm2, 0.0, %v8421_v2  ;;  %v3390_v29 = vperm.slane %v3386_v16, %v5325_v9  ;;  %v8424_v47 = vrot.slane %v8423_v20, 4  ;;  %v3539_v57 = vsel %vm1930_vm2, %v3538_v27, %v6763_v32 }
 0x26c   : > { %v3699_v0 = vsel %vm1930_vm2, %v6788_v59, %v3698_v10  ;;  %v3404_v7 = vrot.slane %v3384_v12, 4  ;;  %v3416_v23 = vrot.slane %v3395_v5, 4  ;;  %v3674_v22 = vrot.slane %v3654_v44, 4 }
 0x26d   : > { %v3397_v39 = vsel %vm1930_vm2, %v8424_v47, %v8422_v26  ;;  %3830 = vrot.lane.b32.xlu0 %v3699_v0, %s4739_s16  ;;  %v3402_v4 = vrot.slane %v3390_v29, 4  ;;  %v3686_v55 = vrot.slane %v3665_v31, 4  ;;  %v3148_v21 = vrot.slane %v8425_v3, 4 }
 0x26e   : > { %v3401_v53 = vperm.slane %v3397_v39, %v5325_v9  ;;  %v3405_v33 = vsel %vm1930_vm2, %v3390_v29, %v3404_v7  ;;  %v3151_v1 = vsel %vm1930_vm2, 0.0, %v8426_v48  ;;  %v3675_v51 = vsel %vm1930_vm2, %v3660_v41, %v3674_v22  ;;  %v8430_v22 = vld [vmem:[#allocation21_spill] sm:$0xff] }
 0x26f   : > { %v3413_v54 = vperm.slane %v3405_v33, %v5421_v58  ;;  %v3403_v52 = vsel %vm1930_vm2, %v3402_v4, %v3384_v12  ;;  %v6826_v24 = vperm.slane %v3675_v51, %v5421_v58  ;;  %v3687_v10 = vsel %vm1930_vm2, %v3671_v37, %v3686_v55 }
 0x270   : > { %v3417_v63 = vsel %vm1930_vm2, %v3401_v53, %v3416_v23  ;;  %v3414_v38 = vrot.slane %v3401_v53, 4  ;;  %v6822_v44 = vperm.slane %v3403_v52, %v5421_v58  ;;  %v6833_v60 = vperm.slane %v3687_v10, %v5421_v58  ;;  %v8429_v23 = vld [vmem:[#allocation17_spill] sm:$0xff] }
 0x271   : > { %v3425_v61 = vperm.slane %v3417_v63, %v5421_v58  ;;  %v3149_v12 = vsel %vm1930_vm2, 0.0, %v3148_v21  ;;  %v3542_v37 = vsel %vm1930_vm2, %v8426_v48, %v8425_v3  ;;  %v3547_v26 = vrot.slane %v3151_v1, 4 }
 0x272   : > { %v3415_v31 = vsel %vm1930_vm2, %v3414_v38, %v3395_v5  ;;  %3856 = vrot.lane.b32.xlu1 %v3539_v57, %s4740_s17  ;;  %v3428_v41 = vrot.slane %v6822_v44, 4  ;;  %v8427_v5 = vld [vmem:[#allocation19_spill] sm:$0xff]  ;;  %v3323_v20 = vsel %vm1930_vm2, 0.0, %v6783_v42  ;;  %v3700_v39 = vrot.slane %v6833_v60, 4 }
 0x273   : > { %v3430_v27 = vrot.slane %v3425_v61, 4  ;;  %v6830_v16 = vperm.slane %v3415_v31, %v5421_v58  ;;  %v8428_v0 = vrot.slane %v8427_v5, 4  ;;  %v3546_v57 = vperm.slane %v3542_v37, %v5325_v9 }
 0x274   : > { %v3548_v7 = vsel %vm1930_vm2, %v3547_v26, %v3149_v12  ;;  %v3553_v4 = vsel %vm1930_vm2, %v8429_v23, %v8427_v5  ;;  %v8431_v55 = vrot.slane %v8430_v22, 4  ;;  %v3709_v21 = vrot.slane %v6799_v43, 4  ;;  %v8432_v12 = vld [vmem:[#allocation41_spill] sm:$0xff]  ;;  %v1630_v23 = vpop.f32.mrf.mxu0 }
 0x275   : > { %v3153_v29 = vsel %vm1930_vm2, 0.0, %v8428_v0  ;;  %v3431_v47 = vsel %vm1930_vm2, %v3430_v27, %v3413_v54  ;;  %v3429_v53 = vsel %vm1930_vm2, %v6830_v16, %v3428_v41  ;;  %v3552_v33 = vperm.slane %v3548_v7, %v5325_v9 }
 0x276   : > { %3852 = vrot.lane.b32.xlu0 %v3431_v47, %s4740_s17  ;;  %v3559_v3 = vsel %vm1930_vm2, %v8431_v55, %v3153_v29  ;;  %3820 = vrot.lane.b32.xlu2 %v3429_v53, %s4739_s16  ;;  %v3557_v63 = vperm.slane %v3553_v4, %v5325_v9  ;;  %v3720_v48 = vrot.slane %v3323_v20, 4  ;;  %v3701_v1 = vsel %vm1930_vm2, %v3700_v39, %v6826_v24  ;;  %v8434_v29 = vld [vmem:[#allocation42_spill] sm:$0xff] }
 0x277   : > { %v3563_v38 = vperm.slane %v3559_v3, %v5325_v9  ;;  %v3566_v52 = vrot.slane %v3546_v57, 4  ;;  %v3432_v51 = vrot.slane %v3413_v54, 4  ;;  %v3564_v10 = vrot.slane %v3552_v33, 4  ;;  %v1712_v3 = vpop.f32.mrf.mxu2 }
 0x278   : > { %v3578_v31 = vrot.slane %v3557_v63, 4  ;;  %v8433_v41 = vrot.slane %v8432_v12, 4  ;;  %v3320_v37 = vrot.slane %v8434_v29, 4  ;;  %v3704_v26 = vsel %vm1930_vm2, %v8421_v2, %v8432_v12 }
 0x279   : > { %v3576_v27 = vrot.slane %v3563_v38, 4  ;;  %v3567_v5 = vsel %vm1930_vm2, %v3552_v33, %v3566_v52  ;;  %v3433_v0 = vsel %vm1930_vm2, %v3425_v61, %v3432_v51  ;;  %v3565_v47 = vsel %vm1930_vm2, %v3564_v10, %v3546_v57  ;;  %v1671_v52 = vpop.f32.mrf.mxu1 }
 0x27a   : > { %v3317_v43 = vsel %vm1930_vm2, 0.0, %v8433_v41  ;;  %v3575_v20 = vperm.slane %v3567_v5, %v5421_v58  ;;  %v3579_v54 = vsel %vm1930_vm2, %v3563_v38, %v3578_v31  ;;  %3862 = vrot.lane.b32.xlu1 %v3701_v1, %s4740_s17  ;;  %v6882_v61 = vperm.slane %v3565_v47, %v5421_v58 }
 0x27b   : > { %v3577_v39 = vsel %vm1930_vm2, %v3576_v27, %v3557_v63  ;;  %v3587_v53 = vperm.slane %v3579_v54, %v5421_v58  ;;  %v3321_v2 = vsel %vm1930_vm2, 0.0, %v3320_v37  ;;  %v3708_v4 = vperm.slane %v3704_v26, %v5325_v9 }
 0x27c   : > { %v6885_v7 = vperm.slane %v3577_v39, %v5421_v58  ;;  %v3710_v22 = vsel %vm1930_vm2, %v3709_v21, %v3317_v43  ;;  %v3715_v57 = vsel %vm1930_vm2, %v6783_v42, %v8434_v29  ;;  %v3721_v55 = vsel %vm1930_vm2, %v3720_v48, %v3321_v2 }
 0x27d   : > { %v3592_v33 = vrot.slane %v3587_v53, 4  ;;  %v3590_v63 = vrot.slane %v6882_v61, 4  ;;  %v3714_v38 = vperm.slane %v3710_v22, %v5325_v9  ;;  %v1932_v1 = vrot.slane %v1630_v23, 4 }
 0x27e   : > { %v3719_v51 = vperm.slane %v3715_v57, %v5325_v9  ;;  %v3725_v31 = vperm.slane %v3721_v55, %v5325_v9  ;;  %v3728_v10 = vrot.slane %v3708_v4, 4  ;;  %v1929_v48 = vrot.slane %v1712_v3, 4  ;;  %v1753_v57 = vpop.f32.mrf.mxu3 }
 0x27f   : > { %v3593_v21 = vsel %vm1930_vm2, %v3592_v33, %v3575_v20  ;;  %v3591_v42 = vsel %vm1930_vm2, %v6885_v7, %v3590_v63  ;;  %v3726_v27 = vrot.slane %v3714_v38, 4  ;;  %v1933_v5 = vsel %vm1930_vm2, %v1712_v3, %v1932_v1 }
 0x280   : > { %3858 = vrot.lane.b32.xlu0 %v3593_v21, %s4740_s17  ;;  %3826 = vrot.lane.b32.xlu2 %v3591_v42, %s4739_s16  ;;  %v3729_v12 = vsel %vm1930_vm2, %v3714_v38, %v3728_v10  ;;  %v3740_v41 = vrot.slane %v3719_v51, 4  ;;  %v3738_v43 = vrot.slane %v3725_v31, 4  ;;  %v1944_v29 = vrot.slane %v1671_v52, 4  ;;  %v1633_v21 = vpop.f32.mrf.mxu0 }
 0x281   : > { %v3727_v37 = vsel %vm1930_vm2, %v3726_v27, %v3708_v4  ;;  %v1931_v26 = vsel %vm1930_vm2, %v1929_v48, %v1630_v23  ;;  %v1941_v54 = vperm.slane %v1933_v5, %v5325_v9  ;;  %v6916_v55 = vperm.slane %v3729_v12, %v5421_v58  ;;  %v1715_v48 = vpop.f32.mrf.mxu2 }
 0x282   : > { %v3741_v47 = vsel %vm1930_vm2, %v3725_v31, %v3740_v41  ;;  %v6910_v39 = vperm.slane %v3727_v37, %v5421_v58  ;;  %v3739_v2 = vsel %vm1930_vm2, %v3738_v43, %v3719_v51  ;;  %v1937_v22 = vperm.slane %v1931_v26, %v5325_v9  ;;  %3884 = vrot.lane.b32.xlu1 %v3433_v0, %s4741_s23 }
 0x283   : > { %v6919_v23 = vperm.slane %v3741_v47, %v5421_v58  ;;  %v6922_v4 = vperm.slane %v3739_v2, %v5421_v58  ;;  %v3594_v3 = vrot.slane %v3575_v20, 4  ;;  %v1968_v63 = vrot.slane %v1941_v54, 4 }
 0x284   : > { %v3752_v33 = vrot.slane %v6910_v39, 4  ;;  %v3458_v38 = vrot.slane %v6553_v40, 4  ;;  %v3470_v1 = vrot.slane %v6563_v11, 4  ;;  %v1956_v0 = vrot.slane %v1937_v22, 4 }
 0x285   : > { %v3754_v51 = vrot.slane %v6919_v23, 4  ;;  %v3595_v31 = vsel %vm1930_vm2, %v3587_v53, %v3594_v3  ;;  %v1942_v10 = vrot.slane %v1753_v57, 4  ;;  %v1945_v40 = vsel %vm1930_vm2, %v1753_v57, %v1944_v29 }
 0x286   : > { %v3753_v42 = vsel %vm1930_vm2, %v6922_v4, %v3752_v33  ;;  %v3459_v20 = vsel %vm1930_vm2, %v6556_v28, %v3458_v38  ;;  %v3471_v27 = vsel %vm1930_vm2, %v6572_v17, %v3470_v1  ;;  %v1953_v17 = vperm.slane %v1945_v40, %v5325_v9 }
 0x287   : > { %v3755_v11 = vsel %vm1930_vm2, %v3754_v51, %v6916_v55  ;;  %v3467_v12 = vperm.slane %v3459_v20, %v5421_v58  ;;  %v3479_v53 = vperm.slane %v3471_v27, %v5421_v58  ;;  %v1943_v41 = vsel %vm1930_vm2, %v1942_v10, %v1671_v52  ;;  %v1674_v10 = vpop.f32.mrf.mxu1 }
 0x288   : > { %3864 = vrot.lane.b32.xlu0 %v3755_v11, %s4740_s17  ;;  %3832 = vrot.lane.b32.xlu2 %v3753_v42, %s4739_s16  ;;  %v1949_v28 = vperm.slane %v1943_v41, %v5325_v9  ;;  %v1988_v43 = vrot.slane %v1633_v21, 4  ;;  %v3620_v5 = vrot.slane %v6623_v36, 4  ;;  %v3632_v26 = vrot.slane %v6632_v46, 4  ;;  %v6970_v41 = vpop.f32.mrf.mxu0 }
 0x289   : > { %v3486_v29 = vrot.slane %v3467_v12, 4  ;;  %v3484_v37 = vrot.slane %v3479_v53, 4  ;;  %v1986_v47 = vrot.slane %v1715_v48, 4  ;;  %v1966_v52 = vrot.slane %v1953_v17, 4 }
 0x28a   : > { %v1954_v2 = vrot.slane %v1949_v28, 4  ;;  %v1957_v57 = vsel %vm1930_vm2, %v1949_v28, %v1956_v0  ;;  %v1969_v3 = vsel %vm1930_vm2, %v1953_v17, %v1968_v63  ;;  %3890 = vrot.lane.b32.xlu1 %v3595_v31, %s4741_s23  ;;  %v3621_v0 = vsel %vm1930_vm2, %v6639_v15, %v3620_v5  ;;  %v1756_v28 = vpop.f32.mrf.mxu3 }
 0x28b   : > { %v3487_v33 = vsel %vm1930_vm2, %v3479_v53, %v3486_v29  ;;  %v3485_v38 = vsel %vm1930_vm2, %v3484_v37, %v3467_v12  ;;  %v1965_v1 = vperm.slane %v1957_v57, %v5421_v58  ;;  %v1977_v36 = vperm.slane %v1969_v3, %v5421_v58 }
 0x28c   : > { %v1955_v51 = vsel %vm1930_vm2, %v1954_v2, %v1937_v22  ;;  %v1967_v46 = vsel %vm1930_vm2, %v1966_v52, %v1941_v54  ;;  %v3633_v63 = vsel %vm1930_vm2, %v6649_v62, %v3632_v26  ;;  %v3629_v40 = vperm.slane %v3621_v0, %v5421_v58 }
 0x28d   : > { %v1961_v31 = vperm.slane %v1955_v51, %v5421_v58  ;;  %v1973_v42 = vperm.slane %v1967_v46, %v5421_v58  ;;  %v1980_v20 = vrot.slane %v1965_v1, 4  ;;  %v1984_v27 = vrot.slane %v1977_v36, 4 }
 0x28e   : > { %v3641_v11 = vperm.slane %v3633_v63, %v5421_v58  ;;  %v1987_v22 = vsel %vm1930_vm2, %v1986_v47, %v1633_v21  ;;  %v1989_v54 = vsel %vm1930_vm2, %v1715_v48, %v1988_v43  ;;  %v2000_v12 = vrot.slane %v1674_v10, 4 }
 0x28f   : > { %v1981_v62 = vsel %vm1930_vm2, 0.0, %v1980_v20  ;;  %v3648_v53 = vrot.slane %v3629_v40, 4  ;;  %v1978_v17 = vrot.slane %v1961_v31, 4  ;;  %v1982_v5 = vrot.slane %v1973_v42, 4 }
 0x290   : > { %3886 = vrot.lane.b32.xlu0 %v3487_v33, %s4741_s23  ;;  %3854 = vrot.lane.b32.xlu2 %v3485_v38, %s4740_s17  ;;  %v1985_v29 = vsel %vm1930_vm2, 0.0, %v1984_v27  ;;  %v3646_v21 = vrot.slane %v3641_v11, 4  ;;  %v1993_v43 = vperm.slane %v1987_v22, %v5325_v9  ;;  %v1997_v37 = vperm.slane %v1989_v54, %v5325_v9 }
 0x291   : > { %v3649_v48 = vsel %vm1930_vm2, %v3641_v11, %v3648_v53  ;;  %v3782_v26 = vrot.slane %v6702_v19, 4  ;;  %v2383_v47 = vrot.slane %v1981_v62, 4  ;;  %v3794_v57 = vrot.slane %v6720_v14, 4 }
 0x292   : > { %v3647_v2 = vsel %vm1930_vm2, %v3646_v21, %v3629_v40  ;;  %v1998_v52 = vrot.slane %v1756_v28, 4  ;;  %v2389_v3 = vsel %vm1930_vm2, %v1984_v27, %v1973_v42  ;;  %v2394_v33 = vrot.slane %v1985_v29, 4  ;;  %v1718_v27 = vpop.f32.mrf.mxu2 }
 0x293   : > { %v3783_v38 = vsel %vm1930_vm2, %v6709_v35, %v3782_v26  ;;  %v2001_v1 = vsel %vm1930_vm2, %v1756_v28, %v2000_v12  ;;  %v2024_v36 = vrot.slane %v1997_v37, 4  ;;  %v3795_v51 = vsel %vm1930_vm2, %v6736_v50, %v3794_v57  ;;  %v7005_v28 = vpop.f32.mrf.mxu1 }
 0x294   : > { %v1999_v19 = vsel %vm1930_vm2, %v1998_v52, %v1674_v10  ;;  %v2009_v46 = vperm.slane %v2001_v1, %v5325_v9  ;;  %v2012_v0 = vrot.slane %v1993_v43, 4  ;;  %v6988_v14 = vperm.slane %v3795_v51, %v5421_v58 }
 0x295   : > { %v2005_v63 = vperm.slane %v1999_v19, %v5325_v9  ;;  %v3540_v42 = vrot.slane %v6763_v32, 4  ;;  %v1983_v35 = vsel %vm1930_vm2, 0.0, %v1982_v5  ;;  %v2378_v50 = vsel %vm1930_vm2, %v1980_v20, %v1961_v31 }
 0x296   : > { %v2022_v40 = vrot.slane %v2009_v46, 4  ;;  %v2025_v11 = vsel %vm1930_vm2, %v2009_v46, %v2024_v36  ;;  %v1979_v12 = vsel %vm1930_vm2, 0.0, %v1978_v17  ;;  %v7001_v32 = vperm.slane %v3783_v38, %v5421_v58  ;;  %v7014_v17 = vpop.f32.mrf.mxu0 }
 0x297   : > { %v2010_v10 = vrot.slane %v2005_v63, 4  ;;  %v2013_v22 = vsel %vm1930_vm2, %v2005_v63, %v2012_v0  ;;  %v2033_v54 = vperm.slane %v2025_v11, %v5421_v58  ;;  %v3808_v62 = vrot.slane %v6988_v14, 4 }
 0x298   : > { %3892 = vrot.lane.b32.xlu0 %v3649_v48, %s4741_s23  ;;  %3860 = vrot.lane.b32.xlu2 %v3647_v2, %s4740_s17  ;;  %v2023_v53 = vsel %vm1930_vm2, %v2022_v40, %v1997_v37  ;;  %v7009_v31 = vsel %vm1930_vm2, %v6775_v49, %v3540_v42  ;;  %v2021_v29 = vperm.slane %v2013_v22, %v5421_v58  ;;  %v2044_v36 = vrot.slane %v6970_v41, 4  ;;  %v1759_v22 = vpop.f32.mrf.mxu3 }
 0x299   : > { %v2382_v21 = vperm.slane %v2378_v50, %v5325_v9  ;;  %v2393_v37 = vperm.slane %v2389_v3, %v5325_v9  ;;  %v2384_v26 = vsel %vm1930_vm2, %v2383_v47, %v1979_v12  ;;  %v2395_v2 = vsel %vm1930_vm2, %v2394_v33, %v1983_v35 }
 0x29a   : > { %v2011_v49 = vsel %vm1930_vm2, %v2010_v10, %v1993_v43  ;;  %v2029_v57 = vperm.slane %v2023_v53, %v5421_v58  ;;  %v2040_v52 = vrot.slane %v2033_v54, 4  ;;  %v2388_v38 = vperm.slane %v2384_v26, %v5325_v9  ;;  %v1721_v10 = vpop.f32.mrf.mxu2 }
 0x29b   : > { %v3809_v51 = vsel %vm1930_vm2, %v3808_v62, %v7001_v32  ;;  %v2100_v3 = vrot.slane %v7014_v17, 4  ;;  %v2036_v19 = vrot.slane %v2021_v29, 4  ;;  %v2056_v47 = vrot.slane %v7005_v28, 4 }
 0x29c   : > { %v2399_v33 = vperm.slane %v2395_v2, %v5325_v9  ;;  %v2402_v43 = vrot.slane %v2382_v21, 4  ;;  %v2017_v46 = vperm.slane %v2011_v49, %v5421_v58  ;;  %v2414_v0 = vrot.slane %v2393_v37, 4 }
 0x29d   : > { %v2042_v63 = vrot.slane %v1718_v27, 4  ;;  %v2045_v42 = vsel %vm1930_vm2, %v1718_v27, %v2044_v36  ;;  %v2038_v35 = vrot.slane %v2029_v57, 4  ;;  %v2041_v40 = vsel %vm1930_vm2, 0.0, %v2040_v52 }
 0x29e   : > { %v2403_v11 = vsel %vm1930_vm2, %v2388_v38, %v2402_v43  ;;  %v2400_v50 = vrot.slane %v2388_v38, 4  ;;  %v2443_v54 = vsel %vm1930_vm2, %v2040_v52, %v2029_v57  ;;  %v2415_v62 = vsel %vm1930_vm2, %v2399_v33, %v2414_v0  ;;  %v7048_v57 = vpop.f32.mrf.mxu1 }
 0x29f   : > { %v2411_v12 = vperm.slane %v2403_v11, %v5421_v58  ;;  %v2043_v53 = vsel %vm1930_vm2, %v2042_v63, %v6970_v41  ;;  %v2037_v27 = vsel %vm1930_vm2, 0.0, %v2036_v19  ;;  %v2423_v29 = vperm.slane %v2415_v62, %v5421_v58 }
 0x2a0   : > { %3866 = vrot.lane.b32.xlu2 %v3809_v51, %s4740_s17  ;;  %v2053_v26 = vperm.slane %v2045_v42, %v5325_v9  ;;  %v2401_v2 = vsel %vm1930_vm2, %v2400_v50, %v2382_v21  ;;  %v7046_v38 = vperm.slane %v2043_v53, %v5325_v9  ;;  %v2412_v52 = vrot.slane %v2399_v33, 4 }
 0x2a1   : > { %v2430_v49 = vrot.slane %v2411_v12, 4  ;;  %v2098_v36 = vrot.slane %v1721_v10, 4  ;;  %v2034_v51 = vrot.slane %v2017_v46, 4  ;;  %v7051_v43 = vperm.slane %v2443_v54, %v5325_v9 }
 0x2a2   : > { %v2428_v41 = vrot.slane %v2423_v29, 4  ;;  %v7054_v0 = vperm.slane %v2401_v2, %v5421_v58  ;;  %v2039_v63 = vsel %vm1930_vm2, 0.0, %v2038_v35  ;;  %v2437_v42 = vrot.slane %v2037_v27, 4 }
 0x2a3   : > { %v2448_v21 = vrot.slane %v2041_v40, 4  ;;  %v2431_v11 = vsel %vm1930_vm2, %v2423_v29, %v2430_v49  ;;  %v2080_v33 = vrot.slane %v2053_v26, 4  ;;  %v2054_v62 = vrot.slane %v1759_v22, 4 }
 0x2a4   : > { %v2429_v50 = vsel %vm1930_vm2, %v2428_v41, %v2411_v12  ;;  %2882 = vrot.lane.b32.xlu1 %v2431_v11, %s4741_s23  ;;  %v2057_v53 = vsel %vm1930_vm2, %v1759_v22, %v2056_v47  ;;  %v2068_v54 = vrot.slane %v7046_v38, 4  ;;  %v2413_v2 = vsel %vm1930_vm2, %v2412_v52, %v2393_v37 }
 0x2a5   : > { %2850 = vrot.lane.b32.xlu0 %v2429_v50, %s4740_s17  ;;  %v2099_v35 = vsel %vm1930_vm2, %v2098_v36, %v7014_v17  ;;  %v2065_v40 = vperm.slane %v2057_v53, %v5325_v9  ;;  %v2426_v12 = vrot.slane %v7054_v0, 4  ;;  %v2101_v27 = vsel %vm1930_vm2, %v1721_v10, %v2100_v3  ;;  %v1762_v10 = vpop.f32.mrf.mxu3 }
 0x2a6   : > { %v2055_v47 = vsel %vm1930_vm2, %v2054_v62, %v7005_v28  ;;  %v2035_v22 = vsel %vm1930_vm2, 0.0, %v2034_v51  ;;  %v2432_v17 = vsel %vm1930_vm2, %v2036_v19, %v2017_v46  ;;  %v7078_v52 = vperm.slane %v2413_v2, %v5421_v58 }
 0x2a7   : > { %v2061_v29 = vperm.slane %v2055_v47, %v5325_v9  ;;  %v2078_v37 = vrot.slane %v2065_v40, 4  ;;  %v2081_v49 = vsel %vm1930_vm2, %v2065_v40, %v2080_v33  ;;  %v2438_v36 = vsel %vm1930_vm2, %v2437_v42, %v2035_v22  ;;  %v7094_v33 = vpop.f32.mrf.mxu1 }
 0x2a8   : > { %3888 = vrot.lane.b32.xlu2 %v7009_v31, %s4741_s23  ;;  %v2436_v31 = vperm.slane %v2432_v17, %v5325_v9  ;;  %v2449_v3 = vsel %vm1930_vm2, %v2448_v21, %v2039_v63  ;;  %v2105_v28 = vperm.slane %v2099_v35, %v5325_v9  ;;  %v7085_v51 = vperm.slane %v2101_v27, %v5325_v9  ;;  %v1794_v21 = vpop.f32.mrf.mxu0 }
 0x2a9   : > { %v2069_v41 = vsel %vm1930_vm2, %v2061_v29, %v2068_v54  ;;  %v2442_v11 = vperm.slane %v2438_v36, %v5325_v9  ;;  %v2427_v19 = vsel %vm1930_vm2, %v7078_v52, %v2426_v12  ;;  %v2066_v46 = vrot.slane %v2061_v29, 4 }
 0x2aa   : > { %v2089_v50 = vperm.slane %v2081_v49, %v5421_v58  ;;  %v2453_v42 = vperm.slane %v2449_v3, %v5325_v9  ;;  %v2079_v63 = vsel %vm1930_vm2, %v2078_v37, %v2053_v26  ;;  %v2456_v62 = vrot.slane %v2436_v31, 4 }
 0x2ab   : > { %v2468_v53 = vrot.slane %v7051_v43, 4  ;;  %v2110_v2 = vrot.slane %v1762_v10, 4  ;;  %v2112_v40 = vrot.slane %v7048_v57, 4  ;;  %v2077_v12 = vperm.slane %v2069_v41, %v5421_v58 }
 0x2ac   : > { %2818 = vrot.lane.b32.xlu1 %v2427_v19, %s4739_s16  ;;  %v2124_v27 = vrot.slane %v2105_v28, 4  ;;  %v2136_v26 = vrot.slane %v7085_v51, 4  ;;  %v2457_v47 = vsel %vm1930_vm2, %v2442_v11, %v2456_v62  ;;  %v2085_v29 = vperm.slane %v2079_v63, %v5421_v58 }
 0x2ad   : > { %v2469_v22 = vsel %vm1930_vm2, %v2453_v42, %v2468_v53  ;;  %v2096_v37 = vrot.slane %v2089_v50, 4  ;;  %v2156_v49 = vrot.slane %v1794_v21, 4  ;;  %v2168_v17 = vrot.slane %v7094_v33, 4  ;;  %v1876_v50 = vpop.f32.mrf.mxu2 }
 0x2ae   : > { %v2067_v36 = vsel %vm1930_vm2, %v2066_v46, %v7046_v38  ;;  %v2465_v3 = vperm.slane %v2457_v47, %v5421_v58  ;;  %v2477_v41 = vperm.slane %v2469_v22, %v5421_v58  ;;  %v2111_v19 = vsel %vm1930_vm2, %v2110_v2, %v7048_v57 }
 0x2af   : > { %v2092_v1 = vrot.slane %v2077_v12, 4  ;;  %v2113_v62 = vsel %vm1930_vm2, %v1762_v10, %v2112_v40  ;;  %v2117_v53 = vperm.slane %v2111_v19, %v5325_v9  ;;  %v2454_v63 = vrot.slane %v2442_v11, 4  ;;  %v1917_v11 = vpop.f32.mrf.mxu3 }
 0x2b0   : > { %v2482_v48 = vrot.slane %v2477_v41, 4  ;;  %v2484_v35 = vrot.slane %v2465_v3, 4  ;;  %v2121_v5 = vperm.slane %v2113_v62, %v5325_v9  ;;  %v2466_v20 = vrot.slane %v2453_v42, 4 }
 0x2b1   : > { %v2122_v38 = vrot.slane %v2117_v53, 4  ;;  %v2125_v46 = vsel %vm1930_vm2, %v2117_v53, %v2124_v27  ;;  %v2455_v47 = vsel %vm1930_vm2, %v2454_v63, %v2436_v31  ;;  %v2154_v22 = vrot.slane %v1876_v50, 4 }
 0x2b2   : > { %v2483_v57 = vsel %vm1930_vm2, %v2482_v48, %v2465_v3  ;;  %v2485_v2 = vsel %vm1930_vm2, %v2477_v41, %v2484_v35  ;;  %v2133_v10 = vperm.slane %v2125_v46, %v5421_v58  ;;  %v2134_v40 = vrot.slane %v2121_v5, 4 }
 0x2b3   : > { %v2073_v12 = vperm.slane %v2067_v36, %v5421_v58  ;;  %v2094_v19 = vrot.slane %v2085_v29, 4  ;;  %v2097_v62 = vsel %vm1930_vm2, 0.0, %v2096_v37  ;;  %2852 = vrot.lane.b32.xlu2 %v2483_v57, %s4740_s17  ;;  %2884 = vrot.lane.b32.xlu0 %v2485_v2, %s4741_s23  ;;  %v7126_v31 = vperm.slane %v2455_v47, %v5421_v58 }
 0x2b4   : > { %v2093_v48 = vsel %vm1930_vm2, 0.0, %v2092_v1  ;;  %v2497_v42 = vsel %vm1930_vm2, %v2096_v37, %v2085_v29  ;;  %v2137_v35 = vsel %vm1930_vm2, %v2121_v5, %v2136_v26  ;;  %v2467_v27 = vsel %vm1930_vm2, %v2466_v20, %v7051_v43 }
 0x2b5   : > { %v2123_v36 = vsel %vm1930_vm2, %v2122_v38, %v2105_v28  ;;  %v7134_v3 = vrot.slane %v2133_v10, 4  ;;  %v2155_v41 = vsel %vm1930_vm2, %v2154_v22, %v1794_v21  ;;  %v2166_v53 = vrot.slane %v1917_v11, 4 }
 0x2b6   : > { %v2502_v63 = vrot.slane %v2097_v62, 4  ;;  %v2135_v46 = vsel %vm1930_vm2, %v2134_v40, %v7085_v51  ;;  %v2480_v47 = vrot.slane %v7126_v31, 4  ;;  %v2157_v29 = vsel %vm1930_vm2, %v1876_v50, %v2156_v49 }
 0x2b7   : > { %v2090_v37 = vrot.slane %v2073_v12, 4  ;;  %v2095_v5 = vsel %vm1930_vm2, 0.0, %v2094_v19  ;;  %v2491_v26 = vrot.slane %v2093_v48, 4  ;;  %v2145_v20 = vperm.slane %v2137_v35, %v5421_v58 }
 0x2b8   : > { %v7144_v43 = vperm.slane %v2123_v36, %v5421_v58  ;;  %v7147_v28 = vperm.slane %v2467_v27, %v5421_v58  ;;  %v2161_v21 = vperm.slane %v2155_v41, %v5325_v9  ;;  %v2165_v51 = vperm.slane %v2157_v29, %v5325_v9 }
 0x2b9   : > { %v2141_v38 = vperm.slane %v2135_v46, %v5421_v58  ;;  %v7154_v49 = vsel %vm1930_vm2, 0.0, %v7134_v3  ;;  %v2167_v50 = vsel %vm1930_vm2, %v2166_v53, %v7094_v33  ;;  %v2169_v22 = vsel %vm1930_vm2, %v1917_v11, %v2168_v17 }
 0x2ba   : > { %v2481_v57 = vsel %vm1930_vm2, %v7147_v28, %v2480_v47  ;;  %v2180_v2 = vrot.slane %v2161_v21, 4  ;;  %v2173_v10 = vperm.slane %v2167_v50, %v5325_v9  ;;  %v2177_v40 = vperm.slane %v2169_v22, %v5325_v9 }
 0x2bb   : > { %v2152_v19 = vrot.slane %v2145_v20, 4  ;;  %2820 = vrot.lane.b32.xlu2 %v2481_v57, %s4739_s16  ;;  %v2192_v62 = vrot.slane %v2165_v51, 4  ;;  %v2091_v48 = vsel %vm1930_vm2, 0.0, %v2090_v37  ;;  %v2486_v35 = vsel %vm1930_vm2, %v2092_v1, %v2073_v12  ;;  %v1797_v1 = vpop.f32.mrf.mxu0  ;;  %v1879_v20 = vpop.f32.mrf.mxu2 }
 0x2bc   : > { %v2501_v17 = vperm.slane %v2497_v42, %v5325_v9  ;;  %v2178_v11 = vrot.slane %v2173_v10, 4  ;;  %v2503_v27 = vsel %vm1930_vm2, %v2502_v63, %v2095_v5  ;;  %v2150_v36 = vrot.slane %v2141_v38, 4  ;;  %v1920_v33 = vpop.f32.mrf.mxu3 }
 0x2bd   : > { %v2190_v41 = vrot.slane %v2177_v40, 4  ;;  %v2490_v53 = vperm.slane %v2486_v35, %v5325_v9  ;;  %v2492_v46 = vsel %vm1930_vm2, %v2491_v26, %v2091_v48  ;;  %v2146_v47 = vrot.slane %v7144_v43, 4 }
 0x2be   : > { %v2181_v37 = vsel %vm1930_vm2, %v2173_v10, %v2180_v2  ;;  %v2496_v12 = vperm.slane %v2492_v46, %v5325_v9  ;;  %v7176_v42 = vsel %vm1930_vm2, 0.0, %v2152_v19  ;;  %v2179_v63 = vsel %vm1930_vm2, %v2178_v11, %v2161_v21 }
 0x2bf   : > { %v2193_v5 = vsel %vm1930_vm2, %v2177_v40, %v2192_v62  ;;  %v2507_v50 = vperm.slane %v2503_v27, %v5325_v9  ;;  %v7182_v26 = vsel %vm1930_vm2, %v2152_v19, %v2141_v38  ;;  %v2510_v22 = vrot.slane %v2490_v53, 4 }
 0x2c0   : > { %v2522_v57 = vrot.slane %v2501_v17, 4  ;;  %v2210_v48 = vrot.slane %v1879_v20, 4  ;;  %v7185_v2 = vsel %vm1930_vm2, 0.0, %v2150_v36  ;;  %v2189_v10 = vperm.slane %v2181_v37, %v5421_v58 }
 0x2c1   : > { %v2191_v35 = vsel %vm1930_vm2, %v2190_v41, %v2165_v51  ;;  %v2212_v46 = vrot.slane %v1797_v1, 4  ;;  %v7191_v40 = vperm.slane %v2179_v63, %v5421_v58  ;;  %v2201_v38 = vperm.slane %v2193_v5, %v5421_v58  ;;  %v1838_v51 = vpop.f32.mrf.mxu1 }
 0x2c2   : > { %v2511_v19 = vsel %vm1930_vm2, %v2496_v12, %v2510_v22  ;;  %v2523_v11 = vsel %vm1930_vm2, %v2507_v50, %v2522_v57  ;;  %v2211_v27 = vsel %vm1930_vm2, %v2210_v48, %v1797_v1  ;;  %v2197_v41 = vperm.slane %v2191_v35, %v5421_v58 }
 0x2c3   : > { %v2519_v62 = vperm.slane %v2511_v19, %v5421_v58  ;;  %v2213_v36 = vsel %vm1930_vm2, %v1879_v20, %v2212_v46  ;;  %v2531_v37 = vperm.slane %v2523_v11, %v5421_v58  ;;  %v2217_v63 = vperm.slane %v2211_v27, %v5325_v9 }
 0x2c4   : > { %v2222_v54 = vrot.slane %v1920_v33, 4  ;;  %v7202_v21 = vrot.slane %v2189_v10, 4  ;;  %v2508_v22 = vrot.slane %v2496_v12, 4  ;;  %v2520_v29 = vrot.slane %v2507_v50, 4 }
 0x2c5   : > { %v2538_v5 = vrot.slane %v2519_v62, 4  ;;  %v2536_v19 = vrot.slane %v2531_v37, 4  ;;  %v2221_v57 = vperm.slane %v2213_v36, %v5325_v9  ;;  %v2236_v15 = vrot.slane %v2217_v63, 4 }
 0x2c6   : > { %v2223_v1 = vsel %vm1930_vm2, %v2222_v54, %v1838_v51  ;;  %v2509_v48 = vsel %vm1930_vm2, %v2508_v22, %v2490_v53  ;;  %v2521_v35 = vsel %vm1930_vm2, %v2520_v29, %v2501_v17  ;;  %v2224_v46 = vrot.slane %v1838_v51, 4  ;;  %v3823_v27 = vpop.permute.xlu1 %3822 }
 0x2c7   : > { %v2539_v20 = vsel %vm1930_vm2, %v2531_v37, %v2538_v5  ;;  %v2208_v11 = vrot.slane %v2201_v38, 4  ;;  %v2537_v10 = vsel %vm1930_vm2, %v2536_v19, %v2519_v62  ;;  %v7212_v12 = vperm.slane %v2509_v48, %v5421_v58 }
 0x2c8   : > { %2886 = vrot.lane.b32.xlu2 %v2539_v20, %s4741_s23  ;;  %v2229_v50 = vperm.slane %v2223_v1, %v5325_v9  ;;  %v7217_v54 = vsel %vm1930_vm2, 0.0, %v7202_v21  ;;  %2854 = vrot.lane.b32.xlu1 %v2537_v10, %s4740_s17  ;;  %v2225_v17 = vsel %vm1930_vm2, %v1920_v33, %v2224_v46  ;;  %v8436_v53 = vrot.slane %v6601_v34, 4  ;;  %v1800_v10 = vpop.f32.mrf.mxu0 }
 0x2c9   : > { %8435 = vst [vmem:[#allocation7_spill] sm:$0xff] %v7212_v12  ;;  %v2147_v38 = vsel %vm1930_vm2, 0.0, %v2146_v47  ;;  %v7227_v62 = vperm.slane %v2521_v35, %v5421_v58  ;;  %v2534_v36 = vrot.slane %v7212_v12, 4  ;;  %v2233_v51 = vperm.slane %v2225_v17, %v5325_v9 }
 0x2ca   : > { %v3481_v29 = vsel %vm1930_vm2, %v8436_v53, %v6591_v13  ;;  %v2234_v37 = vrot.slane %v2229_v50, 4  ;;  %v2248_v5 = vrot.slane %v2221_v57, 4  ;;  %v2237_v22 = vsel %vm1930_vm2, %v2229_v50, %v2236_v15 }
 0x2cb   : > { %8437 = vst [vmem:[#allocation6_spill] sm:$0xff] %v7227_v62  ;;  %v7233_v33 = vsel %vm375_vm0, %v3481_v29, %v3823_v27  ;;  %v2540_v13 = vsel %vm1930_vm2, %v7134_v3, %v7144_v43  ;;  %v2206_v34 = vrot.slane %v2197_v41, 4  ;;  %v2535_v47 = vsel %vm1930_vm2, %v7227_v62, %v2534_v36  ;;  %v1882_v36 = vpop.f32.mrf.mxu2 }
 0x2cc   : > { %v2235_v19 = vsel %vm1930_vm2, %v2234_v37, %v2217_v63  ;;  %v8438_v1 = vrot.slane %v7154_v49, 4  ;;  %v7245_v48 = vsel %vm1930_vm2, 0.0, %v2208_v11  ;;  %2822 = vrot.lane.b32.xlu0 %v2535_v47, %s4739_s16  ;;  %v2245_v15 = vperm.slane %v2237_v22, %v5421_v58  ;;  %v1841_v63 = vpop.f32.mrf.mxu1 }
 0x2cd   : > { %v2246_v35 = vrot.slane %v2233_v51, 4  ;;  %v2249_v3 = vsel %vm1930_vm2, %v2233_v51, %v2248_v5  ;;  %v7255_v49 = vperm.slane %v2235_v19, %v5421_v58  ;;  %v2544_v50 = vperm.slane %v2540_v13, %v5325_v9  ;;  %v1923_v13 = vpop.f32.mrf.mxu3 }
 0x2ce   : > { %v2546_v20 = vsel %vm1930_vm2, %v8438_v1, %v2147_v38  ;;  %v2257_v27 = vperm.slane %v2249_v3, %v5421_v58  ;;  %v2555_v53 = vperm.slane %v7182_v26, %v5325_v9  ;;  %v8439_v29 = vrot.slane %v7176_v42, 4 }
 0x2cf   : > { %v2550_v17 = vperm.slane %v2546_v20, %v5325_v9  ;;  %v7267_v51 = vsel %vm1930_vm2, 0.0, %v2206_v34  ;;  %v7270_v37 = vsel %vm1930_vm2, %v2208_v11, %v2197_v41  ;;  %v2268_v47 = vrot.slane %v1800_v10, 4 }
 0x2d0   : > { %v7250_v43 = vpop.permute.xlu2 %3820  ;;  %v2557_v38 = vsel %vm1930_vm2, %v8439_v29, %v7185_v2  ;;  %v2247_v26 = vsel %vm1930_vm2, %v2246_v35, %v2221_v57  ;;  %v2260_v19 = vrot.slane %v2245_v15, 4  ;;  %v8440_v42 = vrot.slane %v6830_v16, 4 }
 0x2d1   : > { %v2561_v22 = vperm.slane %v2557_v38, %v5325_v9  ;;  %v2258_v34 = vrot.slane %v7255_v49, 4  ;;  %v2564_v1 = vrot.slane %v2544_v50, 4  ;;  %v2576_v20 = vrot.slane %v2555_v53, 4  ;;  %v3829_v11 = vpop.permute.xlu1 %3828 }
 0x2d2   : > { %v3427_v2 = vsel %vm1930_vm2, %v8440_v42, %v6822_v44  ;;  %v2266_v41 = vrot.slane %v1882_v36, 4  ;;  %v7280_v3 = vrot.slane %v2257_v27, 4  ;;  %v2269_v29 = vsel %vm1930_vm2, %v1882_v36, %v2268_v47 }
 0x2d3   : > { %v2278_v38 = vrot.slane %v1923_v13, 4  ;;  %v2562_v5 = vrot.slane %v2550_v17, 4  ;;  %v2565_v57 = vsel %vm1930_vm2, %v2550_v17, %v2564_v1  ;;  %v2577_v15 = vsel %vm1930_vm2, %v2561_v22, %v2576_v20  ;;  %v3825_v35 = vpop.permute.xlu0 %3824 }
 0x2d4   : > { %v2267_v16 = vsel %vm1930_vm2, %v2266_v41, %v1800_v10  ;;  %v2277_v44 = vperm.slane %v2269_v29, %v5325_v9  ;;  %v2573_v42 = vperm.slane %v2565_v57, %v5421_v58  ;;  %v2585_v46 = vperm.slane %v2577_v15, %v5421_v58 }
 0x2d5   : > { %v2273_v27 = vperm.slane %v2267_v16, %v5325_v9  ;;  %v2563_v36 = vsel %vm1930_vm2, %v2562_v5, %v2544_v50  ;;  %v2574_v17 = vrot.slane %v2561_v22, 4  ;;  %v2279_v1 = vsel %vm1930_vm2, %v2278_v38, %v1841_v63 }
 0x2d6   : > { %v2304_v47 = vrot.slane %v2277_v44, 4  ;;  %v7292_v12 = vperm.slane %v2563_v36, %v5421_v58  ;;  %v2592_v20 = vrot.slane %v2573_v42, 4  ;;  %v2590_v41 = vrot.slane %v2585_v46, 4 }
 0x2d7   : > { %v2292_v10 = vrot.slane %v2273_v27, 4  ;;  %v2280_v29 = vrot.slane %v1841_v63, 4  ;;  %v2575_v57 = vsel %vm1930_vm2, %v2574_v17, %v2555_v53  ;;  %v2285_v16 = vperm.slane %v2279_v1, %v5325_v9 }
 0x2d8   : > { %v2588_v15 = vrot.slane %v7292_v12, 4  ;;  %v8441_v50 = vrot.slane %v6691_v45, 4  ;;  %v2593_v22 = vsel %vm1930_vm2, %v2585_v46, %v2592_v20  ;;  %v2591_v38 = vsel %vm1930_vm2, %v2590_v41, %v2573_v42  ;;  %v1885_v41 = vpop.f32.mrf.mxu2 }
 0x2d9   : > { %v7307_v36 = vperm.slane %v2575_v57, %v5421_v58  ;;  %v2281_v63 = vsel %vm1930_vm2, %v1923_v13, %v2280_v29  ;;  %2888 = vrot.lane.b32.xlu1 %v2593_v22, %s4741_s23  ;;  %2856 = vrot.lane.b32.xlu0 %v2591_v38, %s4740_s17  ;;  %v2290_v17 = vrot.slane %v2285_v16, 4  ;;  %v2293_v45 = vsel %vm1930_vm2, %v2285_v16, %v2292_v10 }
 0x2da   : > { %v7295_v62 = vpop.permute.xlu2 %3826  ;;  %v3643_v5 = vsel %vm1930_vm2, %v8441_v50, %v6685_v56  ;;  %v2289_v53 = vperm.slane %v2281_v63, %v5325_v9  ;;  %v7318_v46 = vperm.slane %v2247_v26, %v5421_v58  ;;  %v7322_v42 = vsel %vm375_vm0, %v3427_v2, %v7250_v43 }
 0x2db   : > { %v7315_v56 = vsel %vm375_vm0, %v3643_v5, %v3829_v11  ;;  %v2589_v13 = vsel %vm1930_vm2, %v7307_v36, %v2588_v15  ;;  %v2301_v1 = vperm.slane %v2293_v45, %v5421_v58  ;;  %v7328_v20 = vsel %vm1930_vm2, 0.0, %v2260_v19  ;;  %v1803_v45 = vpop.f32.mrf.mxu0 }
 0x2dc   : > { %2824 = vrot.lane.b32.xlu2 %v2589_v13, %s4739_s16  ;;  %v2291_v11 = vsel %vm1930_vm2, %v2290_v17, %v2273_v27  ;;  %v2302_v10 = vrot.slane %v2289_v53, 4  ;;  %v2305_v26 = vsel %vm1930_vm2, %v2289_v53, %v2304_v47  ;;  %v3835_v29 = vpop.permute.xlu1 %3834  ;;  %v7334_v43 = vsel %vm1930_vm2, 0.0, %v2258_v34 }
 0x2dd   : > { %v2648_v2 = vsel %vm1930_vm2, %v2260_v19, %v7255_v49  ;;  %v7339_v57 = vperm.slane %v2291_v11, %v5421_v58  ;;  %v8442_v15 = vrot.slane %v6705_v30, 4  ;;  %v7347_v27 = vsel %vm1930_vm2, 0.0, %v7280_v3 }
 0x2de   : > { %v2303_v47 = vsel %vm1930_vm2, %v2302_v10, %v2277_v44  ;;  %v7350_v50 = vrot.slane %v2301_v1, 4  ;;  %v2262_v19 = vrot.slane %v7318_v46, 4  ;;  %v2313_v5 = vperm.slane %v2305_v26, %v5421_v58 }
 0x2df   : > { %v3535_v16 = vsel %vm1930_vm2, %v8442_v15, %v6697_v25  ;;  %v3831_v49 = vpop.permute.xlu0 %3830  ;;  %v2322_v22 = vrot.slane %v1885_v41, 4  ;;  %v8443_v30 = vrot.slane %v7191_v40, 4  ;;  %v7361_v63 = vperm.slane %v2648_v2, %v5325_v9 }
 0x2e0   : > { %v7353_v34 = vsel %vm375_vm0, %v3535_v16, %v3825_v35  ;;  %v2653_v44 = vrot.slane %v7328_v20, 4  ;;  %v2594_v35 = vsel %vm1930_vm2, %v7202_v21, %v7191_v40  ;;  %v8444_v53 = vrot.slane %v7217_v54, 4 }
 0x2e1   : > { %v2203_v25 = vsel %vm1930_vm2, 0.0, %v8443_v30  ;;  %v2664_v13 = vrot.slane %v7347_v27, 4  ;;  %v7372_v1 = vperm.slane %v2303_v47, %v5421_v58  ;;  %v2314_v11 = vrot.slane %v7339_v57, 4  ;;  %v1844_v27 = vpop.f32.mrf.mxu1 }
 0x2e2   : > { %v3833_v38 = vpop.permute.xlu2 %3832  ;;  %v2600_v17 = vsel %vm1930_vm2, %v8444_v53, %v2203_v25  ;;  %v8445_v10 = vrot.slane %v6885_v7, 4  ;;  %v7383_v21 = vsel %vm1930_vm2, 0.0, %v7350_v50  ;;  %v2598_v40 = vperm.slane %v2594_v35, %v5325_v9 }
 0x2e3   : > { %v2604_v54 = vperm.slane %v2600_v17, %v5325_v9  ;;  %v2609_v26 = vperm.slane %v7270_v37, %v5325_v9  ;;  %v7389_v2 = vrot.slane %v2313_v5, 4  ;;  %v8446_v15 = vrot.slane %v7245_v48, 4 }
 0x2e4   : > { %v7379_v20 = vsel %vm1930_vm2, %v8445_v10, %v6882_v61  ;;  %v2323_v61 = vsel %vm1930_vm2, %v2322_v22, %v1803_v45  ;;  %v2324_v16 = vrot.slane %v1803_v45, 4  ;;  %v2618_v30 = vrot.slane %v2598_v40, 4 }
 0x2e5   : > { %v2611_v7 = vsel %vm1930_vm2, %v8446_v15, %v7267_v51  ;;  %v2630_v25 = vrot.slane %v2609_v26, 4  ;;  %v2329_v35 = vperm.slane %v2323_v61, %v5325_v9  ;;  %v2616_v37 = vrot.slane %v2604_v54, 4 }
 0x2e6   : > { %v2615_v47 = vperm.slane %v2611_v7, %v5325_v9  ;;  %v2325_v53 = vsel %vm1930_vm2, %v1885_v41, %v2324_v16  ;;  %v8447_v5 = vrot.slane %v6766_v6, 4  ;;  %v8448_v51 = vrot.slane %v6922_v4, 4  ;;  %v7410_v7 = vpop.permute.xlu1 %3856  ;;  %v1926_v16 = vpop.f32.mrf.mxu3 }
 0x2e7   : > { %v2619_v17 = vsel %vm1930_vm2, %v2604_v54, %v2618_v30  ;;  %v2333_v10 = vperm.slane %v2325_v53, %v5325_v9  ;;  %v2336_v15 = vrot.slane %v1844_v27, 4  ;;  %v2348_v4 = vrot.slane %v2329_v35, 4 }
 0x2e8   : > { %v3805_v48 = vsel %vm1930_vm2, %v8447_v5, %v6745_v18  ;;  %v3751_v22 = vsel %vm1930_vm2, %v8448_v51, %v6910_v39  ;;  %v2631_v45 = vsel %vm1930_vm2, %v2615_v47, %v2630_v25  ;;  %v2627_v41 = vperm.slane %v2619_v17, %v5421_v58  ;;  %v7424_v25 = vpop.permute.xlu0 %3852 }
 0x2e9   : > { %v2639_v6 = vperm.slane %v2631_v45, %v5421_v58  ;;  %v2617_v18 = vsel %vm1930_vm2, %v2616_v37, %v2598_v40  ;;  %v2628_v61 = vrot.slane %v2615_v47, 4  ;;  %v7419_v54 = vsel %vm375_vm0, %v3805_v48, %v3835_v29 }
 0x2ea   : > { %v7416_v39 = vperm.slane %v2617_v18, %v5421_v58  ;;  %v7422_v30 = vsel %vm375_vm0, %v3751_v22, %v3833_v38  ;;  %v2646_v53 = vrot.slane %v2627_v41, 4  ;;  %v8449_v40 = vrot.slane %v6788_v59, 4  ;;  %v7431_v37 = vpop.permute.xlu2 %3854 }
 0x2eb   : > { %v2644_v5 = vrot.slane %v2639_v6, 4  ;;  %v2629_v51 = vsel %vm1930_vm2, %v2628_v61, %v2609_v26  ;;  %v2334_v48 = vrot.slane %v1926_v16, 4  ;;  %v2337_v45 = vsel %vm1930_vm2, %v1926_v16, %v2336_v15 }
 0x2ec   : > { %v3697_v47 = vsel %vm1930_vm2, %v8449_v40, %v6769_v8  ;;  %v7434_v17 = vperm.slane %v2629_v51, %v5421_v58  ;;  %v2642_v29 = vrot.slane %v7416_v39, 4  ;;  %v2647_v22 = vsel %vm1930_vm2, %v2639_v6, %v2646_v53 }
 0x2ed   : > { %v7438_v38 = vsel %vm375_vm0, %v3697_v47, %v3831_v49  ;;  %v2645_v26 = vsel %vm1930_vm2, %v2644_v5, %v2627_v41  ;;  %v2263_v59 = vsel %vm1930_vm2, 0.0, %v2262_v19  ;;  %2890 = vrot.lane.b32.xlu0 %v2647_v22, %s4741_s23  ;;  %v2360_v8 = vrot.slane %v2333_v10, 4 }
 0x2ee   : > { %2858 = vrot.lane.b32.xlu2 %v2645_v26, %s4740_s17  ;;  %v2643_v18 = vsel %vm1930_vm2, %v7434_v17, %v2642_v29  ;;  %v2335_v49 = vsel %vm1930_vm2, %v2334_v48, %v1844_v27  ;;  %v2345_v61 = vperm.slane %v2337_v45, %v5325_v9  ;;  %v2654_v15 = vsel %vm1930_vm2, %v2653_v44, %v7334_v43  ;;  %v3863_v29 = vpop.permute.xlu1 %3862 }
 0x2ef   : > { %2826 = vrot.lane.b32.xlu1 %v2643_v18, %s4739_s16  ;;  %v2341_v41 = vperm.slane %v2335_v49, %v5325_v9  ;;  %v2659_v19 = vsel %vm1930_vm2, %v7280_v3, %v7318_v46  ;;  %v2665_v6 = vsel %vm1930_vm2, %v2664_v13, %v2263_v59  ;;  %v2658_v27 = vperm.slane %v2654_v15, %v5325_v9 }
 0x2f0   : > { %v2358_v16 = vrot.slane %v2345_v61, 4  ;;  %v2361_v53 = vsel %vm1930_vm2, %v2345_v61, %v2360_v8  ;;  %v2663_v5 = vperm.slane %v2659_v19, %v5325_v9  ;;  %v2669_v43 = vperm.slane %v2665_v6, %v5325_v9 }
 0x2f1   : > { %v2346_v51 = vrot.slane %v2341_v41, 4  ;;  %v2349_v40 = vsel %vm1930_vm2, %v2341_v41, %v2348_v4  ;;  %v2369_v47 = vperm.slane %v2361_v53, %v5421_v58  ;;  %v2672_v46 = vrot.slane %v7361_v63, 4 }
 0x2f2   : > { %v2357_v44 = vperm.slane %v2349_v40, %v5421_v58  ;;  %v2359_v3 = vsel %vm1930_vm2, %v2358_v16, %v2333_v10  ;;  %v2684_v13 = vrot.slane %v2663_v5, 4  ;;  %v2321_v48 = vsel %vm1930_vm2, 0.0, %v7389_v2  ;;  %v7478_v18 = vpop.permute.xlu0 %3858  ;;  %v3861_v41 = vpop.permute.xlu2 %3860 }
 0x2f3   : > { %v2702_v22 = vsel %vm1930_vm2, %v7350_v50, %v7339_v57  ;;  %v2347_v4 = vsel %vm1930_vm2, %v2346_v51, %v2329_v35  ;;  %v7474_v26 = vperm.slane %v2359_v3, %v5421_v58  ;;  %v2376_v45 = vrot.slane %v2369_v47, 4 }
 0x2f4   : > { %v2673_v59 = vsel %vm1930_vm2, %v2658_v27, %v2672_v46  ;;  %v2685_v10 = vsel %vm1930_vm2, %v2669_v43, %v2684_v13  ;;  %v2670_v8 = vrot.slane %v2658_v27, 4  ;;  %v2318_v49 = vrot.slane %v7372_v1, 4 }
 0x2f5   : > { %v2707_v61 = vrot.slane %v7383_v21, 4  ;;  %v7485_v50 = vsel %vm375_vm0, %v7379_v20, %v7295_v62  ;;  %v2681_v35 = vperm.slane %v2673_v59, %v5421_v58  ;;  %v2315_v15 = vsel %vm1930_vm2, 0.0, %v2314_v11 }
 0x2f6   : > { %v2706_v19 = vperm.slane %v2702_v22, %v5325_v9  ;;  %v2718_v6 = vrot.slane %v2321_v48, 4  ;;  %v7492_v16 = vrot.slane %v2357_v44, 4  ;;  %v7495_v53 = vperm.slane %v2347_v4, %v5421_v58 }
 0x2f7   : > { %v2374_v21 = vrot.slane %v7474_v26, 4  ;;  %v2693_v62 = vperm.slane %v2685_v10, %v5421_v58  ;;  %v2700_v20 = vrot.slane %v2681_v35, 4  ;;  %v2377_v27 = vsel %vm1930_vm2, 0.0, %v2376_v45  ;;  %v3885_v10 = vpop.permute.xlu1 %3884 }
 0x2f8   : > { %v2767_v57 = vsel %vm1930_vm2, %v2376_v45, %v7474_v26  ;;  %v2671_v11 = vsel %vm1930_vm2, %v2670_v8, %v7361_v63  ;;  %v2682_v51 = vrot.slane %v2669_v43, 4  ;;  %v2319_v3 = vsel %vm1930_vm2, 0.0, %v2318_v49 }
 0x2f9   : > { %v2701_v40 = vsel %vm1930_vm2, %v2693_v62, %v2700_v20  ;;  %v2698_v47 = vrot.slane %v2693_v62, 4  ;;  %v7506_v44 = vperm.slane %v2671_v11, %v5421_v58  ;;  %v2373_v46 = vsel %vm1930_vm2, 0.0, %v7492_v16 }
 0x2fa   : > { %2892 = vrot.lane.b32.xlu2 %v2701_v40, %s4741_s23  ;;  %v2683_v13 = vsel %vm1930_vm2, %v2682_v51, %v2663_v5  ;;  %vm2914_vm11 = vcmask 130048   ;;  %v2708_v48 = vsel %vm1930_vm2, %v2707_v61, %v2315_v15  ;;  %v2713_v26 = vsel %vm1930_vm2, %v7389_v2, %v7372_v1  ;;  %v3867_v51 = vpop.permute.xlu2 %3866 }
 0x2fb   : > { %v2699_v63 = vsel %vm1930_vm2, %v2698_v47, %v2681_v35  ;;  %v7516_v43 = vperm.slane %v2683_v13, %v5421_v58  ;;  %v2696_v22 = vrot.slane %v7506_v44, 4  ;;  %v2712_v4 = vperm.slane %v2708_v48, %v5325_v9 }
 0x2fc   : > { %2860 = vrot.lane.b32.xlu1 %v2699_v63, %s4740_s17  ;;  %v2719_v5 = vsel %vm1930_vm2, %v2718_v6, %v2319_v3  ;;  %v2726_v45 = vrot.slane %v2706_v19, 4  ;;  %v7527_v59 = vsel %vm2914_vm11, %v7438_v38, %v3863_v29  ;;  %v2370_v8 = vrot.slane %v7495_v53, 4  ;;  %v3865_v29 = vpop.permute.xlu0 %3864 }
 0x2fd   : > { %v2697_v49 = vsel %vm1930_vm2, %v7516_v43, %v2696_v22  ;;  %v2717_v61 = vperm.slane %v2713_v26, %v5325_v9  ;;  %v2723_v35 = vperm.slane %v2719_v5, %v5325_v9  ;;  %v2772_v15 = vrot.slane %v2377_v27, 4 }
 0x2fe   : > { %2828 = vrot.lane.b32.xlu0 %v2697_v49, %s4739_s16  ;;  %v2727_v1 = vsel %vm1930_vm2, %v2712_v4, %v2726_v45  ;;  %v2724_v2 = vrot.slane %v2712_v4, 4  ;;  %v7538_v38 = vsel %vm2914_vm11, %v7315_v56, %v3861_v41  ;;  %v2761_v6 = vrot.slane %v2373_v46, 4 }
 0x2ff   : > { %v2735_v62 = vperm.slane %v2727_v1, %v5421_v58  ;;  %v2738_v20 = vrot.slane %v2717_v61, 4  ;;  %v2736_v11 = vrot.slane %v2723_v35, 4  ;;  %v3916_v27 = vsel %vm2914_vm11, %v7322_v42, %v7424_v25  ;;  %v3891_v49 = vpop.permute.xlu1 %3890 }
 0x300   : > { %v2725_v40 = vsel %vm1930_vm2, %v2724_v2, %v2706_v19  ;;  %vm2923_vm6 = vcmask 195584   ;;  %v7547_v47 = vsel %vm2914_vm11, %v7419_v54, %v3867_v51  ;;  %v2375_v13 = vsel %vm1930_vm2, 0.0, %v2374_v21 }
 0x301   : > { %v2739_v56 = vsel %vm1930_vm2, %v2723_v35, %v2738_v20  ;;  %v2754_v41 = vrot.slane %v2735_v62, 4  ;;  %v7551_v3 = vperm.slane %v2725_v40, %v5421_v58  ;;  %v2737_v46 = vsel %vm1930_vm2, %v2736_v11, %v2717_v61 }
 0x302   : > { %v2747_v48 = vperm.slane %v2739_v56, %v5421_v58  ;;  %v2371_v42 = vsel %vm1930_vm2, 0.0, %v2370_v8  ;;  %v2771_v25 = vperm.slane %v2767_v57, %v5325_v9  ;;  %v7559_v19 = vperm.slane %v2737_v46, %v5421_v58  ;;  %v3889_v51 = vpop.permute.xlu2 %3888 }
 0x303   : > { %v2750_v54 = vrot.slane %v7551_v3, 4  ;;  %v3919_v4 = vsel %vm2914_vm11, %v7485_v50, %v7478_v18  ;;  %v7567_v21 = vsel %vm2923_vm6, %v3916_v27, %v3885_v10  ;;  %v2756_v26 = vsel %vm1930_vm2, %v7492_v16, %v7495_v53 }
 0x304   : > { %v2755_v63 = vsel %vm1930_vm2, %v2747_v48, %v2754_v41  ;;  %v2752_v22 = vrot.slane %v2747_v48, 4  ;;  %v2762_v5 = vsel %vm1930_vm2, %v2761_v6, %v2371_v42  ;;  %v2773_v45 = vsel %vm1930_vm2, %v2772_v15, %v2375_v13  ;;  %v3887_v6 = vpop.permute.xlu0 %3886 }
 0x305   : > { %2894 = vrot.lane.b32.xlu1 %v2755_v63, %s4741_s23  ;;  %v2751_v57 = vsel %vm1930_vm2, %v7559_v19, %v2750_v54  ;;  %v2760_v18 = vperm.slane %v2756_v26, %v5325_v9  ;;  %v2766_v50 = vperm.slane %v2762_v5, %v5325_v9  ;;  %v2777_v10 = vperm.slane %v2773_v45, %v5325_v9 }
 0x306   : > { %v2753_v8 = vsel %vm1930_vm2, %v2752_v22, %v2735_v62  ;;  %2830 = vrot.lane.b32.xlu2 %v2751_v57, %s4739_s16  ;;  %v3918_v61 = vsel %vm2914_vm11, %v7353_v34, %v7410_v7  ;;  %v2792_v16 = vrot.slane %v2771_v25, 4  ;;  %v7588_v53 = vsel %vm2914_vm11, %v7422_v30, %v3865_v29 }
 0x307   : > { %2862 = vrot.lane.b32.xlu0 %v2753_v8, %s4740_s17  ;;  %v4079_v35 = vrot.slane %v7567_v21, 5  ;;  %v2780_v15 = vrot.slane %v2760_v18, 4  ;;  %v2778_v1 = vrot.slane %v2766_v50, 4  ;;  %v2790_v2 = vrot.slane %v2777_v10, 4 }
 0x308   : > { %v4122_v9 = vrot.slane %v7567_v21, 7  ;;  %v4177_v62 = vrot.slane %v7567_v21, 1  ;;  %v2793_v20 = vsel %vm1930_vm2, %v2777_v10, %v2792_v16  ;;  %v7595_v34 = vsel %vm2923_vm6, %v3919_v4, %v3891_v49 }
 0x309   : > { %v2781_v7 = vsel %vm1930_vm2, %v2766_v50, %v2780_v15  ;;  %v2801_v30 = vperm.slane %v2793_v20, %v5421_v58  ;;  %v2779_v29 = vsel %vm1930_vm2, %v2778_v1, %v2760_v18  ;;  %v2791_v11 = vsel %vm1930_vm2, %v2790_v2, %v2771_v25 }
 0x30a   : > { %v2789_v27 = vperm.slane %v2781_v7, %v5421_v58  ;;  %v7603_v40 = vperm.slane %v2779_v29, %v5421_v58  ;;  %vm4078_vm8 = vcmask 1042432   ;;  %vm4121_vm10 = vcmask 1040384  }
 0x30b   : > { %v2806_v56 = vrot.slane %v2801_v30, 4  ;;  %vm4176_vm15 = vcmask 1046528   ;;  %v4074_v41 = vrot.slane %v7595_v34, 5  ;;  %v4117_v46 = vrot.slane %v7595_v34, 7 }
 0x30c   : > { %v2808_v13 = vrot.slane %v2789_v27, 4  ;;  %v7608_v48 = vperm.slane %v2791_v11, %v5421_v58  ;;  %v2804_v42 = vrot.slane %v7603_v40, 4  ;;  %v7612_v25 = vsel %vm2923_vm6, %v3918_v61, %v3889_v51  ;;  %v3893_v49 = vpop.permute.xlu0 %3892 }
 0x30d   : > { %v2807_v54 = vsel %vm1930_vm2, %v2806_v56, %v2789_v27  ;;  %v7620_v63 = vsel %vm4078_vm8, %v4074_v41, %v4079_v35  ;;  %v7625_v22 = vsel %vm4121_vm10, %v4117_v46, %v4122_v9  ;;  %v4182_v58 = vrot.slane %v7595_v34, 1  ;;  %v2853_v51 = vpop.permute.xlu2 %2852 }
 0x30e   : > { %v3917_v4 = vsel %vm2914_vm11, %v7233_v33, %v7431_v37  ;;  %2864 = vrot.lane.b32.xlu2 %v2807_v54, %s4740_s17  ;;  %v2809_v57 = vsel %vm1930_vm2, %v2801_v30, %v2808_v13  ;;  %v2805_v26 = vsel %vm1930_vm2, %v7608_v48, %v2804_v42  ;;  %v3702_v45 = vrot.slane %v6826_v24, 4  ;;  %s254_s17 = sand.u32 1, %s4727_s19  }
 0x30f   : > { %2896 = vrot.lane.b32.xlu0 %v2809_v57, %s4741_s23  ;;  %2832 = vrot.lane.b32.xlu1 %v2805_v26, %s4739_s16  ;;  %v7638_v5 = vsel %vm4176_vm15, %v4182_v58, %v4177_v62  ;;  %v4125_v8 = vrot.slane %v7612_v25, 7  ;;  %v4180_v33 = vrot.slane %v7612_v25, 1  ;;  %v8280_v37 = vrot.slane %v7612_v25, 5  ;;  %s4382_s6 = sshll.u32 %s254_s17, 6 }
 0x310   : > { %v7645_v18 = vsel %vm2923_vm6, %v3917_v4, %v3887_v6  ;;  %v3810_v50 = vrot.slane %v7001_v32, 4  ;;  %v3756_v10 = vrot.slane %v6916_v55, 4  ;;  %v3993_v61 = vrot.slane %v7567_v21, 3  ;;  %s7874_s13 = scalar_lea.vmem [#allocation2], %s4382_s6 }
 0x311   : > { %v7651_v16 = vsel %vm4121_vm10, %v4125_v8, %v4117_v46  ;;  %v7654_v24 = vsel %vm4176_vm15, %v4180_v33, %v4182_v58  ;;  %v4036_v15 = vrot.slane %v7567_v21, 4  ;;  %v3703_v1 = vsel %vm1930_vm2, %v6833_v60, %v3702_v45  ;;  %s4289_s14 = sshll.u32 %s7874_s13, 4  ;;  %s4290_s14 = int_to_ptr.vmem [resolvable:$true] %s4289_s14 }
 0x312   : > { %v4080_v2 = vrot.slane %v7645_v18, 5  ;;  %v4123_v32 = vrot.slane %v7645_v18, 7  ;;  %v4178_v55 = vrot.slane %v7645_v18, 1  ;;  %v3811_v6 = vsel %vm1930_vm2, %v6988_v14, %v3810_v50 }
 0x313   : > { %v3757_v20 = vsel %vm1930_vm2, %v6919_v23, %v3756_v10  ;;  %v7668_v7 = vsel %vm2923_vm6, %v7538_v38, %v3893_v49  ;;  %v3982_v30 = vrot.slane %v7595_v34, 3  ;;  %v4031_v60 = vrot.slane %v7595_v34, 4  ;;  %v3960_v23 = vld [vmem:[%s8236_s3 + $0x80] sm:$0xff] }
 0x314   : > { %v7675_v29 = vsel %vm4078_vm8, %v4080_v2, %v8280_v37  ;;  %v7678_v11 = vsel %vm4121_vm10, %v4123_v32, %v4125_v8  ;;  %v4179_v14 = vsel %vm4176_vm15, %v4177_v62, %v4178_v55  ;;  %v7686_v38 = vsel %vm4176_vm15, %v4178_v55, %v4180_v33  ;;  %v7724_v8 = vld [vmem:[%s8237_s4] ss:$0 sm:$0xff] }
 0x315   : > { %v3994_v56 = vrot.slane %v7645_v18, 3  ;;  %v4037_v46 = vrot.slane %v7645_v18, 4  ;;  %v7693_v13 = vmul.f32 %v3960_v23, %v7668_v7  ;;  %vm3992_vm9 = vcmask 1044480   ;;  %v7738_v49 = vld [vmem:[%s8236_s3 + $0x20] sm:$0xff] }
 0x316   : > { %3894 = vrot.lane.b32.xlu2 %v3703_v1, %s4741_s23  ;;  %v2883_v27 = vpop.permute.xlu1 %2882  ;;  %vm4035_vm13 = vcmask 1043456   ;;  %v7698_v62 = vsel %vm3992_vm9, %v3982_v30, %v3993_v61  ;;  %v2424_v54 = vrot.slane %v7078_v52, 4  ;;  %v7715_v57 = vsel %vm4078_vm8, %v4079_v35, %v4080_v2  ;;  %v7731_v35 = vld [vmem:[%s8236_s3] sm:$0xff] }
 0x317   : > { %3898 = vrot.lane.b32.xlu0 %v3811_v6, %s4741_s23  ;;  %3896 = vrot.lane.b32.xlu1 %v3757_v20, %s4741_s23  ;;  %v7703_v42 = vsel %vm4035_vm13, %v4031_v60, %v4036_v15  ;;  %v3995_v58 = vsel %vm3992_vm9, %v3993_v61, %v3994_v56  ;;  %v4038_v4 = vsel %vm4035_vm13, %v4036_v15, %v4037_v46  ;;  %v2478_v45 = vrot.slane %v7147_v28, 4  ;;  %v2851_v52 = vpop.permute.xlu0 %2850  ;;  %v7762_v20 = vld [vmem:[%s8236_s3 + $0x8] sm:$0xff]  ;;  %s4276_s23 = scalar_lea.sflag [#allocation3], %s254_s17 }
 0x318   : > { %v4124_v26 = vsel %vm4121_vm10, %v4122_v9, %v4123_v32  ;;  %v2425_v50 = vsel %vm1930_vm2, %v2424_v54, %v7054_v0  ;;  %v2821_v9 = vpop.permute.xlu2 %2820  ;;  %v4015_v1 = vmul.f32 %v7698_v62, %v7731_v35  ;;  %v7750_v32 = vld [vmem:[%s8236_s3 + $0x40] sm:$0xff]  ;;  %v4058_v6 = vmul.f32 %v7703_v42, %v7738_v49 }
 0x319   : > { %v2479_v0 = vsel %vm1930_vm2, %v2478_v45, %v7126_v31  ;;  %v7757_v31 = vld [vmem:[%s8236_s3 + $0x60] sm:$0xff]  ;;  %v4101_v54 = vmul.f32 %v7620_v63, %v7750_v32 }
 0x31a   : > { %v2907_v2 = vsel %vm375_vm0, %v2479_v0, %v2821_v9  ;;  %v4144_v9 = vmul.f32 %v7625_v22, %v7757_v31 }
 0x31b   : > { %v2916_v45 = vsel %vm2914_vm11, %v2907_v2, %v2853_v51  ;;  %v7786_v51 = vld [vmem:[%s8236_s3 + $0xa0] sm:$0xff] }
 0x31e   : > { %v2819_v33 = vpop.permute.xlu1 %2818 }
 0x31f   : > { %v2906_v10 = vsel %vm375_vm0, %v2425_v50, %v2819_v33  ;;  %v2640_v33 = vrot.slane %v7434_v17, 4  ;;  %v7771_v50 = vld [vmem:[%s8236_s3 + $0x28] sm:$0xff] }
 0x320   : > { %v2915_v28 = vsel %vm2914_vm11, %v2906_v10, %v2851_v52  ;;  %v7781_v17 = vld [vmem:[%s8236_s3 + $0x48] sm:$0xff]  ;;  %v4059_v22 = vmul.f32 %v4038_v4, %v7771_v50 }
 0x321   : > { %v2924_v61 = vsel %vm2923_vm6, %v2915_v28, %v2883_v27 }
 0x322   : > { %v3936_v15 = vadd.f32 %v7724_v8, %v2924_v61  ;;  %v4016_v61 = vmul.f32 %v3995_v58, %v7762_v20 }
 0x324   : > { %v4023_v55 = vadd.f32 %v4015_v1, %v3936_v15  ;;  %v4160_v15 = vmul.f32 %v3960_v23, %v7567_v21  ;;  %v4102_v21 = vmul.f32 %v7715_v57, %v7781_v17 }
 0x325   : > { %v2885_v52 = vpop.permute.xlu0 %2884 }
 0x326   : > { %v4066_v27 = vadd.f32 %v4058_v6, %v4023_v55  ;;  %v2925_v10 = vsel %vm2923_vm6, %v2916_v45, %v2885_v52  ;;  %v7793_v55 = vld [vmem:[%s8236_s3 + $0x68] sm:$0xff]  ;;  %v7798_v6 = vld [vmem:[%s8236_s3 + $0xc0] sm:$0xff] }
 0x327   : > { %v3937_v0 = vadd.f32 %v7724_v8, %v2925_v10  ;;  %v7810_v52 = vld [vmem:[%s8236_s3 + $0x88] sm:$0xff]  ;;  %v7815_v10 = vld [vmem:[%s8236_s3 + $0xe0] sm:$0xff] }
 0x328   : > { %v4109_v28 = vadd.f32 %v4101_v54, %v4066_v27  ;;  %v7802_v27 = vsel %vm1930_vm2, %v2640_v33, %v7416_v39  ;;  %v4203_v54 = vmul.f32 %v4179_v14, %v7786_v51  ;;  %v4145_v39 = vmul.f32 %v4124_v26, %v7793_v55 }
 0x329   : > { %v4024_v2 = vadd.f32 %v4016_v61, %v3937_v0  ;;  %v3996_v14 = vrot.slane %v7612_v25, 3  ;;  %v4039_v61 = vrot.slane %v7612_v25, 4  ;;  %v7825_v0 = vld [vmem:[%s8236_s3 + $0xa8] sm:$0xff]  ;;  %v4161_v26 = vmul.f32 %v7810_v52, %v7645_v18 }
 0x32a   : > { %v4152_v1 = vadd.f32 %v4144_v9, %v4109_v28  ;;  %v4219_v9 = vmul.f32 %v3995_v58, %v7798_v6  ;;  %v4235_v58 = vmul.f32 %v4038_v4, %v7815_v10  ;;  %v7866_v18 = vld [vmem:[%s8236_s3 + $0xe8] sm:$0xff] }
 0x32b   : > { %v4067_v45 = vadd.f32 %v4059_v22, %v4024_v2  ;;  %v2694_v2 = vrot.slane %v7516_v43, 4  ;;  %v3997_v37 = vsel %vm3992_vm9, %v3994_v56, %v3996_v14  ;;  %v4040_v4 = vsel %vm4035_vm13, %v4037_v46, %v4039_v61  ;;  %v7861_v56 = vld [vmem:[%s8236_s3 + $0xc8] sm:$0xff] }
 0x32c   : > { %v4168_v23 = vadd.f32 %v4160_v15, %v4152_v1  ;;  %v7830_v15 = vld [vmem:[%s8236_s3 + $0x100] sm:$0xff]  ;;  %v7851_v43 = vsel %vm3992_vm9, %v3996_v14, %v3982_v30  ;;  %v4220_v30 = vmul.f32 %v3997_v37, %v7861_v56  ;;  %v7872_v46 = vld [vmem:[%s8236_s3 + $0x108] sm:$0xff]  ;;  %v4236_v14 = vmul.f32 %v4040_v4, %v7866_v18 }
 0x32d   : > { %v4110_v28 = vadd.f32 %v4102_v21, %v4067_v45  ;;  %8450 = vst [vmem:[#allocation8_spill] sm:$0xff] %v7830_v15  ;;  %v4204_v21 = vmul.f32 %v7686_v38, %v7825_v0  ;;  %v7856_v38 = vsel %vm4035_vm13, %v4039_v61, %v4031_v60  ;;  %v8452_v60 = vrot.slane %v7612_v25, 5 }
 0x32e   : > { %v4211_v33 = vadd.f32 %v4203_v54, %v4168_v23  ;;  %v4251_v54 = vmul.f32 %v7715_v57, %v7830_v15  ;;  %8451 = vst [vmem:[#allocation9_spill] sm:$0xff] %v7872_v46  ;;  %v2748_v61 = vrot.slane %v7559_v19, 4  ;;  %v7905_v19 = vld [vmem:[%s8236_s3 + $0x10] sm:$0xff] }
 0x32f   : > { %v4153_v22 = vadd.f32 %v4145_v39, %v4110_v28 }
 0x330   : > { %v4227_v1 = vadd.f32 %v4219_v9, %v4211_v33  ;;  %v7883_v33 = vsel %vm4078_vm8, %v8452_v60, %v4074_v41  ;;  %v7887_v9 = vsel %vm1930_vm2, %v2694_v2, %v7506_v44  ;;  %v7898_v41 = vsel %vm1930_vm2, %v2748_v61, %v7551_v3  ;;  %v8454_v44 = vld [vmem:[#allocation7_spill] sm:$0xff] }
 0x331   : > { %v4169_v45 = vadd.f32 %v4161_v26, %v4153_v22  ;;  %v4252_v26 = vmul.f32 %v7675_v29, %v7872_v46  ;;  %v8453_v22 = vld [vmem:[#allocation6_spill] sm:$0xff]  ;;  %v2802_v61 = vrot.slane %v7608_v48, 4  ;;  %v7935_v48 = vld [vmem:[%s8236_s3 + $0x90] sm:$0xff] }
 0x332   : > { %v4243_v23 = vadd.f32 %v4235_v58, %v4227_v1 }
 0x333   : > { %v4212_v39 = vadd.f32 %v4204_v21, %v4169_v45  ;;  %v2532_v21 = vrot.slane %v8453_v22, 4  ;;  %v7927_v22 = vld [vmem:[%s8236_s3 + $0x70] sm:$0xff] }
 0x334   : > { %v4259_v57 = vadd.f32 %v4251_v54, %v4243_v23  ;;  %v2887_v23 = vpop.permute.xlu2 %2886 }
 0x335   : > { %v4228_v28 = vadd.f32 %v4220_v30, %v4212_v39  ;;  %v2533_v2 = vsel %vm1930_vm2, %v2532_v21, %v8454_v44  ;;  %v7912_v30 = vld [vmem:[%s8236_s3 + $0x30] sm:$0xff]  ;;  %v2586_v21 = vrot.slane %v7307_v36, 4  ;;  %v4146_v44 = vmul.f32 %v7678_v11, %v7927_v22 }
 0x336   : > { %4267 = vst.msk [vmem:[%s7874_s13] sm:$0xff] %vm832_vm1, %v4259_v57  ;;  %v7946_v36 = vld [vmem:[%s8236_s3 + $0xb0] sm:$0xff] }
 0x337   : > { %v4244_v1 = vadd.f32 %v4236_v14, %v4228_v28  ;;  %v4017_v28 = vmul.f32 %v3997_v37, %v7905_v19  ;;  %v7961_v11 = vld [vmem:[%s8236_s3 + $0xd0] sm:$0xff] }
 0x338   : > { %8455 = vst [vmem:[#allocation10_spill] sm:$0xff] %v7961_v11 }
 0x339   : > { %v4260_v58 = vadd.f32 %v4252_v26, %v4244_v1  ;;  %v7921_v26 = vld [vmem:[%s8236_s3 + $0x50] sm:$0xff]  ;;  %v4060_v1 = vmul.f32 %v4040_v4, %v7912_v30  ;;  %v7939_v4 = vsel %vm1930_vm2, %v2802_v61, %v7603_v40  ;;  %v7956_v40 = vld [vmem:[%s8236_s3 + $0x18] sm:$0xff] }
 0x33a   : > { %v2855_v45 = vpop.permute.xlu1 %2854  ;;  %v4103_v37 = vmul.f32 %v7675_v29, %v7921_v26  ;;  %v4162_v29 = vmul.f32 %v7935_v48, %v7612_v25  ;;  %v4205_v25 = vmul.f32 %v7654_v24, %v7946_v36  ;;  %v7976_v61 = vld [vmem:[%s8236_s3 + $0xf0] sm:$0xff]  ;;  %v4018_v24 = vmul.f32 %v7851_v43, %v7956_v40 }
 0x33b   : > { %4268 = vst.msk [vmem:[%s7874_s13 + $0x8] sm:$0xff] %vm832_vm1, %v4260_v58 }
 0x33c   : > { %v2825_v60 = vpop.permute.xlu2 %2824  ;;  %8456 = vst [vmem:[#allocation5_spill] sm:$0xff] %v7976_v61 }
 0x33e   : > { %v2823_v54 = vpop.permute.xlu0 %2822 }
 0x33f   : > { %v2908_v57 = vsel %vm375_vm0, %v2533_v2, %v2823_v54  ;;  %v2587_v54 = vsel %vm1930_vm2, %v2586_v21, %v7292_v12  ;;  %v4221_v21 = vmul.f32 %v7851_v43, %v7961_v11  ;;  %v4237_v43 = vmul.f32 %v7856_v38, %v7976_v61 }
 0x340   : > { %v2917_v39 = vsel %vm2914_vm11, %v2908_v57, %v2855_v45  ;;  %v2909_v57 = vsel %vm375_vm0, %v2587_v54, %v2825_v60 }
 0x341   : > { %v2926_v3 = vsel %vm2923_vm6, %v2917_v39, %v2887_v23 }
 0x342   : > { %v3938_v14 = vadd.f32 %v7724_v8, %v2926_v3 }
 0x344   : > { %v4025_v58 = vadd.f32 %v4017_v28, %v3938_v14  ;;  %v7971_v14 = vld [vmem:[%s8236_s3 + $0x38] sm:$0xff] }
 0x346   : > { %v4068_v23 = vadd.f32 %v4060_v1, %v4025_v58 }
 0x348   : > { %v4111_v2 = vadd.f32 %v4103_v37, %v4068_v23  ;;  %v7965_v3 = vpop.permute.xlu2 %2858  ;;  %v7987_v23 = vld [vmem:[%s8236_s3 + $0x58] sm:$0xff] }
 0x34a   : > { %v4154_v45 = vadd.f32 %v4146_v44, %v4111_v2  ;;  %v7992_v44 = vld [vmem:[%s8236_s3 + $0x110] sm:$0xff]  ;;  %v4061_v2 = vmul.f32 %v7856_v38, %v7971_v14 }
 0x34b   : > { %v2857_v39 = vpop.permute.xlu0 %2856  ;;  %v2889_v12 = vpop.permute.xlu1 %2888  ;;  %8457 = vst [vmem:[#allocation11_spill] sm:$0xff] %v7992_v44 }
 0x34c   : > { %v4170_v28 = vadd.f32 %v4162_v29, %v4154_v45  ;;  %v2918_v60 = vsel %vm2914_vm11, %v2909_v57, %v2857_v39  ;;  %v8001_v45 = vld [vmem:[%s8236_s3 + $0x78] sm:$0xff]  ;;  %v4104_v57 = vmul.f32 %v7883_v33, %v7987_v23 }
 0x34d   : > { %v2927_v1 = vsel %vm2923_vm6, %v2918_v60, %v2889_v12  ;;  %v4147_v38 = vmul.f32 %v7651_v16, %v8001_v45 }
 0x34e   : > { %v4213_v58 = vadd.f32 %v4205_v25, %v4170_v28  ;;  %v3939_v37 = vadd.f32 %v7724_v8, %v2927_v1  ;;  %v4253_v25 = vmul.f32 %v7883_v33, %v7992_v44  ;;  %v8010_v28 = vld [vmem:[%s8236_s3 + $0x98] sm:$0xff] }
 0x350   : > { %v4229_v29 = vadd.f32 %v4221_v21, %v4213_v58  ;;  %v4026_v54 = vadd.f32 %v4018_v24, %v3939_v37  ;;  %v8017_v24 = vld [vmem:[%s8236_s3 + $0xb8] sm:$0xff]  ;;  %v4163_v58 = vmul.f32 %v8010_v28, %v7595_v34 }
 0x351   : > { %v8026_v37 = vld [vmem:[%s8236_s3 + $0xd8] sm:$0xff]  ;;  %v4206_v16 = vmul.f32 %v7638_v5, %v8017_v24 }
 0x352   : > { %v4245_v39 = vadd.f32 %v4237_v43, %v4229_v29  ;;  %v4069_v12 = vadd.f32 %v4061_v2, %v4026_v54  ;;  %8458 = vst [vmem:[#allocation30_spill] sm:$0xff] %v8026_v37  ;;  %v8033_v29 = vld [vmem:[%s8236_s3 + $0xf8] sm:$0xff]  ;;  %v4222_v34 = vmul.f32 %v7698_v62, %v8026_v37 }
 0x353   : > { %8459 = vst [vmem:[#allocation13_spill] sm:$0xff] %v8033_v29  ;;  %v8040_v54 = vld [vmem:[%s8236_s3 + $0x118] sm:$0xff] }
 0x354   : > { %v4261_v60 = vadd.f32 %v4253_v25, %v4245_v39  ;;  %v4112_v1 = vadd.f32 %v4104_v57, %v4069_v12  ;;  %v2893_v33 = vpop.permute.xlu2 %2892  ;;  %8460 = vst [vmem:[#allocation28_spill] sm:$0xff] %v8040_v54  ;;  %v4238_v57 = vmul.f32 %v7703_v42, %v8033_v29  ;;  %v4254_v5 = vmul.f32 %v7620_v63, %v8040_v54 }
 0x355   : > { %v4085_v63 = vrot.slane %v7668_v7, 5 }
 0x356   : > { %v4155_v21 = vadd.f32 %v4147_v38, %v4112_v1  ;;  %4269 = vst.msk [vmem:[%s7874_s13 + $0x10] sm:$0xff] %vm832_vm1, %v4261_v60 }
 0x358   : > { %v4171_v2 = vadd.f32 %v4163_v58, %v4155_v21 }
 0x35a   : > { %v4214_v43 = vadd.f32 %v4206_v16, %v4171_v2  ;;  %v3999_v16 = vrot.slane %v7668_v7, 3 }
 0x35c   : > { %v4230_v39 = vadd.f32 %v4222_v34, %v4214_v43  ;;  %v4042_v34 = vrot.slane %v7668_v7, 4 }
 0x35e   : > { %v4246_v25 = vadd.f32 %v4238_v57, %v4230_v39 }
 0x35f   : > { %v2891_v62 = vpop.permute.xlu0 %2890 }
 0x360   : > { %v2831_v12 = vpop.permute.xlu2 %2830  ;;  %v4262_v38 = vadd.f32 %v4254_v5, %v4246_v25 }
 0x361   : > { %v2827_v60 = vpop.permute.xlu1 %2826 }
 0x362   : > { %4270 = vst.msk [vmem:[%s7874_s13 + $0x18] sm:$0xff] %vm832_vm1, %v4262_v38 }
 0x368   : > { %v2865_v1 = vpop.permute.xlu2 %2864 }
 0x36e   : > { %v2861_v58 = vpop.permute.xlu1 %2860 }
 0x370   : > { %v2829_v21 = vpop.permute.xlu0 %2828  ;;  %v3895_v42 = vpop.permute.xlu2 %3894 }
 0x371   : > { %v2911_v2 = vsel %vm375_vm0, %v7887_v9, %v2829_v21  ;;  %v8056_v57 = vsel %vm2923_vm6, %v7527_v59, %v3895_v42  ;;  %v4128_v9 = vrot.slane %v7668_v7, 7 }
 0x372   : > { %v2920_v43 = vsel %vm2914_vm11, %v2911_v2, %v2861_v58  ;;  %v4000_v5 = vrot.slane %v8056_v57, 3  ;;  %v8283_v25 = vrot.slane %v8056_v57, 4  ;;  %v8285_v38 = vrot.slane %v8056_v57, 5 }
 0x373   : > { %v2929_v39 = vsel %vm2923_vm6, %v2920_v43, %v2893_v33  ;;  %v8290_v21 = vrot.slane %v8056_v57, 7  ;;  %v8292_v44 = vrot.slane %v8056_v57, 1  ;;  %v4184_v58 = vrot.slane %v7668_v7, 1 }
 0x374   : > { %v8067_v2 = vsel %vm3992_vm9, %v3999_v16, %v4000_v5  ;;  %v8072_v59 = vsel %vm4035_vm13, %v4042_v34, %v8283_v25  ;;  %v8077_v33 = vsel %vm4078_vm8, %v4085_v63, %v8285_v38  ;;  %v3941_v42 = vadd.f32 %v7724_v8, %v2929_v39 }
 0x375   : > { %v4020_v43 = vmul.f32 %v8067_v2, %v7762_v20  ;;  %v4130_v7 = vsel %vm4121_vm10, %v4128_v9, %v8290_v21  ;;  %v8088_v54 = vsel %vm4176_vm15, %v4184_v58, %v8292_v44  ;;  %v4063_v61 = vmul.f32 %v8072_v59, %v7771_v50 }
 0x376   : > { %v4106_v39 = vmul.f32 %v8077_v33, %v7781_v17  ;;  %v4149_v15 = vmul.f32 %v4130_v7, %v7793_v55  ;;  %v4165_v21 = vmul.f32 %v7810_v52, %v8056_v57  ;;  %v2910_v50 = vsel %vm375_vm0, %v7802_v27, %v2827_v60 }
 0x377   : > { %v4028_v25 = vadd.f32 %v4020_v43, %v3941_v42  ;;  %v2895_v29 = vpop.permute.xlu1 %2894  ;;  %v2919_v55 = vsel %vm2914_vm11, %v2910_v50, %v7965_v3 }
 0x379   : > { %v4071_v38 = vadd.f32 %v4063_v61, %v4028_v25  ;;  %v2863_v46 = vpop.permute.xlu0 %2862  ;;  %v2912_v61 = vsel %vm375_vm0, %v7898_v41, %v2831_v12 }
 0x37b   : > { %v4114_v20 = vadd.f32 %v4106_v39, %v4071_v38  ;;  %v2928_v38 = vsel %vm2923_vm6, %v2919_v55, %v2891_v62  ;;  %v8461_v55 = vrot.slane %v8056_v57, 4 }
 0x37c   : > { %v3940_v62 = vadd.f32 %v7724_v8, %v2928_v38 }
 0x37d   : > { %v4157_v11 = vadd.f32 %v4149_v15, %v4114_v20  ;;  %v2921_v15 = vsel %vm2914_vm11, %v2912_v61, %v2863_v46 }
 0x37f   : > { %v8097_v37 = vadd.f32 %v4165_v21, %v4157_v11  ;;  %v2930_v21 = vsel %vm2923_vm6, %v2921_v15, %v2895_v29 }
 0x381   : > { %v2897_v44 = vpop.permute.xlu0 %2896  ;;  %v2833_v42 = vpop.permute.xlu1 %2832 }
 0x382   : > { %v2913_v17 = vsel %vm375_vm0, %v7939_v4, %v2833_v42 }
 0x383   : > { %v2922_v52 = vsel %vm2914_vm11, %v2913_v17, %v2865_v1 }
 0x384   : > { %v2931_v46 = vsel %vm2923_vm6, %v2922_v52, %v2897_v44  ;;  %v3942_v44 = vadd.f32 %v7724_v8, %v2930_v21 }
 0x385   : > { %v3943_v42 = vadd.f32 %v7724_v8, %v2931_v46 }
 0x389   : > { %v3899_v11 = vpop.permute.xlu0 %3898  ;;  %v3897_v25 = vpop.permute.xlu1 %3896 }
 0x38a   : > { %v3931_v27 = vsel %vm2923_vm6, %v7547_v47, %v3899_v11  ;;  %v3930_v41 = vsel %vm2923_vm6, %v7588_v53, %v3897_v25 }
 0x38b   : > { %v3983_v4 = vrot.slane %v3931_v27, 3  ;;  %v4032_v12 = vrot.slane %v3931_v27, 4  ;;  %v4075_v60 = vrot.slane %v3931_v27, 5  ;;  %v4118_v3 = vrot.slane %v3931_v27, 7 }
 0x38c   : > { %v4189_v43 = vrot.slane %v3931_v27, 1  ;;  %v4002_v1 = vrot.slane %v3930_v41, 3  ;;  %v4045_v7 = vrot.slane %v3930_v41, 4  ;;  %v4131_v38 = vrot.slane %v3930_v41, 7 }
 0x38d   : > { %v8117_v39 = vsel %vm3992_vm9, %v3983_v4, %v3999_v16  ;;  %v8120_v29 = vsel %vm4035_vm13, %v4032_v12, %v4042_v34  ;;  %v8123_v47 = vsel %vm4078_vm8, %v4075_v60, %v4085_v63  ;;  %v4143_v53 = vsel %vm4121_vm10, %v4118_v3, %v4128_v9 }
 0x38e   : > { %v4019_v20 = vmul.f32 %v8117_v39, %v7731_v35  ;;  %v4062_v16 = vmul.f32 %v8120_v29, %v7738_v49  ;;  %v4202_v34 = vsel %vm4176_vm15, %v4189_v43, %v4184_v58  ;;  %v4105_v63 = vmul.f32 %v8123_v47, %v7750_v32 }
 0x38f   : > { %v4003_v9 = vsel %vm3992_vm9, %v4000_v5, %v4002_v1  ;;  %v4004_v61 = vsel %vm3992_vm9, %v4002_v1, %v3983_v4  ;;  %v4046_v8 = vsel %vm4035_vm13, %v8461_v55, %v4045_v7  ;;  %v4047_v49 = vsel %vm4035_vm13, %v4045_v7, %v4032_v12 }
 0x390   : > { %v4027_v50 = vadd.f32 %v4019_v20, %v3940_v62  ;;  %v4021_v17 = vmul.f32 %v4003_v9, %v7905_v19  ;;  %v4022_v35 = vmul.f32 %v4004_v61, %v7956_v40  ;;  %v4148_v58 = vmul.f32 %v4143_v53, %v7757_v31 }
 0x391   : > { %v4064_v52 = vmul.f32 %v4046_v8, %v7912_v30  ;;  %v4088_v32 = vrot.slane %v3930_v41, 5  ;;  %v4065_v25 = vmul.f32 %v4047_v49, %v7971_v14  ;;  %v8462_v40 = vrot.slane %v8056_v57, 5 }
 0x392   : > { %v4070_v15 = vadd.f32 %v4062_v16, %v4027_v50  ;;  %v4029_v11 = vadd.f32 %v4021_v17, %v3942_v44  ;;  %v4030_v5 = vadd.f32 %v4022_v35, %v3943_v42  ;;  %v4187_v46 = vrot.slane %v3930_v41, 1 }
 0x393   : > { %v4089_v21 = vsel %vm4078_vm8, %v8462_v40, %v4088_v32  ;;  %v4090_v4 = vsel %vm4078_vm8, %v4088_v32, %v4075_v60  ;;  %v8463_v53 = vrot.slane %v8056_v57, 7  ;;  %v4133_v62 = vsel %vm4121_vm10, %v4131_v38, %v4118_v3  ;;  %v8468_v32 = vld [vmem:[#allocation9_spill] sm:$0xff] }
 0x394   : > { %v4113_v19 = vadd.f32 %v4105_v63, %v4070_v15  ;;  %v4072_v12 = vadd.f32 %v4064_v52, %v4029_v11  ;;  %v4073_v1 = vadd.f32 %v4065_v25, %v4030_v5  ;;  %v4107_v31 = vmul.f32 %v4089_v21, %v7921_v26  ;;  %v8470_v11 = vld [vmem:[#allocation5_spill] sm:$0xff]  ;;  %v8471_v25 = vld [vmem:[#allocation28_spill] sm:$0xff] }
 0x395   : > { %v4108_v30 = vmul.f32 %v4090_v4, %v7987_v23  ;;  %v4132_v14 = vsel %vm4121_vm10, %v8463_v53, %v4131_v38  ;;  %v8464_v20 = vrot.slane %v8056_v57, 1  ;;  %v4151_v50 = vmul.f32 %v4133_v62, %v8001_v45 }
 0x396   : > { %v4156_v7 = vadd.f32 %v4148_v58, %v4113_v19  ;;  %v4115_v42 = vadd.f32 %v4107_v31, %v4072_v12  ;;  %v4150_v16 = vmul.f32 %v4132_v14, %v7927_v22  ;;  %v4207_v26 = vmul.f32 %v8088_v54, %v7786_v51 }
 0x397   : > { %v4188_v44 = vsel %vm4176_vm15, %v8464_v20, %v4187_v46  ;;  %v4116_v60 = vadd.f32 %v4108_v30, %v4073_v1  ;;  %v4190_v63 = vsel %vm4176_vm15, %v4187_v46, %v4189_v43  ;;  %v4167_v57 = vmul.f32 %v8010_v28, %v3931_v27 }
 0x398   : > { %v4172_v23 = vadd.f32 %v7693_v13, %v4156_v7  ;;  %v4208_v3 = vmul.f32 %v4188_v44, %v7825_v0  ;;  %v4158_v17 = vadd.f32 %v4150_v16, %v4115_v42  ;;  %v4166_v55 = vmul.f32 %v7935_v48, %v3930_v41 }
 0x399   : > { %v4159_v35 = vadd.f32 %v4151_v50, %v4116_v60  ;;  %v4223_v22 = vmul.f32 %v8067_v2, %v7798_v6  ;;  %v4224_v51 = vmul.f32 %v4003_v9, %v7861_v56  ;;  %v4210_v13 = vmul.f32 %v4202_v34, %v8017_v24  ;;  %v8465_v6 = vld [vmem:[#allocation30_spill] sm:$0xff]  ;;  %v8467_v34 = vld [vmem:[#allocation8_spill] sm:$0xff] }
 0x39a   : > { %v4215_v45 = vadd.f32 %v4207_v26, %v4172_v23  ;;  %v4216_v15 = vadd.f32 %v4208_v3, %v8097_v37  ;;  %v4174_v54 = vadd.f32 %v4166_v55, %v4158_v17  ;;  %v4209_v0 = vmul.f32 %v4190_v63, %v7946_v36  ;;  %v8466_v9 = vld [vmem:[#allocation10_spill] sm:$0xff] }
 0x39b   : > { %v4175_v43 = vadd.f32 %v4167_v57, %v4159_v35  ;;  %v4239_v28 = vmul.f32 %v8072_v59, %v7815_v10  ;;  %v4240_v41 = vmul.f32 %v4046_v8, %v7866_v18  ;;  %v4226_v37 = vmul.f32 %v8117_v39, %v8465_v6  ;;  %v8469_v18 = vld [vmem:[#allocation13_spill] sm:$0xff] }
 0x39c   : > { %v4231_v27 = vadd.f32 %v4223_v22, %v4215_v45  ;;  %v4232_v48 = vadd.f32 %v4224_v51, %v4216_v15  ;;  %v4217_v2 = vadd.f32 %v4209_v0, %v4174_v54  ;;  %v4225_v24 = vmul.f32 %v4004_v61, %v8466_v9 }
 0x39d   : > { %v4218_v56 = vadd.f32 %v4210_v13, %v4175_v43  ;;  %v4255_v58 = vmul.f32 %v8077_v33, %v8467_v34  ;;  %v4256_v10 = vmul.f32 %v4089_v21, %v8468_v32  ;;  %v4242_v59 = vmul.f32 %v8120_v29, %v8469_v18  ;;  %v8472_v21 = vld [vmem:[#allocation11_spill] sm:$0xff] }
 0x39e   : > { %v4247_v36 = vadd.f32 %v4239_v28, %v4231_v27  ;;  %v4248_v52 = vadd.f32 %v4240_v41, %v4232_v48  ;;  %v4233_v39 = vadd.f32 %v4225_v24, %v4217_v2  ;;  %v4241_v61 = vmul.f32 %v4047_v49, %v8470_v11 }
 0x39f   : > { %v4234_v8 = vadd.f32 %v4226_v37, %v4218_v56  ;;  %v4258_v38 = vmul.f32 %v8123_v47, %v8471_v25  ;;  %v4257_v46 = vmul.f32 %v4090_v4, %v8472_v21 }
 0x3a0   : > { %v4263_v33 = vadd.f32 %v4255_v58, %v4247_v36  ;;  %v4264_v5 = vadd.f32 %v4256_v10, %v4248_v52  ;;  %v4249_v19 = vadd.f32 %v4241_v61, %v4233_v39 }
 0x3a1   : > { %v4250_v40 = vadd.f32 %v4242_v59, %v4234_v8 }
 0x3a2   : > { %4271 = vst.msk [vmem:[%s7874_s13 + $0x20] sm:$0xff] %vm832_vm1, %v4263_v33  ;;  %v4265_v29 = vadd.f32 %v4257_v46, %v4249_v19 }
 0x3a3   : > { %v4266_v12 = vadd.f32 %v4258_v38, %v4250_v40  ;;  %4272 = vst.msk [vmem:[%s7874_s13 + $0x28] sm:$0xff] %vm832_vm1, %v4264_v5 }
 0x3a4   : > { %4273 = vst.msk [vmem:[%s7874_s13 + $0x30] sm:$0xff] %vm832_vm1, %v4265_v29 }
 0x3a5   : > { %4274 = vst.msk [vmem:[%s7874_s13 + $0x38] sm:$0xff] %vm832_vm1, %v4266_v12 }
 0x3a6   : > { %4700 = shalt.err (!%p4697_p3)
}
 0x3a7   : > { %s4742_s17 = smov 128  }
 0x3a8   : > { %4499 = dma.vmem_to_hbm [thread:$0]  (%p4811_p5), %s4290_s14, 1024, %s4292_s15, %s4276_s23, %s4742_s17, %s4742_s17, %s4739_s16  }
 0x3a9 PF: > { %p4505_p4 = scmp.ge.s32.totalorder %s4735_s21, 2  ;;  %s4306_s13 = sand.u32 1, %s4723_s18  }
 0x3aa   : > { %s4307_s10 = scalar_lea.sflag [#allocation3], %s4306_s13 }
 0x3ab   : > { %p4502_p7 = pnand %p4505_p4, %p4815_p6 }
 0x3ad   : > { %p4503_p8 = pneg %p4502_p7 }
 0x3af   : > { %4718 = dma.done.wait (%p4503_p8), %s4307_s10, 1024  }
 0x3b0   : > { %4720 = vsyncadd (%p4503_p8), %s4307_s10, 4294966272  ;;  %p15_p9 = scmp.ge.s32.totalorder %s4798_s24, 4   ;;  %s8473_s18 = smov %s4727_s19 }
 0x3b1   : > { %s8474_s19 = smov %s4731_s20  ;;  %s8475_s20 = smov %s4809_s27 }
 0x3b2   : > { %s8476_s21 = smov %s4798_s24  ;;  %17 = sbr.rel (!%p15_p9) target bundleno = 3 (0x3), region = 81 }
 0x3b7   :  { %4313 = vsyncpa [#allocation3], 1 }
 0x3b8   :  { %4315 = vsyncpa [#allocation3 + $0x1], 1 }

</bundles_post_ra>
